<compile_context>
chip_gen: v7x
topology: tpu7x:2x2x1
jax: 0.10.0
libtpu: 0.0.40
codegen_flags: <defaults>
</compile_context>

<pallas_src>
import numpy as np

import jax
import jax.numpy as jnp
from jax.experimental import pallas as pl
from jax.experimental.pallas import tpu as pltpu


# ----------------------------------------------------------------------------
# Layer plan (mirrors Feature_extractor_unshare.__init__)
# ----------------------------------------------------------------------------
def build_layer_config(depth, base_ic, base_oc, base_dilation):
    """Returns a list of (in_ch, out_ch, dilation, is_residual) per layer."""
    cfg = []
    ic, oc, dil = base_ic, base_oc, base_dilation
    for i in range(depth):
        if i % 2 == 1:
            dil *= 2
        cfg.append((ic, oc, dil, ic == oc))
        ic = oc
        if i % 2 == 1 and i < depth - 1:
            oc *= 2
    return cfg


def _round_up(x, m):
    return ((x + m - 1) // m) * m


# ----------------------------------------------------------------------------
# Fused Pallas kernel
# ----------------------------------------------------------------------------
def _make_fused_kernel(cfg, cpads, moffs, H, W, padl, Bc, use_norm, eps):
    n_layers = len(cfg)
    HW = H * W
    NL = Bc * HW
    inv_hw = np.float32(1.0 / HW)

    def kernel(*refs):
        x_ref = refs[0]                       # (1, Cpad0, NL)
        masks_ref = refs[1]                   # (sum_l 9*Cpad_l, NL) f32 {0,1}
        w_refs = refs[2:2 + n_layers]         # (Cout_l, 9*Cpad_l) bf16
        o_ref = refs[2 + n_layers]            # (1, Cout_last, NL)
        act_ref = refs[3 + n_layers]          # (C_max, padl + NL + padl) f32
        patch_ref = refs[4 + n_layers]        # (9*C_max, NL) f32

        c_max = act_ref.shape[0]

        # Zero ONLY the halo bands (interior is fully overwritten below).
        # Done every grid step: on v7x megacore each TC has its own scratch,
        # so this must not be gated on program_id == 0.
        zero_halo = jnp.zeros((c_max, padl), jnp.float32)
        act_ref[:, 0:padl] = zero_halo
        act_ref[:, padl + NL:padl + NL + padl] = zero_halo

        # Place this batch-chunk's channel-padded input in the interior.
        act_ref[0:cpads[0], padl:padl + NL] = x_ref[0]

        for li in range(n_layers):
            _, cout, dil, residual = cfg[li]
            cp = cpads[li]
            moff = moffs[li]

            # ---- im2col: 9 shifted + masked copies of the resident activation.
            # The per-(layer, tap) mask zeroes every out-of-image read (border
            # positions and cross-image bleed between the Bc concatenated
            # images), so no explicit zero padding of activations is needed.
            for kh in range(3):
                for kw in range(3):
                    oh = (kh - 1) * dil
                    ow = (kw - 1) * dil
                    s = oh * W + ow
                    t = kh * 3 + kw
                    shifted = act_ref[0:cp, padl + s:padl + s + NL]
                    mask = masks_ref[moff + t * cp:moff + (t + 1) * cp, :]
                    patch_ref[t * cp:(t + 1) * cp, :] = shifted * mask

            # ---- one native bf16 MXU matmul per layer, f32 accumulation.
            patches = patch_ref[0:9 * cp, :].astype(jnp.bfloat16)
            y = jnp.dot(w_refs[li][...], patches,
                        preferred_element_type=jnp.float32)    # (Cout, NL) f32

            # ---- per-image epilogue: InstanceNorm (stats per image segment),
            # activation, residual.  All in f32 (v5e has no bf16 VPU/EUP).
            for b in range(Bc):
                lo = b * HW
                yb = y[:, lo:lo + HW]
                if use_norm:
                    mu = jnp.sum(yb, axis=1, keepdims=True) * inv_hw
                    ms = jnp.sum(yb * yb, axis=1, keepdims=True) * inv_hw
                    var = ms - mu * mu
                    yb = (yb - mu) * jax.lax.rsqrt(var + eps)
                if residual:
                    # ResConv2d: ReLU(norm(conv(x))) + x (x read from resident act)
                    yb = (jnp.maximum(yb, 0.0) +
                          act_ref[0:cout, padl + lo:padl + lo + HW])
                else:
                    yb = jnp.where(yb >= 0.0, yb, 0.1 * yb)    # LeakyReLU(0.1)

                if li == n_layers - 1:
                    o_ref[0, :, lo:lo + HW] = yb.astype(o_ref.dtype)
                else:
                    act_ref[0:cout, padl + lo:padl + lo + HW] = yb

    return kernel


def build_forward(cfg, use_norm=True, eps=1e-5, max_lanes_per_step=2048):
    """Returns a jitted forward(x_nchw, weights) for the static layer plan.

    weights[l] is the HWIO (3, 3, in_ch, out_ch) kernel of layer l.
    """
    n_layers = len(cfg)

    @jax.jit
    def forward(x_nchw, weights):
        B, cin0, H, W = x_nchw.shape
        HW = H * W
        assert cin0 == cfg[0][0]
        for l in range(1, n_layers):
            assert cfg[l][0] == cfg[l - 1][1]

        # Channel padding so every sublane offset inside the kernel is aligned
        # (zero weight columns keep the math exact).
        cpads = [_round_up(cfg[0][0], 8)]
        for l in range(1, n_layers):
            assert cfg[l][0] % 8 == 0, "intermediate channel counts must be x8"
            cpads.append(cfg[l][0])
        c_max = max(cpads + [oc for (_, oc, _, _) in cfg])

        # Batch chunking: fold Bc images into the matmul N dimension, keeping
        # >= 2 "parallel" grid steps when B >= 2 (v7x has 2 TensorCores).
        bc_cap = max(1, max_lanes_per_step // HW)
        n_steps = 1 if B <= 1 else max(2, pl.cdiv(B, bc_cap))
        Bc = pl.cdiv(B, n_steps)
        B_pad = n_steps * Bc
        NL = Bc * HW

        # Halo width of the flat activation buffer (>= largest tap shift).
        max_shift = max(d * W + d for (_, _, d, _) in cfg)
        padl = _round_up(max_shift, 128)

        # Pack weights HWIO -> (Cout, 9*Cpad) and cast to bf16 (native MXU fmt).
        packed = []
        for l, ((ic, oc, _, _), w) in enumerate(zip(cfg, weights)):
            cp = cpads[l]
            wp = jnp.pad(w, ((0, 0), (0, 0), (0, cp - ic), (0, 0)))
            packed.append(jnp.transpose(wp.reshape(9 * cp, oc)).astype(jnp.bfloat16))

        # Border-validity masks: per (layer, tap), tiled over the Bc images and
        # pre-broadcast to Cpad sublanes at trace time (numpy; all static).
        hh = np.repeat(np.arange(H), W)
        ww = np.tile(np.arange(W), H)
        rows, moffs, off = [], [], 0
        for l, (_, _, dil, _) in enumerate(cfg):
            cp = cpads[l]
            moffs.append(off)
            for kh in range(3):
                for kw in range(3):
                    oh, ow = (kh - 1) * dil, (kw - 1) * dil
                    ok = ((hh + oh >= 0) & (hh + oh < H) &
                          (ww + ow >= 0) & (ww + ow < W)).astype(np.float32)
                    rows.append(np.broadcast_to(np.tile(ok, Bc), (cp, NL)))
            off += 9 * cp
        masks = jnp.asarray(np.concatenate(rows, axis=0))     # (sum 9*cp, NL)

        # NCHW -> (n_steps, Cpad0, Bc*HW): channel pad, batch pad, layout plumbing.
        xp = x_nchw.reshape(B, cin0, HW).astype(jnp.float32)
        if cpads[0] != cin0:
            xp = jnp.pad(xp, ((0, 0), (0, cpads[0] - cin0), (0, 0)))
        if B_pad != B:
            xp = jnp.pad(xp, ((0, B_pad - B), (0, 0), (0, 0)))
        xp = xp.reshape(n_steps, Bc, cpads[0], HW)
        xp = jnp.transpose(xp, (0, 2, 1, 3)).reshape(n_steps, cpads[0], NL)

        oc_last = cfg[-1][1]
        kernel = _make_fused_kernel(cfg, cpads, moffs, H, W, padl, Bc,
                                    use_norm, eps)

        in_specs = [
            pl.BlockSpec((1, cpads[0], NL), lambda i: (i, 0, 0)),
            pl.BlockSpec(masks.shape, lambda i: (0, 0)),
        ] + [pl.BlockSpec(pw.shape, lambda i: (0, 0)) for pw in packed]

        out = pl.pallas_call(
            kernel,
            out_shape=jax.ShapeDtypeStruct((n_steps, oc_last, NL), jnp.float32),
            grid=(n_steps,),
            in_specs=in_specs,
            out_specs=pl.BlockSpec((1, oc_last, NL), lambda i: (i, 0, 0)),
            scratch_shapes=[
                pltpu.VMEM((c_max, padl + NL + padl), jnp.float32),
                pltpu.VMEM((9 * c_max, NL), jnp.float32),
            ],
            compiler_params=pltpu.CompilerParams(
                dimension_semantics=("parallel",)),
        )(xp, masks, *packed)

        # (n_steps, Cout, Bc*HW) -> (B, Cout, H, W)
        out = out.reshape(n_steps, oc_last, Bc, HW)
        out = jnp.transpose(out, (0, 2, 1, 3)).reshape(B_pad, oc_last, H, W)
        return out[:B]

    return forward


# ----------------------------------------------------------------------------
# Pure-JAX reference for validation
# ----------------------------------------------------------------------------
def reference_forward(x_nchw, weights, cfg, use_norm=True, eps=1e-5,
                      bf16_mxu=False):
    x = x_nchw
    for w, (_, _, dil, residual) in zip(weights, cfg):
        lhs, rhs, kwargs = x, w, {}
        if bf16_mxu:
            lhs = lhs.astype(jnp.bfloat16)
            rhs = rhs.astype(jnp.bfloat16)
        else:
            kwargs["precision"] = jax.lax.Precision.HIGHEST
        y = jax.lax.conv_general_dilated(
            lhs, rhs,
            window_strides=(1, 1),
            padding=((dil, dil), (dil, dil)),
            rhs_dilation=(dil, dil),
            dimension_numbers=("NCHW", "HWIO", "NCHW"),
            preferred_element_type=jnp.float32, **kwargs)
        if use_norm:  # InstanceNorm2d(affine=False), eps=1e-5, biased variance
            mu = jnp.mean(y, axis=(2, 3), keepdims=True)
            var = jnp.mean((y - mu) ** 2, axis=(2, 3), keepdims=True)
            y = (y - mu) * jax.lax.rsqrt(var + eps)
        if residual:
            x = jnp.maximum(y, 0.0) + x           # ResConv2d: ReLU(norm(conv)) + x
        else:
            x = jnp.where(y >= 0.0, y, 0.1 * y)    # Conv2d + LeakyReLU(0.1)
    return x


if __name__ == "__main__":
    # Exactly the regis_model configuration of Feature_extractor_unshare:
    #   depth=4, base_ic=3, base_oc=8, base_dilation=1, norm=InstanceNorm2d
    # Layer plan: Conv(3->8,d1) -> Res(8->8,d2) -> Conv(8->16,d2) -> Res(16->16,d4)
    depth, base_ic, base_oc, base_dilation = 4, 3, 8, 1
    B, H, W = 4, 16, 16           # B=4 -> 2 grid steps of Bc=2 images each

    cfg = build_layer_config(depth, base_ic, base_oc, base_dilation)

    key = jax.random.PRNGKey(0)
    key, xkey = jax.random.split(key)
    weights = []
    for (ic, oc, _, _) in cfg:
        key, sub = jax.random.split(key)
        weights.append(0.1 * jax.random.normal(sub, (3, 3, ic, oc), jnp.float32))
    weights = tuple(weights)

    x = jax.random.normal(xkey, (B, base_ic, H, W), dtype=jnp.float32)

    forward = build_forward(cfg, use_norm=True)
    out = jax.block_until_ready(forward(x, weights))

    # Apples-to-apples reference: same bf16 MXU operands, f32 accumulation.
    ref_bf16 = jax.block_until_ready(
        reference_forward(x, weights, cfg, use_norm=True, bf16_mxu=True))
    assert out.shape == ref_bf16.shape, (out.shape, ref_bf16.shape)
    err_bf16 = float(jnp.max(jnp.abs(out - ref_bf16)))
    assert err_bf16 < 5e-3, f"mismatch vs bf16-operand reference: {err_bf16}"

    # Sanity check vs the full-f32 module semantics (bf16 MXU operands introduce
    # an expected small deviation on InstanceNorm-scaled O(1) features).
    ref_f32 = jax.block_until_ready(
        reference_forward(x, weights, cfg, use_norm=True, bf16_mxu=False))
    err_f32 = float(jnp.max(jnp.abs(out - ref_f32)))
    assert err_f32 < 2.5e-1, f"gross mismatch vs f32 reference: {err_f32}"

    print("KERNEL_OK")
</pallas_src>

<mosaic_0001>
module attributes {stable_mosaic.version = 11 : i64} {
  func.func @kernel(%arg0: i32, %arg1: memref<1x8x512xf32, #tpu.memory_space<vmem>>, %arg2: memref<360x512xf32, #tpu.memory_space<vmem>>, %arg3: memref<8x72xbf16, #tpu.memory_space<vmem>>, %arg4: memref<8x72xbf16, #tpu.memory_space<vmem>>, %arg5: memref<16x72xbf16, #tpu.memory_space<vmem>>, %arg6: memref<16x144xbf16, #tpu.memory_space<vmem>>, %arg7: memref<1x16x512xf32, #tpu.memory_space<vmem>>, %arg8: memref<16x768xf32, #tpu.memory_space<vmem>>, %arg9: memref<144x512xf32, #tpu.memory_space<vmem>>) attributes {dimension_semantics = [#tpu.dimension_semantics<parallel>], iteration_bounds = array<i64: 2>, scalar_prefetch = 0 : i64, scratch_operands = 2 : i64, tpu.core_type = #tpu.core_type<tc>, window_params = [{transform_indices = @transform_0, window_bounds = array<i64: 1, 8, 512>}, {pipeline_mode = #tpu.pipeline_mode<synchronous>, transform_indices = @transform_1, window_bounds = array<i64: 360, 512>}, {pipeline_mode = #tpu.pipeline_mode<synchronous>, transform_indices = @transform_2, window_bounds = array<i64: 8, 72>}, {pipeline_mode = #tpu.pipeline_mode<synchronous>, transform_indices = @transform_3, window_bounds = array<i64: 8, 72>}, {pipeline_mode = #tpu.pipeline_mode<synchronous>, transform_indices = @transform_4, window_bounds = array<i64: 16, 72>}, {pipeline_mode = #tpu.pipeline_mode<synchronous>, transform_indices = @transform_5, window_bounds = array<i64: 16, 144>}, {transform_indices = @transform_6, window_bounds = array<i64: 1, 16, 512>}]} {
    %cst = arith.constant 0.000000e+00 : f32
    %0 = vector.broadcast %cst : f32 to vector<16x128xf32>
    %c0 = arith.constant 0 : index
    %c0_0 = arith.constant 0 : index
    %1 = vector.load %arg8[%c0, %c0_0] : memref<16x768xf32, #tpu.memory_space<vmem>>, vector<16x128xf32>
    tpu.vector_store %arg8[%c0, %c0_0], %0 {strides = array<i32>} : memref<16x768xf32, #tpu.memory_space<vmem>>, vector<16x128xf32>,
    %c0_1 = arith.constant 0 : index
    %c640 = arith.constant 640 : index
    %2 = vector.load %arg8[%c0_1, %c640] : memref<16x768xf32, #tpu.memory_space<vmem>>, vector<16x128xf32>
    tpu.vector_store %arg8[%c0_1, %c640], %0 {strides = array<i32>} : memref<16x768xf32, #tpu.memory_space<vmem>>, vector<16x128xf32>,
    %c0_2 = arith.constant 0 : index
    %c0_3 = arith.constant 0 : index
    %c0_4 = arith.constant 0 : index
    %3 = vector.load %arg1[%c0_2, %c0_3, %c0_4] : memref<1x8x512xf32, #tpu.memory_space<vmem>>, vector<1x8x512xf32>
    %4 = vector.shape_cast %3 : vector<1x8x512xf32> to vector<8x512xf32>
    %c0_5 = arith.constant 0 : index
    %c128 = arith.constant 128 : index
    %5 = vector.load %arg8[%c0_5, %c128] : memref<16x768xf32, #tpu.memory_space<vmem>>, vector<8x512xf32>
    tpu.vector_store %arg8[%c0_5, %c128], %4 {strides = array<i32>} : memref<16x768xf32, #tpu.memory_space<vmem>>, vector<8x512xf32>,
    %c0_6 = arith.constant 0 : index
    %c111 = arith.constant 111 : index
    %6 = vector.load %arg8[%c0_6, %c111] : memref<16x768xf32, #tpu.memory_space<vmem>>, vector<8x512xf32>
    %c0_7 = arith.constant 0 : index
    %c0_8 = arith.constant 0 : index
    %7 = vector.load %arg2[%c0_7, %c0_8] : memref<360x512xf32, #tpu.memory_space<vmem>>, vector<8x512xf32>
    %8 = arith.mulf %6, %7 : vector<8x512xf32>
    %c0_9 = arith.constant 0 : index
    %c0_10 = arith.constant 0 : index
    %9 = vector.load %arg9[%c0_9, %c0_10] : memref<144x512xf32, #tpu.memory_space<vmem>>, vector<8x512xf32>
    tpu.vector_store %arg9[%c0_9, %c0_10], %8 {strides = array<i32>} : memref<144x512xf32, #tpu.memory_space<vmem>>, vector<8x512xf32>,
    %c0_11 = arith.constant 0 : index
    %c112 = arith.constant 112 : index
    %10 = vector.load %arg8[%c0_11, %c112] : memref<16x768xf32, #tpu.memory_space<vmem>>, vector<8x512xf32>
    %c8 = arith.constant 8 : index
    %c0_12 = arith.constant 0 : index
    %11 = vector.load %arg2[%c8, %c0_12] : memref<360x512xf32, #tpu.memory_space<vmem>>, vector<8x512xf32>
    %12 = arith.mulf %10, %11 : vector<8x512xf32>
    %c8_13 = arith.constant 8 : index
    %c0_14 = arith.constant 0 : index
    %13 = vector.load %arg9[%c8_13, %c0_14] : memref<144x512xf32, #tpu.memory_space<vmem>>, vector<8x512xf32>
    tpu.vector_store %arg9[%c8_13, %c0_14], %12 {strides = array<i32>} : memref<144x512xf32, #tpu.memory_space<vmem>>, vector<8x512xf32>,
    %c0_15 = arith.constant 0 : index
    %c113 = arith.constant 113 : index
    %14 = vector.load %arg8[%c0_15, %c113] : memref<16x768xf32, #tpu.memory_space<vmem>>, vector<8x512xf32>
    %c16 = arith.constant 16 : index
    %c0_16 = arith.constant 0 : index
    %15 = vector.load %arg2[%c16, %c0_16] : memref<360x512xf32, #tpu.memory_space<vmem>>, vector<8x512xf32>
    %16 = arith.mulf %14, %15 : vector<8x512xf32>
    %c16_17 = arith.constant 16 : index
    %c0_18 = arith.constant 0 : index
    %17 = vector.load %arg9[%c16_17, %c0_18] : memref<144x512xf32, #tpu.memory_space<vmem>>, vector<8x512xf32>
    tpu.vector_store %arg9[%c16_17, %c0_18], %16 {strides = array<i32>} : memref<144x512xf32, #tpu.memory_space<vmem>>, vector<8x512xf32>,
    %c0_19 = arith.constant 0 : index
    %c127 = arith.constant 127 : index
    %18 = vector.load %arg8[%c0_19, %c127] : memref<16x768xf32, #tpu.memory_space<vmem>>, vector<8x512xf32>
    %c24 = arith.constant 24 : index
    %c0_20 = arith.constant 0 : index
    %19 = vector.load %arg2[%c24, %c0_20] : memref<360x512xf32, #tpu.memory_space<vmem>>, vector<8x512xf32>
    %20 = arith.mulf %18, %19 : vector<8x512xf32>
    %c24_21 = arith.constant 24 : index
    %c0_22 = arith.constant 0 : index
    %21 = vector.load %arg9[%c24_21, %c0_22] : memref<144x512xf32, #tpu.memory_space<vmem>>, vector<8x512xf32>
    tpu.vector_store %arg9[%c24_21, %c0_22], %20 {strides = array<i32>} : memref<144x512xf32, #tpu.memory_space<vmem>>, vector<8x512xf32>,
    %c0_23 = arith.constant 0 : index
    %c128_24 = arith.constant 128 : index
    %22 = vector.load %arg8[%c0_23, %c128_24] : memref<16x768xf32, #tpu.memory_space<vmem>>, vector<8x512xf32>
    %c32 = arith.constant 32 : index
    %c0_25 = arith.constant 0 : index
    %23 = vector.load %arg2[%c32, %c0_25] : memref<360x512xf32, #tpu.memory_space<vmem>>, vector<8x512xf32>
    %24 = arith.mulf %22, %23 : vector<8x512xf32>
    %c32_26 = arith.constant 32 : index
    %c0_27 = arith.constant 0 : index
    %25 = vector.load %arg9[%c32_26, %c0_27] : memref<144x512xf32, #tpu.memory_space<vmem>>, vector<8x512xf32>
    tpu.vector_store %arg9[%c32_26, %c0_27], %24 {strides = array<i32>} : memref<144x512xf32, #tpu.memory_space<vmem>>, vector<8x512xf32>,
    %c0_28 = arith.constant 0 : index
    %c129 = arith.constant 129 : index
    %26 = vector.load %arg8[%c0_28, %c129] : memref<16x768xf32, #tpu.memory_space<vmem>>, vector<8x512xf32>
    %c40 = arith.constant 40 : index
    %c0_29 = arith.constant 0 : index
    %27 = vector.load %arg2[%c40, %c0_29] : memref<360x512xf32, #tpu.memory_space<vmem>>, vector<8x512xf32>
    %28 = arith.mulf %26, %27 : vector<8x512xf32>
    %c40_30 = arith.constant 40 : index
    %c0_31 = arith.constant 0 : index
    %29 = vector.load %arg9[%c40_30, %c0_31] : memref<144x512xf32, #tpu.memory_space<vmem>>, vector<8x512xf32>
    tpu.vector_store %arg9[%c40_30, %c0_31], %28 {strides = array<i32>} : memref<144x512xf32, #tpu.memory_space<vmem>>, vector<8x512xf32>,
    %c0_32 = arith.constant 0 : index
    %c143 = arith.constant 143 : index
    %30 = vector.load %arg8[%c0_32, %c143] : memref<16x768xf32, #tpu.memory_space<vmem>>, vector<8x512xf32>
    %c48 = arith.constant 48 : index
    %c0_33 = arith.constant 0 : index
    %31 = vector.load %arg2[%c48, %c0_33] : memref<360x512xf32, #tpu.memory_space<vmem>>, vector<8x512xf32>
    %32 = arith.mulf %30, %31 : vector<8x512xf32>
    %c48_34 = arith.constant 48 : index
    %c0_35 = arith.constant 0 : index
    %33 = vector.load %arg9[%c48_34, %c0_35] : memref<144x512xf32, #tpu.memory_space<vmem>>, vector<8x512xf32>
    tpu.vector_store %arg9[%c48_34, %c0_35], %32 {strides = array<i32>} : memref<144x512xf32, #tpu.memory_space<vmem>>, vector<8x512xf32>,
    %c0_36 = arith.constant 0 : index
    %c144 = arith.constant 144 : index
    %34 = vector.load %arg8[%c0_36, %c144] : memref<16x768xf32, #tpu.memory_space<vmem>>, vector<8x512xf32>
    %c56 = arith.constant 56 : index
    %c0_37 = arith.constant 0 : index
    %35 = vector.load %arg2[%c56, %c0_37] : memref<360x512xf32, #tpu.memory_space<vmem>>, vector<8x512xf32>
    %36 = arith.mulf %34, %35 : vector<8x512xf32>
    %c56_38 = arith.constant 56 : index
    %c0_39 = arith.constant 0 : index
    %37 = vector.load %arg9[%c56_38, %c0_39] : memref<144x512xf32, #tpu.memory_space<vmem>>, vector<8x512xf32>
    tpu.vector_store %arg9[%c56_38, %c0_39], %36 {strides = array<i32>} : memref<144x512xf32, #tpu.memory_space<vmem>>, vector<8x512xf32>,
    %c0_40 = arith.constant 0 : index
    %c145 = arith.constant 145 : index
    %38 = vector.load %arg8[%c0_40, %c145] : memref<16x768xf32, #tpu.memory_space<vmem>>, vector<8x512xf32>
    %c64 = arith.constant 64 : index
    %c0_41 = arith.constant 0 : index
    %39 = vector.load %arg2[%c64, %c0_41] : memref<360x512xf32, #tpu.memory_space<vmem>>, vector<8x512xf32>
    %40 = arith.mulf %38, %39 : vector<8x512xf32>
    %c64_42 = arith.constant 64 : index
    %c0_43 = arith.constant 0 : index
    %41 = vector.load %arg9[%c64_42, %c0_43] : memref<144x512xf32, #tpu.memory_space<vmem>>, vector<8x512xf32>
    tpu.vector_store %arg9[%c64_42, %c0_43], %40 {strides = array<i32>} : memref<144x512xf32, #tpu.memory_space<vmem>>, vector<8x512xf32>,
    %c0_44 = arith.constant 0 : index
    %c0_45 = arith.constant 0 : index
    %42 = vector.load %arg9[%c0_44, %c0_45] : memref<144x512xf32, #tpu.memory_space<vmem>>, vector<72x512xf32>
    %43 = arith.truncf %42 : vector<72x512xf32> to vector<72x512xbf16>
    %c0_46 = arith.constant 0 : index
    %c0_47 = arith.constant 0 : index
    %44 = vector.load %arg3[%c0_46, %c0_47] : memref<8x72xbf16, #tpu.memory_space<vmem>>, vector<8x72xbf16>
    %cst_48 = arith.constant dense<0.000000e+00> : vector<8x512xf32>
    %45 = tpu.matmul %44, %43, %cst_48 {dimension_numbers = #tpu.dot_dimension_numbers<[1], [0], [0], [1], [0, 0, 1, 1], [], []>} : vector<8x72xbf16>, vector<72x512xbf16>, vector<8x512xf32> -> vector<8x512xf32>
    %46 = vector.extract_strided_slice %45 {offsets = [0, 0], sizes = [8, 256], strides = [1, 1]} : vector<8x512xf32> to vector<8x256xf32>
    %cst_49 = arith.constant dense<0.000000e+00> : vector<8xf32>
    %47 = vector.multi_reduction <add>, %46, %cst_49 [1] : vector<8x256xf32> to vector<8xf32>
    %48 = vector.shape_cast %47 : vector<8xf32> to vector<8x1xf32>
    %cst_50 = arith.constant 3.906250e-03 : f32
    %49 = vector.broadcast %cst_50 : f32 to vector<8x1xf32>
    %50 = arith.mulf %48, %49 : vector<8x1xf32>
    %51 = arith.mulf %46, %46 : vector<8x256xf32>
    %cst_51 = arith.constant dense<0.000000e+00> : vector<8xf32>
    %52 = vector.multi_reduction <add>, %51, %cst_51 [1] : vector<8x256xf32> to vector<8xf32>
    %53 = vector.shape_cast %52 : vector<8xf32> to vector<8x1xf32>
    %cst_52 = arith.constant 3.906250e-03 : f32
    %54 = vector.broadcast %cst_52 : f32 to vector<8x1xf32>
    %55 = arith.mulf %53, %54 : vector<8x1xf32>
    %56 = arith.mulf %50, %50 : vector<8x1xf32>
    %57 = arith.subf %55, %56 : vector<8x1xf32>
    %58 = vector.broadcast %50 : vector<8x1xf32> to vector<8x256xf32>
    %59 = arith.subf %46, %58 : vector<8x256xf32>
    %cst_53 = arith.constant 9.99999974E-6 : f32
    %60 = vector.broadcast %cst_53 : f32 to vector<8x1xf32>
    %61 = arith.addf %57, %60 : vector<8x1xf32>
    %62 = math.rsqrt %61 : vector<8x1xf32>
    %63 = vector.broadcast %62 : vector<8x1xf32> to vector<8x256xf32>
    %64 = arith.mulf %59, %63 : vector<8x256xf32>
    %cst_54 = arith.constant 0.000000e+00 : f32
    %65 = vector.broadcast %cst_54 : f32 to vector<8x256xf32>
    %66 = arith.cmpf oge, %64, %65 : vector<8x256xf32>
    %cst_55 = arith.constant 1.000000e-01 : f32
    %67 = vector.broadcast %cst_55 : f32 to vector<8x256xf32>
    %68 = arith.mulf %67, %64 : vector<8x256xf32>
    %69 = arith.select %66, %64, %68 : vector<8x256xi1>, vector<8x256xf32>
    %c0_56 = arith.constant 0 : index
    %c128_57 = arith.constant 128 : index
    %70 = vector.load %arg8[%c0_56, %c128_57] : memref<16x768xf32, #tpu.memory_space<vmem>>, vector<8x256xf32>
    tpu.vector_store %arg8[%c0_56, %c128_57], %69 {strides = array<i32>} : memref<16x768xf32, #tpu.memory_space<vmem>>, vector<8x256xf32>,
    %71 = vector.extract_strided_slice %45 {offsets = [0, 256], sizes = [8, 256], strides = [1, 1]} : vector<8x512xf32> to vector<8x256xf32>
    %cst_58 = arith.constant dense<0.000000e+00> : vector<8xf32>
    %72 = vector.multi_reduction <add>, %71, %cst_58 [1] : vector<8x256xf32> to vector<8xf32>
    %73 = vector.shape_cast %72 : vector<8xf32> to vector<8x1xf32>
    %cst_59 = arith.constant 3.906250e-03 : f32
    %74 = vector.broadcast %cst_59 : f32 to vector<8x1xf32>
    %75 = arith.mulf %73, %74 : vector<8x1xf32>
    %76 = arith.mulf %71, %71 : vector<8x256xf32>
    %cst_60 = arith.constant dense<0.000000e+00> : vector<8xf32>
    %77 = vector.multi_reduction <add>, %76, %cst_60 [1] : vector<8x256xf32> to vector<8xf32>
    %78 = vector.shape_cast %77 : vector<8xf32> to vector<8x1xf32>
    %cst_61 = arith.constant 3.906250e-03 : f32
    %79 = vector.broadcast %cst_61 : f32 to vector<8x1xf32>
    %80 = arith.mulf %78, %79 : vector<8x1xf32>
    %81 = arith.mulf %75, %75 : vector<8x1xf32>
    %82 = arith.subf %80, %81 : vector<8x1xf32>
    %83 = vector.broadcast %75 : vector<8x1xf32> to vector<8x256xf32>
    %84 = arith.subf %71, %83 : vector<8x256xf32>
    %cst_62 = arith.constant 9.99999974E-6 : f32
    %85 = vector.broadcast %cst_62 : f32 to vector<8x1xf32>
    %86 = arith.addf %82, %85 : vector<8x1xf32>
    %87 = math.rsqrt %86 : vector<8x1xf32>
    %88 = vector.broadcast %87 : vector<8x1xf32> to vector<8x256xf32>
    %89 = arith.mulf %84, %88 : vector<8x256xf32>
    %cst_63 = arith.constant 0.000000e+00 : f32
    %90 = vector.broadcast %cst_63 : f32 to vector<8x256xf32>
    %91 = arith.cmpf oge, %89, %90 : vector<8x256xf32>
    %cst_64 = arith.constant 1.000000e-01 : f32
    %92 = vector.broadcast %cst_64 : f32 to vector<8x256xf32>
    %93 = arith.mulf %92, %89 : vector<8x256xf32>
    %94 = arith.select %91, %89, %93 : vector<8x256xi1>, vector<8x256xf32>
    %c0_65 = arith.constant 0 : index
    %c384 = arith.constant 384 : index
    %95 = vector.load %arg8[%c0_65, %c384] : memref<16x768xf32, #tpu.memory_space<vmem>>, vector<8x256xf32>
    tpu.vector_store %arg8[%c0_65, %c384], %94 {strides = array<i32>} : memref<16x768xf32, #tpu.memory_space<vmem>>, vector<8x256xf32>,
    %c0_66 = arith.constant 0 : index
    %c94 = arith.constant 94 : index
    %96 = vector.load %arg8[%c0_66, %c94] : memref<16x768xf32, #tpu.memory_space<vmem>>, vector<8x512xf32>
    %c72 = arith.constant 72 : index
    %c0_67 = arith.constant 0 : index
    %97 = vector.load %arg2[%c72, %c0_67] : memref<360x512xf32, #tpu.memory_space<vmem>>, vector<8x512xf32>
    %98 = arith.mulf %96, %97 : vector<8x512xf32>
    %c0_68 = arith.constant 0 : index
    %c0_69 = arith.constant 0 : index
    %99 = vector.load %arg9[%c0_68, %c0_69] : memref<144x512xf32, #tpu.memory_space<vmem>>, vector<8x512xf32>
    tpu.vector_store %arg9[%c0_68, %c0_69], %98 {strides = array<i32>} : memref<144x512xf32, #tpu.memory_space<vmem>>, vector<8x512xf32>,
    %c0_70 = arith.constant 0 : index
    %c96 = arith.constant 96 : index
    %100 = vector.load %arg8[%c0_70, %c96] : memref<16x768xf32, #tpu.memory_space<vmem>>, vector<8x512xf32>
    %c80 = arith.constant 80 : index
    %c0_71 = arith.constant 0 : index
    %101 = vector.load %arg2[%c80, %c0_71] : memref<360x512xf32, #tpu.memory_space<vmem>>, vector<8x512xf32>
    %102 = arith.mulf %100, %101 : vector<8x512xf32>
    %c8_72 = arith.constant 8 : index
    %c0_73 = arith.constant 0 : index
    %103 = vector.load %arg9[%c8_72, %c0_73] : memref<144x512xf32, #tpu.memory_space<vmem>>, vector<8x512xf32>
    tpu.vector_store %arg9[%c8_72, %c0_73], %102 {strides = array<i32>} : memref<144x512xf32, #tpu.memory_space<vmem>>, vector<8x512xf32>,
    %c0_74 = arith.constant 0 : index
    %c98 = arith.constant 98 : index
    %104 = vector.load %arg8[%c0_74, %c98] : memref<16x768xf32, #tpu.memory_space<vmem>>, vector<8x512xf32>
    %c88 = arith.constant 88 : index
    %c0_75 = arith.constant 0 : index
    %105 = vector.load %arg2[%c88, %c0_75] : memref<360x512xf32, #tpu.memory_space<vmem>>, vector<8x512xf32>
    %106 = arith.mulf %104, %105 : vector<8x512xf32>
    %c16_76 = arith.constant 16 : index
    %c0_77 = arith.constant 0 : index
    %107 = vector.load %arg9[%c16_76, %c0_77] : memref<144x512xf32, #tpu.memory_space<vmem>>, vector<8x512xf32>
    tpu.vector_store %arg9[%c16_76, %c0_77], %106 {strides = array<i32>} : memref<144x512xf32, #tpu.memory_space<vmem>>, vector<8x512xf32>,
    %c0_78 = arith.constant 0 : index
    %c126 = arith.constant 126 : index
    %108 = vector.load %arg8[%c0_78, %c126] : memref<16x768xf32, #tpu.memory_space<vmem>>, vector<8x512xf32>
    %c96_79 = arith.constant 96 : index
    %c0_80 = arith.constant 0 : index
    %109 = vector.load %arg2[%c96_79, %c0_80] : memref<360x512xf32, #tpu.memory_space<vmem>>, vector<8x512xf32>
    %110 = arith.mulf %108, %109 : vector<8x512xf32>
    %c24_81 = arith.constant 24 : index
    %c0_82 = arith.constant 0 : index
    %111 = vector.load %arg9[%c24_81, %c0_82] : memref<144x512xf32, #tpu.memory_space<vmem>>, vector<8x512xf32>
    tpu.vector_store %arg9[%c24_81, %c0_82], %110 {strides = array<i32>} : memref<144x512xf32, #tpu.memory_space<vmem>>, vector<8x512xf32>,
    %c0_83 = arith.constant 0 : index
    %c128_84 = arith.constant 128 : index
    %112 = vector.load %arg8[%c0_83, %c128_84] : memref<16x768xf32, #tpu.memory_space<vmem>>, vector<8x512xf32>
    %c104 = arith.constant 104 : index
    %c0_85 = arith.constant 0 : index
    %113 = vector.load %arg2[%c104, %c0_85] : memref<360x512xf32, #tpu.memory_space<vmem>>, vector<8x512xf32>
    %114 = arith.mulf %112, %113 : vector<8x512xf32>
    %c32_86 = arith.constant 32 : index
    %c0_87 = arith.constant 0 : index
    %115 = vector.load %arg9[%c32_86, %c0_87] : memref<144x512xf32, #tpu.memory_space<vmem>>, vector<8x512xf32>
    tpu.vector_store %arg9[%c32_86, %c0_87], %114 {strides = array<i32>} : memref<144x512xf32, #tpu.memory_space<vmem>>, vector<8x512xf32>,
    %c0_88 = arith.constant 0 : index
    %c130 = arith.constant 130 : index
    %116 = vector.load %arg8[%c0_88, %c130] : memref<16x768xf32, #tpu.memory_space<vmem>>, vector<8x512xf32>
    %c112_89 = arith.constant 112 : index
    %c0_90 = arith.constant 0 : index
    %117 = vector.load %arg2[%c112_89, %c0_90] : memref<360x512xf32, #tpu.memory_space<vmem>>, vector<8x512xf32>
    %118 = arith.mulf %116, %117 : vector<8x512xf32>
    %c40_91 = arith.constant 40 : index
    %c0_92 = arith.constant 0 : index
    %119 = vector.load %arg9[%c40_91, %c0_92] : memref<144x512xf32, #tpu.memory_space<vmem>>, vector<8x512xf32>
    tpu.vector_store %arg9[%c40_91, %c0_92], %118 {strides = array<i32>} : memref<144x512xf32, #tpu.memory_space<vmem>>, vector<8x512xf32>,
    %c0_93 = arith.constant 0 : index
    %c158 = arith.constant 158 : index
    %120 = vector.load %arg8[%c0_93, %c158] : memref<16x768xf32, #tpu.memory_space<vmem>>, vector<8x512xf32>
    %c120 = arith.constant 120 : index
    %c0_94 = arith.constant 0 : index
    %121 = vector.load %arg2[%c120, %c0_94] : memref<360x512xf32, #tpu.memory_space<vmem>>, vector<8x512xf32>
    %122 = arith.mulf %120, %121 : vector<8x512xf32>
    %c48_95 = arith.constant 48 : index
    %c0_96 = arith.constant 0 : index
    %123 = vector.load %arg9[%c48_95, %c0_96] : memref<144x512xf32, #tpu.memory_space<vmem>>, vector<8x512xf32>
    tpu.vector_store %arg9[%c48_95, %c0_96], %122 {strides = array<i32>} : memref<144x512xf32, #tpu.memory_space<vmem>>, vector<8x512xf32>,
    %c0_97 = arith.constant 0 : index
    %c160 = arith.constant 160 : index
    %124 = vector.load %arg8[%c0_97, %c160] : memref<16x768xf32, #tpu.memory_space<vmem>>, vector<8x512xf32>
    %c128_98 = arith.constant 128 : index
    %c0_99 = arith.constant 0 : index
    %125 = vector.load %arg2[%c128_98, %c0_99] : memref<360x512xf32, #tpu.memory_space<vmem>>, vector<8x512xf32>
    %126 = arith.mulf %124, %125 : vector<8x512xf32>
    %c56_100 = arith.constant 56 : index
    %c0_101 = arith.constant 0 : index
    %127 = vector.load %arg9[%c56_100, %c0_101] : memref<144x512xf32, #tpu.memory_space<vmem>>, vector<8x512xf32>
    tpu.vector_store %arg9[%c56_100, %c0_101], %126 {strides = array<i32>} : memref<144x512xf32, #tpu.memory_space<vmem>>, vector<8x512xf32>,
    %c0_102 = arith.constant 0 : index
    %c162 = arith.constant 162 : index
    %128 = vector.load %arg8[%c0_102, %c162] : memref<16x768xf32, #tpu.memory_space<vmem>>, vector<8x512xf32>
    %c136 = arith.constant 136 : index
    %c0_103 = arith.constant 0 : index
    %129 = vector.load %arg2[%c136, %c0_103] : memref<360x512xf32, #tpu.memory_space<vmem>>, vector<8x512xf32>
    %130 = arith.mulf %128, %129 : vector<8x512xf32>
    %c64_104 = arith.constant 64 : index
    %c0_105 = arith.constant 0 : index
    %131 = vector.load %arg9[%c64_104, %c0_105] : memref<144x512xf32, #tpu.memory_space<vmem>>, vector<8x512xf32>
    tpu.vector_store %arg9[%c64_104, %c0_105], %130 {strides = array<i32>} : memref<144x512xf32, #tpu.memory_space<vmem>>, vector<8x512xf32>,
    %c0_106 = arith.constant 0 : index
    %c0_107 = arith.constant 0 : index
    %132 = vector.load %arg9[%c0_106, %c0_107] : memref<144x512xf32, #tpu.memory_space<vmem>>, vector<72x512xf32>
    %133 = arith.truncf %132 : vector<72x512xf32> to vector<72x512xbf16>
    %c0_108 = arith.constant 0 : index
    %c0_109 = arith.constant 0 : index
    %134 = vector.load %arg4[%c0_108, %c0_109] : memref<8x72xbf16, #tpu.memory_space<vmem>>, vector<8x72xbf16>
    %cst_110 = arith.constant dense<0.000000e+00> : vector<8x512xf32>
    %135 = tpu.matmul %134, %133, %cst_110 {dimension_numbers = #tpu.dot_dimension_numbers<[1], [0], [0], [1], [0, 0, 1, 1], [], []>} : vector<8x72xbf16>, vector<72x512xbf16>, vector<8x512xf32> -> vector<8x512xf32>
    %136 = vector.extract_strided_slice %135 {offsets = [0, 0], sizes = [8, 256], strides = [1, 1]} : vector<8x512xf32> to vector<8x256xf32>
    %cst_111 = arith.constant dense<0.000000e+00> : vector<8xf32>
    %137 = vector.multi_reduction <add>, %136, %cst_111 [1] : vector<8x256xf32> to vector<8xf32>
    %138 = vector.shape_cast %137 : vector<8xf32> to vector<8x1xf32>
    %cst_112 = arith.constant 3.906250e-03 : f32
    %139 = vector.broadcast %cst_112 : f32 to vector<8x1xf32>
    %140 = arith.mulf %138, %139 : vector<8x1xf32>
    %141 = arith.mulf %136, %136 : vector<8x256xf32>
    %cst_113 = arith.constant dense<0.000000e+00> : vector<8xf32>
    %142 = vector.multi_reduction <add>, %141, %cst_113 [1] : vector<8x256xf32> to vector<8xf32>
    %143 = vector.shape_cast %142 : vector<8xf32> to vector<8x1xf32>
    %cst_114 = arith.constant 3.906250e-03 : f32
    %144 = vector.broadcast %cst_114 : f32 to vector<8x1xf32>
    %145 = arith.mulf %143, %144 : vector<8x1xf32>
    %146 = arith.mulf %140, %140 : vector<8x1xf32>
    %147 = arith.subf %145, %146 : vector<8x1xf32>
    %148 = vector.broadcast %140 : vector<8x1xf32> to vector<8x256xf32>
    %149 = arith.subf %136, %148 : vector<8x256xf32>
    %cst_115 = arith.constant 9.99999974E-6 : f32
    %150 = vector.broadcast %cst_115 : f32 to vector<8x1xf32>
    %151 = arith.addf %147, %150 : vector<8x1xf32>
    %152 = math.rsqrt %151 : vector<8x1xf32>
    %153 = vector.broadcast %152 : vector<8x1xf32> to vector<8x256xf32>
    %154 = arith.mulf %149, %153 : vector<8x256xf32>
    %cst_116 = arith.constant 0.000000e+00 : f32
    %155 = vector.broadcast %cst_116 : f32 to vector<8x256xf32>
    %156 = arith.maximumf %154, %155 : vector<8x256xf32>
    %c0_117 = arith.constant 0 : index
    %c128_118 = arith.constant 128 : index
    %157 = vector.load %arg8[%c0_117, %c128_118] : memref<16x768xf32, #tpu.memory_space<vmem>>, vector<8x256xf32>
    %158 = arith.addf %156, %157 : vector<8x256xf32>
    %c0_119 = arith.constant 0 : index
    %c128_120 = arith.constant 128 : index
    %159 = vector.load %arg8[%c0_119, %c128_120] : memref<16x768xf32, #tpu.memory_space<vmem>>, vector<8x256xf32>
    tpu.vector_store %arg8[%c0_119, %c128_120], %158 {strides = array<i32>} : memref<16x768xf32, #tpu.memory_space<vmem>>, vector<8x256xf32>,
    %160 = vector.extract_strided_slice %135 {offsets = [0, 256], sizes = [8, 256], strides = [1, 1]} : vector<8x512xf32> to vector<8x256xf32>
    %cst_121 = arith.constant dense<0.000000e+00> : vector<8xf32>
    %161 = vector.multi_reduction <add>, %160, %cst_121 [1] : vector<8x256xf32> to vector<8xf32>
    %162 = vector.shape_cast %161 : vector<8xf32> to vector<8x1xf32>
    %cst_122 = arith.constant 3.906250e-03 : f32
    %163 = vector.broadcast %cst_122 : f32 to vector<8x1xf32>
    %164 = arith.mulf %162, %163 : vector<8x1xf32>
    %165 = arith.mulf %160, %160 : vector<8x256xf32>
    %cst_123 = arith.constant dense<0.000000e+00> : vector<8xf32>
    %166 = vector.multi_reduction <add>, %165, %cst_123 [1] : vector<8x256xf32> to vector<8xf32>
    %167 = vector.shape_cast %166 : vector<8xf32> to vector<8x1xf32>
    %cst_124 = arith.constant 3.906250e-03 : f32
    %168 = vector.broadcast %cst_124 : f32 to vector<8x1xf32>
    %169 = arith.mulf %167, %168 : vector<8x1xf32>
    %170 = arith.mulf %164, %164 : vector<8x1xf32>
    %171 = arith.subf %169, %170 : vector<8x1xf32>
    %172 = vector.broadcast %164 : vector<8x1xf32> to vector<8x256xf32>
    %173 = arith.subf %160, %172 : vector<8x256xf32>
    %cst_125 = arith.constant 9.99999974E-6 : f32
    %174 = vector.broadcast %cst_125 : f32 to vector<8x1xf32>
    %175 = arith.addf %171, %174 : vector<8x1xf32>
    %176 = math.rsqrt %175 : vector<8x1xf32>
    %177 = vector.broadcast %176 : vector<8x1xf32> to vector<8x256xf32>
    %178 = arith.mulf %173, %177 : vector<8x256xf32>
    %cst_126 = arith.constant 0.000000e+00 : f32
    %179 = vector.broadcast %cst_126 : f32 to vector<8x256xf32>
    %180 = arith.maximumf %178, %179 : vector<8x256xf32>
    %c0_127 = arith.constant 0 : index
    %c384_128 = arith.constant 384 : index
    %181 = vector.load %arg8[%c0_127, %c384_128] : memref<16x768xf32, #tpu.memory_space<vmem>>, vector<8x256xf32>
    %182 = arith.addf %180, %181 : vector<8x256xf32>
    %c0_129 = arith.constant 0 : index
    %c384_130 = arith.constant 384 : index
    %183 = vector.load %arg8[%c0_129, %c384_130] : memref<16x768xf32, #tpu.memory_space<vmem>>, vector<8x256xf32>
    tpu.vector_store %arg8[%c0_129, %c384_130], %182 {strides = array<i32>} : memref<16x768xf32, #tpu.memory_space<vmem>>, vector<8x256xf32>,
    %c0_131 = arith.constant 0 : index
    %c94_132 = arith.constant 94 : index
    %184 = vector.load %arg8[%c0_131, %c94_132] : memref<16x768xf32, #tpu.memory_space<vmem>>, vector<8x512xf32>
    %c144_133 = arith.constant 144 : index
    %c0_134 = arith.constant 0 : index
    %185 = vector.load %arg2[%c144_133, %c0_134] : memref<360x512xf32, #tpu.memory_space<vmem>>, vector<8x512xf32>
    %186 = arith.mulf %184, %185 : vector<8x512xf32>
    %c0_135 = arith.constant 0 : index
    %c0_136 = arith.constant 0 : index
    %187 = vector.load %arg9[%c0_135, %c0_136] : memref<144x512xf32, #tpu.memory_space<vmem>>, vector<8x512xf32>
    tpu.vector_store %arg9[%c0_135, %c0_136], %186 {strides = array<i32>} : memref<144x512xf32, #tpu.memory_space<vmem>>, vector<8x512xf32>,
    %c0_137 = arith.constant 0 : index
    %c96_138 = arith.constant 96 : index
    %188 = vector.load %arg8[%c0_137, %c96_138] : memref<16x768xf32, #tpu.memory_space<vmem>>, vector<8x512xf32>
    %c152 = arith.constant 152 : index
    %c0_139 = arith.constant 0 : index
    %189 = vector.load %arg2[%c152, %c0_139] : memref<360x512xf32, #tpu.memory_space<vmem>>, vector<8x512xf32>
    %190 = arith.mulf %188, %189 : vector<8x512xf32>
    %c8_140 = arith.constant 8 : index
    %c0_141 = arith.constant 0 : index
    %191 = vector.load %arg9[%c8_140, %c0_141] : memref<144x512xf32, #tpu.memory_space<vmem>>, vector<8x512xf32>
    tpu.vector_store %arg9[%c8_140, %c0_141], %190 {strides = array<i32>} : memref<144x512xf32, #tpu.memory_space<vmem>>, vector<8x512xf32>,
    %c0_142 = arith.constant 0 : index
    %c98_143 = arith.constant 98 : index
    %192 = vector.load %arg8[%c0_142, %c98_143] : memref<16x768xf32, #tpu.memory_space<vmem>>, vector<8x512xf32>
    %c160_144 = arith.constant 160 : index
    %c0_145 = arith.constant 0 : index
    %193 = vector.load %arg2[%c160_144, %c0_145] : memref<360x512xf32, #tpu.memory_space<vmem>>, vector<8x512xf32>
    %194 = arith.mulf %192, %193 : vector<8x512xf32>
    %c16_146 = arith.constant 16 : index
    %c0_147 = arith.constant 0 : index
    %195 = vector.load %arg9[%c16_146, %c0_147] : memref<144x512xf32, #tpu.memory_space<vmem>>, vector<8x512xf32>
    tpu.vector_store %arg9[%c16_146, %c0_147], %194 {strides = array<i32>} : memref<144x512xf32, #tpu.memory_space<vmem>>, vector<8x512xf32>,
    %c0_148 = arith.constant 0 : index
    %c126_149 = arith.constant 126 : index
    %196 = vector.load %arg8[%c0_148, %c126_149] : memref<16x768xf32, #tpu.memory_space<vmem>>, vector<8x512xf32>
    %c168 = arith.constant 168 : index
    %c0_150 = arith.constant 0 : index
    %197 = vector.load %arg2[%c168, %c0_150] : memref<360x512xf32, #tpu.memory_space<vmem>>, vector<8x512xf32>
    %198 = arith.mulf %196, %197 : vector<8x512xf32>
    %c24_151 = arith.constant 24 : index
    %c0_152 = arith.constant 0 : index
    %199 = vector.load %arg9[%c24_151, %c0_152] : memref<144x512xf32, #tpu.memory_space<vmem>>, vector<8x512xf32>
    tpu.vector_store %arg9[%c24_151, %c0_152], %198 {strides = array<i32>} : memref<144x512xf32, #tpu.memory_space<vmem>>, vector<8x512xf32>,
    %c0_153 = arith.constant 0 : index
    %c128_154 = arith.constant 128 : index
    %200 = vector.load %arg8[%c0_153, %c128_154] : memref<16x768xf32, #tpu.memory_space<vmem>>, vector<8x512xf32>
    %c176 = arith.constant 176 : index
    %c0_155 = arith.constant 0 : index
    %201 = vector.load %arg2[%c176, %c0_155] : memref<360x512xf32, #tpu.memory_space<vmem>>, vector<8x512xf32>
    %202 = arith.mulf %200, %201 : vector<8x512xf32>
    %c32_156 = arith.constant 32 : index
    %c0_157 = arith.constant 0 : index
    %203 = vector.load %arg9[%c32_156, %c0_157] : memref<144x512xf32, #tpu.memory_space<vmem>>, vector<8x512xf32>
    tpu.vector_store %arg9[%c32_156, %c0_157], %202 {strides = array<i32>} : memref<144x512xf32, #tpu.memory_space<vmem>>, vector<8x512xf32>,
    %c0_158 = arith.constant 0 : index
    %c130_159 = arith.constant 130 : index
    %204 = vector.load %arg8[%c0_158, %c130_159] : memref<16x768xf32, #tpu.memory_space<vmem>>, vector<8x512xf32>
    %c184 = arith.constant 184 : index
    %c0_160 = arith.constant 0 : index
    %205 = vector.load %arg2[%c184, %c0_160] : memref<360x512xf32, #tpu.memory_space<vmem>>, vector<8x512xf32>
    %206 = arith.mulf %204, %205 : vector<8x512xf32>
    %c40_161 = arith.constant 40 : index
    %c0_162 = arith.constant 0 : index
    %207 = vector.load %arg9[%c40_161, %c0_162] : memref<144x512xf32, #tpu.memory_space<vmem>>, vector<8x512xf32>
    tpu.vector_store %arg9[%c40_161, %c0_162], %206 {strides = array<i32>} : memref<144x512xf32, #tpu.memory_space<vmem>>, vector<8x512xf32>,
    %c0_163 = arith.constant 0 : index
    %c158_164 = arith.constant 158 : index
    %208 = vector.load %arg8[%c0_163, %c158_164] : memref<16x768xf32, #tpu.memory_space<vmem>>, vector<8x512xf32>
    %c192 = arith.constant 192 : index
    %c0_165 = arith.constant 0 : index
    %209 = vector.load %arg2[%c192, %c0_165] : memref<360x512xf32, #tpu.memory_space<vmem>>, vector<8x512xf32>
    %210 = arith.mulf %208, %209 : vector<8x512xf32>
    %c48_166 = arith.constant 48 : index
    %c0_167 = arith.constant 0 : index
    %211 = vector.load %arg9[%c48_166, %c0_167] : memref<144x512xf32, #tpu.memory_space<vmem>>, vector<8x512xf32>
    tpu.vector_store %arg9[%c48_166, %c0_167], %210 {strides = array<i32>} : memref<144x512xf32, #tpu.memory_space<vmem>>, vector<8x512xf32>,
    %c0_168 = arith.constant 0 : index
    %c160_169 = arith.constant 160 : index
    %212 = vector.load %arg8[%c0_168, %c160_169] : memref<16x768xf32, #tpu.memory_space<vmem>>, vector<8x512xf32>
    %c200 = arith.constant 200 : index
    %c0_170 = arith.constant 0 : index
    %213 = vector.load %arg2[%c200, %c0_170] : memref<360x512xf32, #tpu.memory_space<vmem>>, vector<8x512xf32>
    %214 = arith.mulf %212, %213 : vector<8x512xf32>
    %c56_171 = arith.constant 56 : index
    %c0_172 = arith.constant 0 : index
    %215 = vector.load %arg9[%c56_171, %c0_172] : memref<144x512xf32, #tpu.memory_space<vmem>>, vector<8x512xf32>
    tpu.vector_store %arg9[%c56_171, %c0_172], %214 {strides = array<i32>} : memref<144x512xf32, #tpu.memory_space<vmem>>, vector<8x512xf32>,
    %c0_173 = arith.constant 0 : index
    %c162_174 = arith.constant 162 : index
    %216 = vector.load %arg8[%c0_173, %c162_174] : memref<16x768xf32, #tpu.memory_space<vmem>>, vector<8x512xf32>
    %c208 = arith.constant 208 : index
    %c0_175 = arith.constant 0 : index
    %217 = vector.load %arg2[%c208, %c0_175] : memref<360x512xf32, #tpu.memory_space<vmem>>, vector<8x512xf32>
    %218 = arith.mulf %216, %217 : vector<8x512xf32>
    %c64_176 = arith.constant 64 : index
    %c0_177 = arith.constant 0 : index
    %219 = vector.load %arg9[%c64_176, %c0_177] : memref<144x512xf32, #tpu.memory_space<vmem>>, vector<8x512xf32>
    tpu.vector_store %arg9[%c64_176, %c0_177], %218 {strides = array<i32>} : memref<144x512xf32, #tpu.memory_space<vmem>>, vector<8x512xf32>,
    %c0_178 = arith.constant 0 : index
    %c0_179 = arith.constant 0 : index
    %220 = vector.load %arg9[%c0_178, %c0_179] : memref<144x512xf32, #tpu.memory_space<vmem>>, vector<72x512xf32>
    %221 = arith.truncf %220 : vector<72x512xf32> to vector<72x512xbf16>
    %c0_180 = arith.constant 0 : index
    %c0_181 = arith.constant 0 : index
    %222 = vector.load %arg5[%c0_180, %c0_181] : memref<16x72xbf16, #tpu.memory_space<vmem>>, vector<16x72xbf16>
    %cst_182 = arith.constant dense<0.000000e+00> : vector<16x512xf32>
    %223 = tpu.matmul %222, %221, %cst_182 {dimension_numbers = #tpu.dot_dimension_numbers<[1], [0], [0], [1], [0, 0, 1, 1], [], []>} : vector<16x72xbf16>, vector<72x512xbf16>, vector<16x512xf32> -> vector<16x512xf32>
    %224 = vector.extract_strided_slice %223 {offsets = [0, 0], sizes = [16, 256], strides = [1, 1]} : vector<16x512xf32> to vector<16x256xf32>
    %cst_183 = arith.constant dense<0.000000e+00> : vector<16xf32>
    %225 = vector.multi_reduction <add>, %224, %cst_183 [1] : vector<16x256xf32> to vector<16xf32>
    %226 = vector.shape_cast %225 : vector<16xf32> to vector<16x1xf32>
    %cst_184 = arith.constant 3.906250e-03 : f32
    %227 = vector.broadcast %cst_184 : f32 to vector<16x1xf32>
    %228 = arith.mulf %226, %227 : vector<16x1xf32>
    %229 = arith.mulf %224, %224 : vector<16x256xf32>
    %cst_185 = arith.constant dense<0.000000e+00> : vector<16xf32>
    %230 = vector.multi_reduction <add>, %229, %cst_185 [1] : vector<16x256xf32> to vector<16xf32>
    %231 = vector.shape_cast %230 : vector<16xf32> to vector<16x1xf32>
    %cst_186 = arith.constant 3.906250e-03 : f32
    %232 = vector.broadcast %cst_186 : f32 to vector<16x1xf32>
    %233 = arith.mulf %231, %232 : vector<16x1xf32>
    %234 = arith.mulf %228, %228 : vector<16x1xf32>
    %235 = arith.subf %233, %234 : vector<16x1xf32>
    %236 = vector.broadcast %228 : vector<16x1xf32> to vector<16x256xf32>
    %237 = arith.subf %224, %236 : vector<16x256xf32>
    %cst_187 = arith.constant 9.99999974E-6 : f32
    %238 = vector.broadcast %cst_187 : f32 to vector<16x1xf32>
    %239 = arith.addf %235, %238 : vector<16x1xf32>
    %240 = math.rsqrt %239 : vector<16x1xf32>
    %241 = vector.broadcast %240 : vector<16x1xf32> to vector<16x256xf32>
    %242 = arith.mulf %237, %241 : vector<16x256xf32>
    %cst_188 = arith.constant 0.000000e+00 : f32
    %243 = vector.broadcast %cst_188 : f32 to vector<16x256xf32>
    %244 = arith.cmpf oge, %242, %243 : vector<16x256xf32>
    %cst_189 = arith.constant 1.000000e-01 : f32
    %245 = vector.broadcast %cst_189 : f32 to vector<16x256xf32>
    %246 = arith.mulf %245, %242 : vector<16x256xf32>
    %247 = arith.select %244, %242, %246 : vector<16x256xi1>, vector<16x256xf32>
    %c0_190 = arith.constant 0 : index
    %c128_191 = arith.constant 128 : index
    %248 = vector.load %arg8[%c0_190, %c128_191] : memref<16x768xf32, #tpu.memory_space<vmem>>, vector<16x256xf32>
    tpu.vector_store %arg8[%c0_190, %c128_191], %247 {strides = array<i32>} : memref<16x768xf32, #tpu.memory_space<vmem>>, vector<16x256xf32>,
    %249 = vector.extract_strided_slice %223 {offsets = [0, 256], sizes = [16, 256], strides = [1, 1]} : vector<16x512xf32> to vector<16x256xf32>
    %cst_192 = arith.constant dense<0.000000e+00> : vector<16xf32>
    %250 = vector.multi_reduction <add>, %249, %cst_192 [1] : vector<16x256xf32> to vector<16xf32>
    %251 = vector.shape_cast %250 : vector<16xf32> to vector<16x1xf32>
    %cst_193 = arith.constant 3.906250e-03 : f32
    %252 = vector.broadcast %cst_193 : f32 to vector<16x1xf32>
    %253 = arith.mulf %251, %252 : vector<16x1xf32>
    %254 = arith.mulf %249, %249 : vector<16x256xf32>
    %cst_194 = arith.constant dense<0.000000e+00> : vector<16xf32>
    %255 = vector.multi_reduction <add>, %254, %cst_194 [1] : vector<16x256xf32> to vector<16xf32>
    %256 = vector.shape_cast %255 : vector<16xf32> to vector<16x1xf32>
    %cst_195 = arith.constant 3.906250e-03 : f32
    %257 = vector.broadcast %cst_195 : f32 to vector<16x1xf32>
    %258 = arith.mulf %256, %257 : vector<16x1xf32>
    %259 = arith.mulf %253, %253 : vector<16x1xf32>
    %260 = arith.subf %258, %259 : vector<16x1xf32>
    %261 = vector.broadcast %253 : vector<16x1xf32> to vector<16x256xf32>
    %262 = arith.subf %249, %261 : vector<16x256xf32>
    %cst_196 = arith.constant 9.99999974E-6 : f32
    %263 = vector.broadcast %cst_196 : f32 to vector<16x1xf32>
    %264 = arith.addf %260, %263 : vector<16x1xf32>
    %265 = math.rsqrt %264 : vector<16x1xf32>
    %266 = vector.broadcast %265 : vector<16x1xf32> to vector<16x256xf32>
    %267 = arith.mulf %262, %266 : vector<16x256xf32>
    %cst_197 = arith.constant 0.000000e+00 : f32
    %268 = vector.broadcast %cst_197 : f32 to vector<16x256xf32>
    %269 = arith.cmpf oge, %267, %268 : vector<16x256xf32>
    %cst_198 = arith.constant 1.000000e-01 : f32
    %270 = vector.broadcast %cst_198 : f32 to vector<16x256xf32>
    %271 = arith.mulf %270, %267 : vector<16x256xf32>
    %272 = arith.select %269, %267, %271 : vector<16x256xi1>, vector<16x256xf32>
    %c0_199 = arith.constant 0 : index
    %c384_200 = arith.constant 384 : index
    %273 = vector.load %arg8[%c0_199, %c384_200] : memref<16x768xf32, #tpu.memory_space<vmem>>, vector<16x256xf32>
    tpu.vector_store %arg8[%c0_199, %c384_200], %272 {strides = array<i32>} : memref<16x768xf32, #tpu.memory_space<vmem>>, vector<16x256xf32>,
    %c0_201 = arith.constant 0 : index
    %c60 = arith.constant 60 : index
    %274 = vector.load %arg8[%c0_201, %c60] : memref<16x768xf32, #tpu.memory_space<vmem>>, vector<16x512xf32>
    %c216 = arith.constant 216 : index
    %c0_202 = arith.constant 0 : index
    %275 = vector.load %arg2[%c216, %c0_202] : memref<360x512xf32, #tpu.memory_space<vmem>>, vector<16x512xf32>
    %276 = arith.mulf %274, %275 : vector<16x512xf32>
    %c0_203 = arith.constant 0 : index
    %c0_204 = arith.constant 0 : index
    %277 = vector.load %arg9[%c0_203, %c0_204] : memref<144x512xf32, #tpu.memory_space<vmem>>, vector<16x512xf32>
    tpu.vector_store %arg9[%c0_203, %c0_204], %276 {strides = array<i32>} : memref<144x512xf32, #tpu.memory_space<vmem>>, vector<16x512xf32>,
    %c0_205 = arith.constant 0 : index
    %c64_206 = arith.constant 64 : index
    %278 = vector.load %arg8[%c0_205, %c64_206] : memref<16x768xf32, #tpu.memory_space<vmem>>, vector<16x512xf32>
    %c232 = arith.constant 232 : index
    %c0_207 = arith.constant 0 : index
    %279 = vector.load %arg2[%c232, %c0_207] : memref<360x512xf32, #tpu.memory_space<vmem>>, vector<16x512xf32>
    %280 = arith.mulf %278, %279 : vector<16x512xf32>
    %c16_208 = arith.constant 16 : index
    %c0_209 = arith.constant 0 : index
    %281 = vector.load %arg9[%c16_208, %c0_209] : memref<144x512xf32, #tpu.memory_space<vmem>>, vector<16x512xf32>
    tpu.vector_store %arg9[%c16_208, %c0_209], %280 {strides = array<i32>} : memref<144x512xf32, #tpu.memory_space<vmem>>, vector<16x512xf32>,
    %c0_210 = arith.constant 0 : index
    %c68 = arith.constant 68 : index
    %282 = vector.load %arg8[%c0_210, %c68] : memref<16x768xf32, #tpu.memory_space<vmem>>, vector<16x512xf32>
    %c248 = arith.constant 248 : index
    %c0_211 = arith.constant 0 : index
    %283 = vector.load %arg2[%c248, %c0_211] : memref<360x512xf32, #tpu.memory_space<vmem>>, vector<16x512xf32>
    %284 = arith.mulf %282, %283 : vector<16x512xf32>
    %c32_212 = arith.constant 32 : index
    %c0_213 = arith.constant 0 : index
    %285 = vector.load %arg9[%c32_212, %c0_213] : memref<144x512xf32, #tpu.memory_space<vmem>>, vector<16x512xf32>
    tpu.vector_store %arg9[%c32_212, %c0_213], %284 {strides = array<i32>} : memref<144x512xf32, #tpu.memory_space<vmem>>, vector<16x512xf32>,
    %c0_214 = arith.constant 0 : index
    %c124 = arith.constant 124 : index
    %286 = vector.load %arg8[%c0_214, %c124] : memref<16x768xf32, #tpu.memory_space<vmem>>, vector<16x512xf32>
    %c264 = arith.constant 264 : index
    %c0_215 = arith.constant 0 : index
    %287 = vector.load %arg2[%c264, %c0_215] : memref<360x512xf32, #tpu.memory_space<vmem>>, vector<16x512xf32>
    %288 = arith.mulf %286, %287 : vector<16x512xf32>
    %c48_216 = arith.constant 48 : index
    %c0_217 = arith.constant 0 : index
    %289 = vector.load %arg9[%c48_216, %c0_217] : memref<144x512xf32, #tpu.memory_space<vmem>>, vector<16x512xf32>
    tpu.vector_store %arg9[%c48_216, %c0_217], %288 {strides = array<i32>} : memref<144x512xf32, #tpu.memory_space<vmem>>, vector<16x512xf32>,
    %c0_218 = arith.constant 0 : index
    %c128_219 = arith.constant 128 : index
    %290 = vector.load %arg8[%c0_218, %c128_219] : memref<16x768xf32, #tpu.memory_space<vmem>>, vector<16x512xf32>
    %c280 = arith.constant 280 : index
    %c0_220 = arith.constant 0 : index
    %291 = vector.load %arg2[%c280, %c0_220] : memref<360x512xf32, #tpu.memory_space<vmem>>, vector<16x512xf32>
    %292 = arith.mulf %290, %291 : vector<16x512xf32>
    %c64_221 = arith.constant 64 : index
    %c0_222 = arith.constant 0 : index
    %293 = vector.load %arg9[%c64_221, %c0_222] : memref<144x512xf32, #tpu.memory_space<vmem>>, vector<16x512xf32>
    tpu.vector_store %arg9[%c64_221, %c0_222], %292 {strides = array<i32>} : memref<144x512xf32, #tpu.memory_space<vmem>>, vector<16x512xf32>,
    %c0_223 = arith.constant 0 : index
    %c132 = arith.constant 132 : index
    %294 = vector.load %arg8[%c0_223, %c132] : memref<16x768xf32, #tpu.memory_space<vmem>>, vector<16x512xf32>
    %c296 = arith.constant 296 : index
    %c0_224 = arith.constant 0 : index
    %295 = vector.load %arg2[%c296, %c0_224] : memref<360x512xf32, #tpu.memory_space<vmem>>, vector<16x512xf32>
    %296 = arith.mulf %294, %295 : vector<16x512xf32>
    %c80_225 = arith.constant 80 : index
    %c0_226 = arith.constant 0 : index
    %297 = vector.load %arg9[%c80_225, %c0_226] : memref<144x512xf32, #tpu.memory_space<vmem>>, vector<16x512xf32>
    tpu.vector_store %arg9[%c80_225, %c0_226], %296 {strides = array<i32>} : memref<144x512xf32, #tpu.memory_space<vmem>>, vector<16x512xf32>,
    %c0_227 = arith.constant 0 : index
    %c188 = arith.constant 188 : index
    %298 = vector.load %arg8[%c0_227, %c188] : memref<16x768xf32, #tpu.memory_space<vmem>>, vector<16x512xf32>
    %c312 = arith.constant 312 : index
    %c0_228 = arith.constant 0 : index
    %299 = vector.load %arg2[%c312, %c0_228] : memref<360x512xf32, #tpu.memory_space<vmem>>, vector<16x512xf32>
    %300 = arith.mulf %298, %299 : vector<16x512xf32>
    %c96_229 = arith.constant 96 : index
    %c0_230 = arith.constant 0 : index
    %301 = vector.load %arg9[%c96_229, %c0_230] : memref<144x512xf32, #tpu.memory_space<vmem>>, vector<16x512xf32>
    tpu.vector_store %arg9[%c96_229, %c0_230], %300 {strides = array<i32>} : memref<144x512xf32, #tpu.memory_space<vmem>>, vector<16x512xf32>,
    %c0_231 = arith.constant 0 : index
    %c192_232 = arith.constant 192 : index
    %302 = vector.load %arg8[%c0_231, %c192_232] : memref<16x768xf32, #tpu.memory_space<vmem>>, vector<16x512xf32>
    %c328 = arith.constant 328 : index
    %c0_233 = arith.constant 0 : index
    %303 = vector.load %arg2[%c328, %c0_233] : memref<360x512xf32, #tpu.memory_space<vmem>>, vector<16x512xf32>
    %304 = arith.mulf %302, %303 : vector<16x512xf32>
    %c112_234 = arith.constant 112 : index
    %c0_235 = arith.constant 0 : index
    %305 = vector.load %arg9[%c112_234, %c0_235] : memref<144x512xf32, #tpu.memory_space<vmem>>, vector<16x512xf32>
    tpu.vector_store %arg9[%c112_234, %c0_235], %304 {strides = array<i32>} : memref<144x512xf32, #tpu.memory_space<vmem>>, vector<16x512xf32>,
    %c0_236 = arith.constant 0 : index
    %c196 = arith.constant 196 : index
    %306 = vector.load %arg8[%c0_236, %c196] : memref<16x768xf32, #tpu.memory_space<vmem>>, vector<16x512xf32>
    %c344 = arith.constant 344 : index
    %c0_237 = arith.constant 0 : index
    %307 = vector.load %arg2[%c344, %c0_237] : memref<360x512xf32, #tpu.memory_space<vmem>>, vector<16x512xf32>
    %308 = arith.mulf %306, %307 : vector<16x512xf32>
    %c128_238 = arith.constant 128 : index
    %c0_239 = arith.constant 0 : index
    %309 = vector.load %arg9[%c128_238, %c0_239] : memref<144x512xf32, #tpu.memory_space<vmem>>, vector<16x512xf32>
    tpu.vector_store %arg9[%c128_238, %c0_239], %308 {strides = array<i32>} : memref<144x512xf32, #tpu.memory_space<vmem>>, vector<16x512xf32>,
    %c0_240 = arith.constant 0 : index
    %c0_241 = arith.constant 0 : index
    %310 = vector.load %arg9[%c0_240, %c0_241] : memref<144x512xf32, #tpu.memory_space<vmem>>, vector<144x512xf32>
    %311 = arith.truncf %310 : vector<144x512xf32> to vector<144x512xbf16>
    %c0_242 = arith.constant 0 : index
    %c0_243 = arith.constant 0 : index
    %312 = vector.load %arg6[%c0_242, %c0_243] : memref<16x144xbf16, #tpu.memory_space<vmem>>, vector<16x144xbf16>
    %cst_244 = arith.constant dense<0.000000e+00> : vector<16x512xf32>
    %313 = tpu.matmul %312, %311, %cst_244 {dimension_numbers = #tpu.dot_dimension_numbers<[1], [0], [0], [1], [0, 0, 1, 1], [], []>} : vector<16x144xbf16>, vector<144x512xbf16>, vector<16x512xf32> -> vector<16x512xf32>
    %314 = vector.extract_strided_slice %313 {offsets = [0, 0], sizes = [16, 256], strides = [1, 1]} : vector<16x512xf32> to vector<16x256xf32>
    %cst_245 = arith.constant dense<0.000000e+00> : vector<16xf32>
    %315 = vector.multi_reduction <add>, %314, %cst_245 [1] : vector<16x256xf32> to vector<16xf32>
    %316 = vector.shape_cast %315 : vector<16xf32> to vector<16x1xf32>
    %cst_246 = arith.constant 3.906250e-03 : f32
    %317 = vector.broadcast %cst_246 : f32 to vector<16x1xf32>
    %318 = arith.mulf %316, %317 : vector<16x1xf32>
    %319 = arith.mulf %314, %314 : vector<16x256xf32>
    %cst_247 = arith.constant dense<0.000000e+00> : vector<16xf32>
    %320 = vector.multi_reduction <add>, %319, %cst_247 [1] : vector<16x256xf32> to vector<16xf32>
    %321 = vector.shape_cast %320 : vector<16xf32> to vector<16x1xf32>
    %cst_248 = arith.constant 3.906250e-03 : f32
    %322 = vector.broadcast %cst_248 : f32 to vector<16x1xf32>
    %323 = arith.mulf %321, %322 : vector<16x1xf32>
    %324 = arith.mulf %318, %318 : vector<16x1xf32>
    %325 = arith.subf %323, %324 : vector<16x1xf32>
    %326 = vector.broadcast %318 : vector<16x1xf32> to vector<16x256xf32>
    %327 = arith.subf %314, %326 : vector<16x256xf32>
    %cst_249 = arith.constant 9.99999974E-6 : f32
    %328 = vector.broadcast %cst_249 : f32 to vector<16x1xf32>
    %329 = arith.addf %325, %328 : vector<16x1xf32>
    %330 = math.rsqrt %329 : vector<16x1xf32>
    %331 = vector.broadcast %330 : vector<16x1xf32> to vector<16x256xf32>
    %332 = arith.mulf %327, %331 : vector<16x256xf32>
    %cst_250 = arith.constant 0.000000e+00 : f32
    %333 = vector.broadcast %cst_250 : f32 to vector<16x256xf32>
    %334 = arith.maximumf %332, %333 : vector<16x256xf32>
    %c0_251 = arith.constant 0 : index
    %c128_252 = arith.constant 128 : index
    %335 = vector.load %arg8[%c0_251, %c128_252] : memref<16x768xf32, #tpu.memory_space<vmem>>, vector<16x256xf32>
    %336 = arith.addf %334, %335 : vector<16x256xf32>
    %c0_253 = arith.constant 0 : index
    %c0_254 = arith.constant 0 : index
    %c0_255 = arith.constant 0 : index
    %337 = vector.load %arg7[%c0_253, %c0_254, %c0_255] : memref<1x16x512xf32, #tpu.memory_space<vmem>>, vector<1x16x256xf32>
    %338 = vector.shape_cast %337 : vector<1x16x256xf32> to vector<16x256xf32>
    %339 = vector.shape_cast %336 : vector<16x256xf32> to vector<1x16x256xf32>
    tpu.vector_store %arg7[%c0_253, %c0_254, %c0_255], %339 {strides = array<i32>} : memref<1x16x512xf32, #tpu.memory_space<vmem>>, vector<1x16x256xf32>,
    %340 = vector.extract_strided_slice %313 {offsets = [0, 256], sizes = [16, 256], strides = [1, 1]} : vector<16x512xf32> to vector<16x256xf32>
    %cst_256 = arith.constant dense<0.000000e+00> : vector<16xf32>
    %341 = vector.multi_reduction <add>, %340, %cst_256 [1] : vector<16x256xf32> to vector<16xf32>
    %342 = vector.shape_cast %341 : vector<16xf32> to vector<16x1xf32>
    %cst_257 = arith.constant 3.906250e-03 : f32
    %343 = vector.broadcast %cst_257 : f32 to vector<16x1xf32>
    %344 = arith.mulf %342, %343 : vector<16x1xf32>
    %345 = arith.mulf %340, %340 : vector<16x256xf32>
    %cst_258 = arith.constant dense<0.000000e+00> : vector<16xf32>
    %346 = vector.multi_reduction <add>, %345, %cst_258 [1] : vector<16x256xf32> to vector<16xf32>
    %347 = vector.shape_cast %346 : vector<16xf32> to vector<16x1xf32>
    %cst_259 = arith.constant 3.906250e-03 : f32
    %348 = vector.broadcast %cst_259 : f32 to vector<16x1xf32>
    %349 = arith.mulf %347, %348 : vector<16x1xf32>
    %350 = arith.mulf %344, %344 : vector<16x1xf32>
    %351 = arith.subf %349, %350 : vector<16x1xf32>
    %352 = vector.broadcast %344 : vector<16x1xf32> to vector<16x256xf32>
    %353 = arith.subf %340, %352 : vector<16x256xf32>
    %cst_260 = arith.constant 9.99999974E-6 : f32
    %354 = vector.broadcast %cst_260 : f32 to vector<16x1xf32>
    %355 = arith.addf %351, %354 : vector<16x1xf32>
    %356 = math.rsqrt %355 : vector<16x1xf32>
    %357 = vector.broadcast %356 : vector<16x1xf32> to vector<16x256xf32>
    %358 = arith.mulf %353, %357 : vector<16x256xf32>
    %cst_261 = arith.constant 0.000000e+00 : f32
    %359 = vector.broadcast %cst_261 : f32 to vector<16x256xf32>
    %360 = arith.maximumf %358, %359 : vector<16x256xf32>
    %c0_262 = arith.constant 0 : index
    %c384_263 = arith.constant 384 : index
    %361 = vector.load %arg8[%c0_262, %c384_263] : memref<16x768xf32, #tpu.memory_space<vmem>>, vector<16x256xf32>
    %362 = arith.addf %360, %361 : vector<16x256xf32>
    %c0_264 = arith.constant 0 : index
    %c0_265 = arith.constant 0 : index
    %c256 = arith.constant 256 : index
    %363 = vector.load %arg7[%c0_264, %c0_265, %c256] : memref<1x16x512xf32, #tpu.memory_space<vmem>>, vector<1x16x256xf32>
    %364 = vector.shape_cast %363 : vector<1x16x256xf32> to vector<16x256xf32>
    %365 = vector.shape_cast %362 : vector<16x256xf32> to vector<1x16x256xf32>
    tpu.vector_store %arg7[%c0_264, %c0_265, %c256], %365 {strides = array<i32>} : memref<1x16x512xf32, #tpu.memory_space<vmem>>, vector<1x16x256xf32>,
    return
  }
  func.func @transform_0(%arg0: i32) -> (i32, i32, i32) {
    %c0_i32 = arith.constant 0 : i32
    %c0_i32_0 = arith.constant 0 : i32
    %c0_i32_1 = arith.constant 0 : i32
    return %arg0, %c0_i32, %c0_i32_0 : i32, i32, i32
  }
  func.func @transform_1(%arg0: i32) -> (i32, i32) {
    %c0_i32 = arith.constant 0 : i32
    %c0_i32_0 = arith.constant 0 : i32
    %c0_i32_1 = arith.constant 0 : i32
    return %c0_i32, %c0_i32_0 : i32, i32
  }
  func.func @transform_2(%arg0: i32) -> (i32, i32) {
    %c0_i32 = arith.constant 0 : i32
    %c0_i32_0 = arith.constant 0 : i32
    %c0_i32_1 = arith.constant 0 : i32
    return %c0_i32, %c0_i32_0 : i32, i32
  }
  func.func @transform_3(%arg0: i32) -> (i32, i32) {
    %c0_i32 = arith.constant 0 : i32
    %c0_i32_0 = arith.constant 0 : i32
    %c0_i32_1 = arith.constant 0 : i32
    return %c0_i32, %c0_i32_0 : i32, i32
  }
  func.func @transform_4(%arg0: i32) -> (i32, i32) {
    %c0_i32 = arith.constant 0 : i32
    %c0_i32_0 = arith.constant 0 : i32
    %c0_i32_1 = arith.constant 0 : i32
    return %c0_i32, %c0_i32_0 : i32, i32
  }
  func.func @transform_5(%arg0: i32) -> (i32, i32) {
    %c0_i32 = arith.constant 0 : i32
    %c0_i32_0 = arith.constant 0 : i32
    %c0_i32_1 = arith.constant 0 : i32
    return %c0_i32, %c0_i32_0 : i32, i32
  }
  func.func @transform_6(%arg0: i32) -> (i32, i32, i32) {
    %c0_i32 = arith.constant 0 : i32
    %c0_i32_0 = arith.constant 0 : i32
    %c0_i32_1 = arith.constant 0 : i32
    return %arg0, %c0_i32, %c0_i32_0 : i32, i32, i32
  }
}

</mosaic_0001>

<bundles_post_ra>
// kernel: forward.1
= control target key start
LH: loop header
LB: loop body
LE: loop exit
PB: predicated region body
PF: predicated region fallthrough
CT: control target
= control target key end

     0   :  { %11 = vsyncpa [#allocation5], 0  ;;  %s4525_s21 = smov 0   ;;  %s6248_s0 = inlined_call_operand.vmem [shape: f32[2,8,512], index: 0, kind: input, shape index: {}]   ;;  %s6249_s1 = inlined_call_operand.hbm [shape: f32[360,512], index: 1, kind: input, shape index: {}]   ;;  %s6250_s2 = inlined_call_operand.vmem [shape: bf16[8,72], index: 2, kind: input, shape index: {}]   ;;  %s6251_s3 = inlined_call_operand.vmem [shape: bf16[8,72], index: 3, kind: input, shape index: {}]   ;;  %s6252_s4 = inlined_call_operand.vmem [shape: bf16[16,72], index: 4, kind: input, shape index: {}]   ;;  %s6253_s5 = inlined_call_operand.vmem [shape: bf16[16,144], index: 5, kind: input, shape index: {}]   ;;  %s6254_s6 = inlined_call_operand.vmem [shape: f32[2,16,512], index: 6, kind: output, shape index: {}]  }
   0x1 LB: > { %s4531_s22 = sadd.s32 4294967295, %s4463_s21   ;;  %p3884_p0 = scmp.ge.s32.totalorder %s4463_s21, 1  ;;  %s4463_s21 = sphi %s4525_s21, %s17_s21  }
   0x2   : > { %p179_p1 = scmp.lt.s32.totalorder %s4463_s21, 3  ;;  %s4465_s23 = smov [#allocation4]  }
   0x3   : > { %s191_s24 = sshll.u32 %s4465_s23, 4  ;;  %p6255_p3 = scmp.eq.s32.totalorder %s4531_s22, 0  ;;  %s192_s24 = int_to_ptr.vmem [resolvable:$true] %s191_s24 }
   0x4   : > { %p4535_p2 = pnand %p3884_p0, %p179_p1  ;;  %s4425_s29 = scalar_lea.hbm %s6249_s1, 23040 }
   0x5   : > { %p4426_p6 = scmp.ne.s32.totalorder %s6249_s1, %s4425_s29  ;;  %p4432_p10 = scmp.lt.u32.totalorder %s4425_s29, %s6249_s1 }
   0x6   : > { %s6275_s25 = scalar_select %p4535_p2, 1, 0 }
   0x7   : > { %p3918_p4 = pneg %p4535_p2 }
   0x9   : > { %p4544_p5 = pnand %p6255_p3, %p3918_p4 }
   0xb   : > { %p4427_p7 = pneg %p4544_p5 }
   0xd   : > { %p4428_p8 = pnand %p4427_p7, %p4426_p6 }
   0xf   : > { %p4429_p9 = pneg %p4428_p8 }
  0x11   : > { %p4434_p11 = pnand %p4432_p10, %p4429_p9 }
  0x13   : > { %4437 = shalt.err (!%p4434_p11)
}
  0x14   : > { %s4438_s10 = scalar_lea.vmem %s192_s24, 23040  ;;  %p4446_p1 = scmp.lt.s32.totalorder %s192_s24, %s192_s24 }
  0x15   : > { %p4439_p12 = scmp.ne.s32.totalorder %s192_s24, %s4438_s10  ;;  %p4447_p4 = scmp.lt.s32.totalorder %s4438_s10, %s4438_s10 }
  0x17   : > { %p4441_p13 = pnand %p4439_p12, %p4427_p7  ;;  %p4448_p3 = por %p4447_p4, %p4446_p1 }
  0x19   : > { %p4442_p0 = pneg %p4441_p13 }
  0x1b   : > { %p4449_p2 = pnand %p4448_p3, %p4442_p0 }
  0x1d   : > { %4452 = shalt.err (!%p4449_p2)
}
  0x1e   : > { %s4466_s11 = smov 512   ;;  %s4467_s12 = smov 32  }
  0x1f   : > { %3921 = dma.hbm_to_vmem [thread:$0]  (!%p4544_p5), %s6249_s1, 23040, %s192_s24, [#allocation5], %s4466_s11, %s4466_s11, %s4467_s12  }
  0x20   : > { %p6277_p6 = scmp.ne.s32.totalorder %s6275_s25, 0 }
  0x22   : > { %227 = sbr.rel (%p6277_p6) target bundleno = 2445 (0x98d), region = 44 }
  0x29   : > { %p6278_p8 = scmp.eq.s32.totalorder %s4531_s22, 0 }
  0x2b   : > { %4458 = dma.done.wait (%p6278_p8), [#allocation5], 23040   ;;  %p6279_p7 = pmov %p6278_p8 }
  0x2c   : > { %v287_v0 = vld [vmem:[#allocation4 + $0x10] sm:$0xff]  ;;  %v285_v1 = vld [vmem:[#allocation4] sm:$0xff]  ;;  %s4468_s15 = smov 111   ;;  %v288_v2 = vld [vmem:[#allocation4 + $0x18] sm:$0xff]  ;;  %s4469_s16 = smov 112   ;;  %vm301_vm0 = vcmask 908288  }
  0x2d   : > { %4460 = vsyncadd (%p6279_p7), [#allocation5], 4294944256  ;;  %297 = vrot.lane.b32.xlu1 %v287_v0, %s4468_s15  ;;  %293 = vrot.lane.b32.xlu0 %v285_v1, %s4468_s15  ;;  %v286_v3 = vld [vmem:[#allocation4 + $0x8] sm:$0xff]  ;;  %v348_v5 = vld [vmem:[#allocation4 + $0x20] sm:$0xff]  ;;  %s4470_s17 = smov 113   ;;  %s4471_s18 = smov 127  }
  0x2e   : > { %v349_v4 = vld [vmem:[#allocation4 + $0x28] sm:$0xff]  ;;  %v351_v6 = vld [vmem:[#allocation4 + $0x38] sm:$0xff]  ;;  %v350_v7 = vld [vmem:[#allocation4 + $0x30] sm:$0xff]  ;;  %s4472_s19 = smov 1   ;;  %s4473_s20 = smov 15   ;;  %vm364_vm1 = vcmask 916480  }
  0x2f   : > { %v412_v8 = vld [vmem:[#allocation4 + $0x48] sm:$0xff]  ;;  %v411_v9 = vld [vmem:[#allocation4 + $0x40] sm:$0xff]  ;;  %v414_v10 = vld [vmem:[#allocation4 + $0x58] sm:$0xff]  ;;  %s4474_s23 = smov 16   ;;  %s4475_s24 = smov 17   ;;  %vm427_vm2 = vcmask 924672  }
  0x30   : > { %v413_v11 = vld [vmem:[#allocation4 + $0x50] sm:$0xff]  ;;  %v475_v12 = vld [vmem:[#allocation4 + $0x68] sm:$0xff]  ;;  %v474_v13 = vld [vmem:[#allocation4 + $0x60] sm:$0xff]  ;;  %p257_p2 = scmp.lt.s32.totalorder %s4531_s22, 1  ;;  %vm490_vm3 = vcmask 1039360   ;;  %vm519_vm4 = vcmask 7168  }
  0x31   : > { %299 = vrot.lane.b32.xlu1 %v288_v2, %s4468_s15  ;;  %295 = vrot.lane.b32.xlu0 %v286_v3, %s4468_s15  ;;  %v477_v14 = vld [vmem:[#allocation4 + $0x78] sm:$0xff]  ;;  %v476_v15 = vld [vmem:[#allocation4 + $0x70] sm:$0xff]  ;;  %v554_v16 = vld [vmem:[#allocation4 + $0xa8] sm:$0xff]  ;;  %vm456_vm5 = vcmask 121856   ;;  %vm393_vm6 = vcmask 130048   ;;  %vm330_vm7 = vcmask 138240  }
  0x32   : > { %v553_v17 = vld [vmem:[#allocation4 + $0xa0] sm:$0xff]  ;;  %v556_v18 = vld [vmem:[#allocation4 + $0xb8] sm:$0xff]  ;;  %v555_v19 = vld [vmem:[#allocation4 + $0xb0] sm:$0xff]  ;;  %s6334_s22 = smov (!%p257_p2, %s4531_s22), 1  ;;  %s4477_s29 = smov 94   ;;  %vm853_vm8 = vcmask 1043456  }
  0x33   : > { %v615_v20 = vld [vmem:[#allocation4 + $0xc8] sm:$0xff]  ;;  %v614_v21 = vld [vmem:[#allocation4 + $0xc0] sm:$0xff]  ;;  %v617_v22 = vld [vmem:[#allocation4 + $0xd8] sm:$0xff]  ;;  %s3912_s25 = sshll.u32 %s6334_s22, 5  ;;  %s4478_s30 = smov 96   ;;  %vm849_vm9 = vcmask 588800  }
  0x34   : > { %v616_v23 = vld [vmem:[#allocation4 + $0xd0] sm:$0xff]  ;;  %v676_v24 = vld [vmem:[#allocation4 + $0xe8] sm:$0xff]  ;;  %v675_v25 = vld [vmem:[#allocation4 + $0xe0] sm:$0xff]  ;;  %s261_s28 = scalar_lea.vmem %s6248_s0, %s3912_s25  ;;  %s4479_s7 = smov 98   ;;  %vm1021_vm10 = vcmask 769024   ;;  %vm1084_vm13 = vcmask 785408  }
  0x35   : > { %358 = vrot.lane.b32.xlu1 %v349_v4, %s4469_s16  ;;  %356 = vrot.lane.b32.xlu0 %v348_v5, %s4469_s16  ;;  %v677_v26 = vld [vmem:[#allocation4 + $0xf0] sm:$0xff]  ;;  %v678_v27 = vld [vmem:[#allocation4 + $0xf8] sm:$0xff]  ;;  %v737_v28 = vld [vmem:[#allocation4 + $0x108] sm:$0xff]  ;;  %s4480_s8 = smov 126   ;;  %s4481_s9 = smov 2  }
  0x36   : > { %v736_v29 = vld [vmem:[#allocation4 + $0x100] sm:$0xff]  ;;  %v739_v30 = vld [vmem:[#allocation4 + $0x118] sm:$0xff]  ;;  %v738_v31 = vld [vmem:[#allocation4 + $0x110] sm:$0xff]  ;;  %s4482_s12 = smov 30   ;;  %s4483_s13 = smov 32  }
  0x37   : > { %v4628_v52 = vld [vmem:[%s261_s28] sm:$0xff]  ;;  %v4640_v59 = vld [vmem:[%s261_s28 + $0x10] sm:$0xff]  ;;  %v4642_v60 = vld [vmem:[%s261_s28 + $0x18] sm:$0xff]  ;;  %s4484_s14 = smov 34  }
  0x38   : > { %v4652_v5 = vld [vmem:[%s261_s28 + $0x8] sm:$0xff] }
  0x39   : > { %362 = vrot.lane.b32.xlu1 %v351_v6, %s4469_s16  ;;  %360 = vrot.lane.b32.xlu0 %v350_v7, %s4469_s16 }
  0x3d   : > { %421 = vrot.lane.b32.xlu1 %v412_v8, %s4470_s17  ;;  %419 = vrot.lane.b32.xlu0 %v411_v9, %s4470_s17 }
  0x41   : > { %425 = vrot.lane.b32.xlu1 %v414_v10, %s4470_s17  ;;  %423 = vrot.lane.b32.xlu0 %v413_v11, %s4470_s17 }
  0x45   : > { %484 = vrot.lane.b32.xlu1 %v475_v12, %s4471_s18  ;;  %482 = vrot.lane.b32.xlu0 %v474_v13, %s4471_s18 }
  0x49   : > { %488 = vrot.lane.b32.xlu1 %v477_v14, %s4471_s18  ;;  %486 = vrot.lane.b32.xlu0 %v476_v15, %s4471_s18 }
  0x4d   : > { %563 = vrot.lane.b32.xlu1 %v554_v16, %s4472_s19  ;;  %561 = vrot.lane.b32.xlu0 %v553_v17, %s4472_s19 }
  0x51   : > { %567 = vrot.lane.b32.xlu1 %v556_v18, %s4472_s19  ;;  %565 = vrot.lane.b32.xlu0 %v555_v19, %s4472_s19 }
  0x55   : > { %624 = vrot.lane.b32.xlu1 %v615_v20, %s4473_s20  ;;  %622 = vrot.lane.b32.xlu0 %v614_v21, %s4473_s20 }
  0x59   : > { %628 = vrot.lane.b32.xlu1 %v617_v22, %s4473_s20  ;;  %626 = vrot.lane.b32.xlu0 %v616_v23, %s4473_s20 }
  0x5d   : > { %685 = vrot.lane.b32.xlu1 %v676_v24, %s4474_s23  ;;  %683 = vrot.lane.b32.xlu0 %v675_v25, %s4474_s23 }
  0x61   : > { %687 = vrot.lane.b32.xlu0 %v677_v26, %s4474_s23  ;;  %689 = vrot.lane.b32.xlu1 %v678_v27, %s4474_s23 }
  0x65   : > { %746 = vrot.lane.b32.xlu1 %v737_v28, %s4475_s24  ;;  %744 = vrot.lane.b32.xlu0 %v736_v29, %s4475_s24 }
  0x69   : > { %750 = vrot.lane.b32.xlu1 %v739_v30, %s4475_s24  ;;  %748 = vrot.lane.b32.xlu0 %v738_v31, %s4475_s24 }
  0x9f   : > { %v298_v32 = vpop.permute.xlu1 %297  ;;  %v294_v33 = vpop.permute.xlu0 %293 }
  0xa0   : > { %v310_v34 = vmul.f32 0.0, %v294_v33 }
  0xa2   : > { %320 = vrot.lane.b32.xlu0 %v310_v34, %s4475_s24 }
  0xa3   : > { %v300_v35 = vpop.permute.xlu1 %299  ;;  %v296_v36 = vpop.permute.xlu0 %295 }
  0xa4   : > { %v304_v58 = vsel %vm301_vm0, %v298_v32, %v300_v35  ;;  %v314_v0 = vmul.f32 %v300_v35, %v4642_v60  ;;  %v302_v3 = vsel %vm301_vm0, %v294_v33, %v296_v36  ;;  %v303_v6 = vsel %vm301_vm0, %v296_v36, %v298_v32 }
  0xa5   : > { %v313_v63 = vmul.f32 %v304_v58, %v4640_v59  ;;  %v311_v12 = vmul.f32 %v302_v3, %v4628_v52  ;;  %v312_v13 = vmul.f32 %v303_v6, %v4652_v5 }
  0xa7   : > { %v4603_v37 = vpop.permute.xlu1 %358  ;;  %v357_v38 = vpop.permute.xlu0 %356  ;;  %v3962_v10 = vpack.i.bf16 %v314_v0, %v313_v63  ;;  %v3957_v27 = vpack.i.bf16 %v312_v13, %v311_v12 }
  0xa8   : > { %v373_v39 = vmul.f32 0.0, %v357_v38  ;;  %v365_v21 = vsel %vm364_vm1, %v357_v38, %v4603_v37 }
  0xa9   : > { %v374_v28 = vmul.f32 %v365_v21, %v4628_v52 }
  0xaa   : > { %383 = vrot.lane.b32.xlu1 %v373_v39, %s4474_s23 }
  0xab   : > { %v363_v40 = vpop.permute.xlu1 %362  ;;  %v361_v41 = vpop.permute.xlu0 %360 }
  0xac   : > { %v367_v2 = vsel %vm364_vm1, %v361_v41, %v363_v40  ;;  %v377_v7 = vmul.f32 %v363_v40, %v4642_v60  ;;  %v366_v14 = vsel %vm364_vm1, %v4603_v37, %v361_v41 }
  0xad   : > { %v376_v8 = vmul.f32 %v367_v2, %v4640_v59  ;;  %v375_v23 = vmul.f32 %v366_v14, %v4652_v5 }
  0xaf   : > { %v4606_v42 = vpop.permute.xlu1 %421  ;;  %v4608_v43 = vpop.permute.xlu0 %419  ;;  %v3972_v19 = vpack.i.bf16 %v377_v7, %v376_v8  ;;  %v3967_v33 = vpack.i.bf16 %v375_v23, %v374_v28  ;;  %v4476_v23 = vmov 0   ;;  %v1008_v28 = vld [vmem:[#allocation4 + $0x138] sm:$0xff] }
  0xb0   : > { %v436_v44 = vmul.f32 0.0, %v4608_v43  ;;  %v428_v32 = vsel %vm427_vm2, %v4608_v43, %v4606_v42  ;;  %898 = vmatprep.mubr.bf16.mxu0 %v4476_v23  ;;  %939 = vmatprep.mubr.bf16.mxu1 %v4476_v23 }
  0xb1   : > { %v437_v41 = vmul.f32 %v428_v32, %v4628_v52  ;;  %v1071_v32 = vld [vmem:[#allocation4 + $0x158] sm:$0xff] }
  0xb2   : > { %446 = vrot.lane.b32.xlu0 %v436_v44, %s4473_s20 }
  0xb3   : > { %v426_v45 = vpop.permute.xlu1 %425  ;;  %v424_v46 = vpop.permute.xlu0 %423 }
  0xb4   : > { %v430_v11 = vsel %vm427_vm2, %v424_v46, %v426_v45  ;;  %v440_v16 = vmul.f32 %v426_v45, %v4642_v60  ;;  %v429_v29 = vsel %vm427_vm2, %v4606_v42, %v424_v46 }
  0xb5   : > { %v439_v17 = vmul.f32 %v430_v11, %v4640_v59  ;;  %v438_v34 = vmul.f32 %v429_v29, %v4652_v5  ;;  %v1068_v29 = vld [vmem:[#allocation4 + $0x140] sm:$0xff] }
  0xb7   : > { %v4616_v47 = vpop.permute.xlu1 %484  ;;  %v4618_v48 = vpop.permute.xlu0 %482  ;;  %v3982_v26 = vpack.i.bf16 %v440_v16, %v439_v17 }
  0xb8   : > { %v499_v49 = vmul.f32 0.0, %v4618_v48  ;;  %v491_v42 = vsel %vm490_vm3, %v4618_v48, %v4616_v47 }
  0xba   : > { %509 = vrot.lane.b32.xlu1 %v499_v49, %s4472_s19  ;;  %v3977_v49 = vpack.i.bf16 %v438_v34, %v437_v41  ;;  %v1132_v34 = vld [vmem:[#allocation4 + $0x168] sm:$0xff]  ;;  %v1273_v41 = vld [vmem:[#allocation4 + $0x1c0] sm:$0xff] }
  0xbb   : > { %v489_v50 = vpop.permute.xlu1 %488  ;;  %v4623_v51 = vpop.permute.xlu0 %486 }
  0xbc   : > { %v493_v20 = vsel %vm490_vm3, %v4623_v51, %v489_v50  ;;  %v503_v24 = vmul.f32 %v489_v50, %v4642_v60  ;;  %v492_v39 = vsel %vm490_vm3, %v4616_v47, %v4623_v51  ;;  %v500_v47 = vmul.f32 %v491_v42, %v4628_v52  ;;  %v1274_v42 = vld [vmem:[#allocation4 + $0x1c8] sm:$0xff] }
  0xbd   : > { %v502_v25 = vmul.f32 %v493_v20, %v4640_v59  ;;  %v501_v44 = vmul.f32 %v492_v39, %v4652_v5  ;;  %v1196_v39 = vld [vmem:[#allocation4 + $0x190] sm:$0xff] }
  0xbf   : > { %v4630_v53 = vpop.permute.xlu1 %563  ;;  %v4632_v54 = vpop.permute.xlu0 %561  ;;  %v3992_v38 = vpack.i.bf16 %v503_v24, %v502_v25  ;;  %v1005_v24 = vld [vmem:[#allocation4 + $0x120] sm:$0xff] }
  0xc0   : > { %v577_v55 = vmul.f32 %v4632_v54, %v4628_v52  ;;  %v569_v48 = vsel %vm519_vm4, %v4632_v54, %v4630_v53 }
  0xc1   : > { %v578_v2 = vmul.f32 %v569_v48, %v4652_v5 }
  0xc2   : > { %587 = vrot.lane.b32.xlu0 %v577_v55, %s4471_s18 }
  0xc3   : > { %v568_v56 = vpop.permute.xlu1 %567  ;;  %v4637_v57 = vpop.permute.xlu0 %565 }
  0xc4   : > { %v571_v30 = vsel %vm519_vm4, %v4637_v57, %v568_v56  ;;  %v581_v35 = vmul.f32 0.0, %v568_v56  ;;  %v570_v55 = vsel %vm519_vm4, %v4630_v53, %v4637_v57 }
  0xc5   : > { %v580_v36 = vmul.f32 %v571_v30, %v4642_v60  ;;  %v579_v57 = vmul.f32 %v570_v55, %v4640_v59  ;;  %v1069_v30 = vld [vmem:[#allocation4 + $0x148] sm:$0xff] }
  0xc7   : > { %v625_v61 = vpop.permute.xlu1 %624  ;;  %v623_v62 = vpop.permute.xlu0 %622  ;;  %v4002_v46 = vpack.i.bf16 %v581_v35, %v580_v36  ;;  %v3997_v11 = vpack.i.bf16 %v579_v57, %v578_v2  ;;  %v1133_v35 = vld [vmem:[#allocation4 + $0x170] sm:$0xff]  ;;  %v1134_v36 = vld [vmem:[#allocation4 + $0x178] sm:$0xff] }
  0xc8   : > { %v638_v1 = vmul.f32 %v623_v62, %v4628_v52  ;;  %v630_v43 = vsel %vm456_vm5, %v623_v62, %v625_v61 }
  0xc9   : > { %v639_v58 = vmul.f32 %v630_v43, %v4652_v5  ;;  %v1275_v43 = vld [vmem:[#allocation4 + $0x1d0] sm:$0xff] }
  0xca   : > { %648 = vrot.lane.b32.xlu1 %v638_v1, %s4470_s17  ;;  %v3987_v1 = vpack.i.bf16 %v501_v44, %v500_v47  ;;  %v1276_v44 = vld [vmem:[#allocation4 + $0x1d8] sm:$0xff] }
  0xcb   : > { %v4650_v4 = vpop.permute.xlu0 %626  ;;  %v4657_v9 = vpop.permute.xlu1 %628 }
  0xcc   : > { %v631_v40 = vsel %vm456_vm5, %v625_v61, %v4650_v4  ;;  %v632_v53 = vsel %vm456_vm5, %v4650_v4, %v4657_v9  ;;  %v642_v7 = vmul.f32 0.0, %v4657_v9 }
  0xcd   : > { %v640_v45 = vmul.f32 %v631_v40, %v4640_v59  ;;  %v641_v8 = vmul.f32 %v632_v53, %v4642_v60  ;;  %v1197_v40 = vld [vmem:[#allocation4 + $0x198] sm:$0xff] }
  0xce   : > { %3963 = vrot.lane.b32.xlu1 %v3962_v10, %s4475_s24 }
  0xcf   : > { %v684_v15 = vpop.permute.xlu0 %683  ;;  %v686_v22 = vpop.permute.xlu1 %685  ;;  %v4007_v0 = vpack.i.bf16 %v640_v45, %v639_v58  ;;  %v4012_v17 = vpack.i.bf16 %v642_v7, %v641_v8 }
  0xd0   : > { %v699_v18 = vmul.f32 %v684_v15, %v4628_v52  ;;  %v691_v61 = vsel %vm393_vm6, %v684_v15, %v686_v22 }
  0xd1   : > { %v700_v54 = vmul.f32 %v691_v61, %v4652_v5 }
  0xd2   : > { %3973 = vrot.lane.b32.xlu1 %v3972_v19, %s4474_s23  ;;  %709 = vrot.lane.b32.xlu0 %v699_v18, %s4469_s16 }
  0xd3   : > { %v690_v31 = vpop.permute.xlu1 %689  ;;  %v688_v37 = vpop.permute.xlu0 %687 }
  0xd4   : > { %v692_v56 = vsel %vm393_vm6, %v686_v22, %v688_v37  ;;  %v693_v12 = vsel %vm393_vm6, %v688_v37, %v690_v31  ;;  %v703_v16 = vmul.f32 0.0, %v690_v31  ;;  %v1070_v31 = vld [vmem:[#allocation4 + $0x150] sm:$0xff]  ;;  %v1194_v37 = vld [vmem:[#allocation4 + $0x180] sm:$0xff] }
  0xd5   : > { %v701_v63 = vmul.f32 %v692_v56, %v4640_v59  ;;  %v702_v15 = vmul.f32 %v693_v12, %v4642_v60 }
  0xd6   : > { %3983 = vrot.lane.b32.xlu1 %v3982_v26, %s4473_s20  ;;  %3958 = vrot.lane.b32.xlu0 %v3957_v27, %s4475_s24  ;;  %v1007_v26 = vld [vmem:[#allocation4 + $0x130] sm:$0xff]  ;;  %v1006_v27 = vld [vmem:[#allocation4 + $0x128] sm:$0xff] }
  0xd7   : > { %v747_v50 = vpop.permute.xlu1 %746  ;;  %v745_v51 = vpop.permute.xlu0 %744  ;;  %v4017_v10 = vpack.i.bf16 %v701_v63, %v700_v54  ;;  %v4022_v22 = vpack.i.bf16 %v703_v16, %v702_v15 }
  0xd8   : > { %v752_v62 = vsel %vm330_vm7, %v745_v51, %v747_v50  ;;  %v760_v3 = vmul.f32 %v745_v51, %v4628_v52 }
  0xd9   : > { %v761_v6 = vmul.f32 %v752_v62, %v4652_v5 }
  0xda   : > { %3993 = vrot.lane.b32.xlu1 %v3992_v38, %s4472_s19  ;;  %3968 = vrot.lane.b32.xlu0 %v3967_v33, %s4474_s23  ;;  %v1131_v33 = vld [vmem:[#allocation4 + $0x160] sm:$0xff]  ;;  %v1195_v38 = vld [vmem:[#allocation4 + $0x188] sm:$0xff]  ;;  %s4489_s23 = smov 4  }
  0xdb   : > { %v751_v4 = vpop.permute.xlu1 %750  ;;  %v749_v13 = vpop.permute.xlu0 %748  ;;  %v4027_v14 = vpack.i.bf16 %v761_v6, %v760_v3 }
  0xdc   : > { %v753_v18 = vsel %vm330_vm7, %v747_v50, %v749_v13  ;;  %v754_v9 = vsel %vm330_vm7, %v749_v13, %v751_v4  ;;  %v764_v19 = vmul.f32 0.0, %v751_v4 }
  0xdd   : > { %v762_v20 = vmul.f32 %v753_v18, %v4640_v59  ;;  %v763_v21 = vmul.f32 %v754_v9, %v4642_v60 }
  0xde   : > { %4003 = vrot.lane.b32.xlu1 %v4002_v46, %s4471_s18  ;;  %3978 = vrot.lane.b32.xlu0 %v3977_v49, %s4473_s20  ;;  %s4488_s20 = smov 124  }
  0xdf   : > { %v4032_v25 = vpack.i.bf16 %v763_v21, %v762_v20 }
  0xe2   : > { %4008 = vrot.lane.b32.xlu1 %v4007_v0, %s4470_s17  ;;  %3988 = vrot.lane.b32.xlu0 %v3987_v1, %s4472_s19  ;;  %s4487_s19 = smov 68  }
  0xe6   : > { %4018 = vrot.lane.b32.xlu1 %v4017_v10, %s4469_s16  ;;  %3998 = vrot.lane.b32.xlu0 %v3997_v11, %s4471_s18  ;;  %s4486_s18 = smov 64  }
  0xea   : > { %4013 = vrot.lane.b32.xlu0 %v4012_v17, %s4470_s17  ;;  %4028 = vrot.lane.b32.xlu1 %v4027_v14, %s4468_s15  ;;  %s4485_s17 = smov 60  }
  0xee   : > { %4023 = vrot.lane.b32.xlu0 %v4022_v22, %s4469_s16  ;;  %778 = vrot.lane.b32.xlu1 %v764_v19, %s4468_s15 }
  0xf2   : > { %4033 = vrot.lane.b32.xlu0 %v4032_v25, %s4468_s15  ;;  %1013 = vrot.lane.b32.xlu1 %v1005_v24, %s4477_s29 }
  0xf6   : > { %1017 = vrot.lane.b32.xlu1 %v1007_v26, %s4477_s29  ;;  %1015 = vrot.lane.b32.xlu0 %v1006_v27, %s4477_s29 }
  0xfa   : > { %1019 = vrot.lane.b32.xlu1 %v1008_v28, %s4477_s29  ;;  %1076 = vrot.lane.b32.xlu0 %v1068_v29, %s4478_s30 }
  0xfe   : > { %1078 = vrot.lane.b32.xlu1 %v1069_v30, %s4478_s30  ;;  %1080 = vrot.lane.b32.xlu0 %v1070_v31, %s4478_s30  ;;  %v539_v30 = vld [vmem:[#allocation4 + $0x98] sm:$0xff]  ;;  %v537_v31 = vld [vmem:[#allocation4 + $0x88] sm:$0xff] }
 0x102   : > { %1082 = vrot.lane.b32.xlu1 %v1071_v32, %s4478_s30  ;;  %1139 = vrot.lane.b32.xlu0 %v1131_v33, %s4479_s7  ;;  %v538_v32 = vld [vmem:[#allocation4 + $0x90] sm:$0xff] }
 0x106   : > { %1141 = vrot.lane.b32.xlu1 %v1132_v34, %s4479_s7  ;;  %1143 = vrot.lane.b32.xlu0 %v1133_v35, %s4479_s7  ;;  %v536_v35 = vld [vmem:[#allocation4 + $0x80] sm:$0xff] }
 0x10a   : > { %1145 = vrot.lane.b32.xlu1 %v1134_v36, %s4479_s7  ;;  %1202 = vrot.lane.b32.xlu0 %v1194_v37, %s4480_s8 }
 0x10e   : > { %1204 = vrot.lane.b32.xlu1 %v1195_v38, %s4480_s8  ;;  %1206 = vrot.lane.b32.xlu0 %v1196_v39, %s4480_s8  ;;  %v543_v38 = vmul.f32 %v539_v30, %v4642_v60  ;;  %v541_v39 = vmul.f32 %v537_v31, %v4652_v5 }
 0x112   : > { %1208 = vrot.lane.b32.xlu1 %v1197_v40, %s4480_s8  ;;  %1281 = vrot.lane.b32.xlu0 %v1273_v41, %s4481_s9  ;;  %v542_v40 = vmul.f32 %v538_v32, %v4640_v59 }
 0x114   : > { %v321_v46 = vpop.permute.xlu0 %320 }
 0x116   : > { %1283 = vrot.lane.b32.xlu1 %v1274_v42, %s4481_s9  ;;  %1285 = vrot.lane.b32.xlu0 %v1275_v43, %s4481_s9 }
 0x11a   : > { %1287 = vrot.lane.b32.xlu1 %v1276_v44, %s4481_s9  ;;  %v540_v44 = vmul.f32 %v536_v35, %v4628_v52 }
 0x11c   : > { %v384_v45 = vpop.permute.xlu1 %383 }
 0x124   : > { %v4766_v50 = vpop.permute.xlu0 %446 }
 0x12c   : > { %v4764_v49 = vpop.permute.xlu1 %509 }
 0x134   : > { %v4770_v55 = vpop.permute.xlu0 %587 }
 0x13c   : > { %v4768_v51 = vpop.permute.xlu1 %648 }
 0x140   : > { %v3964_v56 = vpop.permute.xlu1 %3963 }
 0x141   : > { %v3966_v47 = vunpack.i.h.bf16 %v3964_v56  ;;  %v3965_v48 = vunpack.i.l.bf16 %v3964_v56 }
 0x143   : > { %v334_v63 = vsel %vm330_vm7, %v3965_v48, %v3966_v47 }
 0x144   : > { %v3974_v58 = vpop.permute.xlu1 %3973  ;;  %v4772_v61 = vpop.permute.xlu0 %709 }
 0x145   : > { %v3976_v62 = vunpack.i.h.bf16 %v3974_v58  ;;  %v3975_v57 = vunpack.i.l.bf16 %v3974_v58 }
 0x147   : > { %v397_v0 = vsel %vm393_vm6, %v3975_v57, %v3976_v62 }
 0x148   : > { %v3984_v1 = vpop.permute.xlu1 %3983  ;;  %v3959_v2 = vpop.permute.xlu0 %3958  ;;  %v831_v53 = vpack.c.bf16 %v397_v0, %v334_v63 }
 0x149   : > { %v3986_v54 = vunpack.i.h.bf16 %v3984_v1  ;;  %v3985_v3 = vunpack.i.l.bf16 %v3984_v1  ;;  %v3961_v6 = vunpack.i.h.bf16 %v3959_v2  ;;  %v3960_v7 = vunpack.i.l.bf16 %v3959_v2 }
 0x14a   : > { %907 = vmatprep.subr.bf16.mxu1 %v831_v53 }
 0x14b   : > { %v332_v14 = vsel %vm330_vm7, %v3960_v7, %v3961_v6  ;;  %v333_v15 = vsel %vm330_vm7, %v3961_v6, %v3965_v48  ;;  %v331_v16 = vsel %vm330_vm7, %v321_v46, %v3960_v7  ;;  %v460_v17 = vsel %vm456_vm5, %v3985_v3, %v3986_v54 }
 0x14c   : > { %v3994_v8 = vpop.permute.xlu1 %3993  ;;  %v3969_v10 = vpop.permute.xlu0 %3968  ;;  %vm2901_vm7 = vcmask 1014784  }
 0x14d   : > { %v3996_v11 = vunpack.i.h.bf16 %v3994_v8  ;;  %v3995_v12 = vunpack.i.l.bf16 %v3994_v8  ;;  %v3971_v4 = vunpack.i.h.bf16 %v3969_v10  ;;  %v3970_v13 = vunpack.i.l.bf16 %v3969_v10 }
 0x14f   : > { %v395_v18 = vsel %vm393_vm6, %v3970_v13, %v3971_v4  ;;  %v396_v9 = vsel %vm393_vm6, %v3971_v4, %v3975_v57  ;;  %v394_v19 = vsel %vm393_vm6, %v384_v45, %v3970_v13  ;;  %v523_v20 = vsel %vm519_vm4, %v3995_v12, %v3996_v11 }
 0x150   : > { %v4004_v21 = vpop.permute.xlu1 %4003  ;;  %v3979_v22 = vpop.permute.xlu0 %3978  ;;  %v829_v24 = vpack.c.bf16 %v395_v18, %v332_v14  ;;  %v830_v25 = vpack.c.bf16 %v396_v9, %v333_v15  ;;  %v828_v26 = vpack.c.bf16 %v394_v19, %v331_v16  ;;  %v835_v27 = vpack.c.bf16 %v523_v20, %v460_v17 }
 0x151   : > { %v4006_v28 = vunpack.i.h.bf16 %v4004_v21  ;;  %v4005_v29 = vunpack.i.l.bf16 %v4004_v21  ;;  %v3981_v33 = vunpack.i.h.bf16 %v3979_v22  ;;  %v3980_v34 = vunpack.i.l.bf16 %v3979_v22 }
 0x152   : > { %866 = vmatprep.subr.bf16.mxu0 %v829_v24  ;;  %908 = vmatpush1.bf16.msra.mxu1 %v830_v25 }
 0x153   : > { %867 = vmatpush1.bf16.msra.mxu0 %v828_v26  ;;  %909 = vmatprep.subr.bf16.mxu1 %v835_v27  ;;  %v600_v43 = vsel %vm490_vm3, %v4005_v29, %v4006_v28  ;;  %v458_v46 = vsel %vm456_vm5, %v3980_v34, %v3981_v33  ;;  %v459_v56 = vsel %vm456_vm5, %v3981_v33, %v3985_v3 }
 0x154   : > { %v4009_v36 = vpop.permute.xlu1 %4008  ;;  %v3989_v37 = vpop.permute.xlu0 %3988  ;;  %v457_v47 = vsel %vm456_vm5, %v4766_v50, %v3980_v34  ;;  %v839_v0 = vpack.c.bf16 %v600_v43, %v543_v38  ;;  %vm1050_vm5 = vcmask 277504  }
 0x155   : > { %v3991_v41 = vunpack.i.h.bf16 %v3989_v37  ;;  %v3990_v42 = vunpack.i.l.bf16 %v3989_v37  ;;  %v4011_v45 = vunpack.i.h.bf16 %v4009_v36  ;;  %v4010_v48 = vunpack.i.l.bf16 %v4009_v36 }
 0x157   : > { %v521_v60 = vsel %vm519_vm4, %v3990_v42, %v3991_v41  ;;  %v522_v5 = vsel %vm519_vm4, %v3991_v41, %v3995_v12  ;;  %v520_v59 = vsel %vm519_vm4, %v4764_v49, %v3990_v42  ;;  %v659_v12 = vsel %vm427_vm2, %v4010_v48, %v4011_v45  ;;  %v848_v41 = vld [vmem:[%s6250_s2] sm:$0xf] }
 0x158   : > { %v4019_v58 = vpop.permute.xlu1 %4018  ;;  %v3999_v62 = vpop.permute.xlu0 %3998  ;;  %v833_v57 = vpack.c.bf16 %v521_v60, %v458_v46  ;;  %v834_v52 = vpack.c.bf16 %v522_v5, %v459_v56  ;;  %v832_v63 = vpack.c.bf16 %v520_v59, %v457_v47  ;;  %v658_v9 = vsel %vm427_vm2, %v4768_v51, %v4010_v48 }
 0x159   : > { %v4021_v1 = vunpack.i.h.bf16 %v4019_v58  ;;  %v4020_v2 = vunpack.i.l.bf16 %v4019_v58  ;;  %v4001_v53 = vunpack.i.h.bf16 %v3999_v62  ;;  %v4000_v54 = vunpack.i.l.bf16 %v3999_v62 }
 0x15a   : > { %868 = vmatprep.subr.bf16.mxu0 %v833_v57  ;;  %910 = vmatpush1.bf16.msra.mxu1 %v834_v52  ;;  %vm1113_vm4 = vcmask 261120  }
 0x15b   : > { %869 = vmatpush1.bf16.msra.mxu0 %v832_v63  ;;  %911 = vmatprep.subr.bf16.mxu1 %v839_v0  ;;  %v598_v50 = vsel %vm490_vm3, %v4000_v54, %v4001_v53  ;;  %v599_v3 = vsel %vm490_vm3, %v4001_v53, %v4005_v29  ;;  %v597_v49 = vsel %vm490_vm3, %v4770_v55, %v4000_v54  ;;  %v1337_v53 = vld [vmem:[#allocation4 + $0x1f8] sm:$0xff]  ;;  %v1396_v54 = vld [vmem:[#allocation4 + $0x208] sm:$0xff]  ;;  %vm1176_vm3 = vcmask 244736  }
 0x15c   : > { %v4014_v6 = vpop.permute.xlu0 %4013  ;;  %v837_v7 = vpack.c.bf16 %v598_v50, %v541_v39  ;;  %v838_v8 = vpack.c.bf16 %v599_v3, %v542_v40  ;;  %v836_v10 = vpack.c.bf16 %v597_v49, %v540_v44  ;;  %v720_v11 = vsel %vm364_vm1, %v4020_v2, %v4021_v1  ;;  %v4029_v14 = vpop.permute.xlu1 %4028  ;;  %v1398_v3 = vld [vmem:[#allocation4 + $0x218] sm:$0xff]  ;;  %v1334_v49 = vld [vmem:[#allocation4 + $0x1e0] sm:$0xff] }
 0x15d   : > { %v4016_v4 = vunpack.i.h.bf16 %v4014_v6  ;;  %v4015_v13 = vunpack.i.l.bf16 %v4014_v6  ;;  %v841_v15 = vpack.c.bf16 %v720_v11, %v659_v12  ;;  %v719_v16 = vsel %vm364_vm1, %v4772_v61, %v4020_v2  ;;  %v1395_v12 = vld [vmem:[#allocation4 + $0x200] sm:$0xff] }
 0x15e   : > { %870 = vmatprep.subr.bf16.mxu0 %v837_v7  ;;  %912 = vmatpush1.bf16.msra.mxu1 %v838_v8  ;;  %v4031_v17 = vunpack.i.h.bf16 %v4029_v14  ;;  %v4030_v18 = vunpack.i.l.bf16 %v4029_v14  ;;  %v840_v21 = vpack.c.bf16 %v719_v16, %v658_v9  ;;  %v1457_v7 = vld [vmem:[#allocation4 + $0x228] sm:$0xff]  ;;  %v1336_v8 = vld [vmem:[#allocation4 + $0x1f0] sm:$0xff]  ;;  %v1456_v16 = vld [vmem:[#allocation4 + $0x220] sm:$0xff] }
 0x15f   : > { %871 = vmatpush1.bf16.msra.mxu0 %v836_v10  ;;  %v661_v22 = vsel %vm427_vm2, %v4015_v13, %v4016_v4  ;;  %v660_v25 = vsel %vm427_vm2, %v4011_v45, %v4015_v13  ;;  %v1459_v10 = vld [vmem:[#allocation4 + $0x238] sm:$0xff]  ;;  %v1397_v13 = vld [vmem:[#allocation4 + $0x210] sm:$0xff]  ;;  %vm1239_vm2 = vcmask 15360  }
 0x160   : > { %v4024_v55 = vpop.permute.xlu0 %4023  ;;  %872 = vmatprep.subr.bf16.mxu0 %v841_v15  ;;  %v780_v26 = vsel %vm301_vm0, %v4030_v18, %v4031_v17  ;;  %v779_v51 = vpop.permute.xlu1 %778 }
 0x161   : > { %v4026_v19 = vunpack.i.h.bf16 %v4024_v55  ;;  %v4025_v20 = vunpack.i.l.bf16 %v4024_v55  ;;  %v844_v32 = vpack.c.bf16 %v780_v26, %v780_v26 }
 0x163   : > { %873 = vmatpush1.bf16.msra.mxu0 %v840_v21  ;;  %v722_v24 = vsel %vm364_vm1, %v4025_v20, %v4026_v19  ;;  %v721_v61 = vsel %vm364_vm1, %v4021_v1, %v4025_v20  ;;  %v855_v39 = vsel %vm853_vm8, %v844_v32, 0  ;;  %v1335_v1 = vld [vmem:[#allocation4 + $0x1e8] sm:$0xff]  ;;  %vm1210_vm1 = vcmask 1031168  }
 0x164   : > { %v4034_v27 = vpop.permute.xlu0 %4033  ;;  %v843_v28 = vpack.c.bf16 %v722_v24, %v661_v22  ;;  %v842_v29 = vpack.c.bf16 %v721_v61, %v660_v25  ;;  %v1014_v18 = vpop.permute.xlu1 %1013 }
 0x165   : > { %v4036_v30 = vunpack.i.h.bf16 %v4034_v27  ;;  %v4035_v31 = vunpack.i.l.bf16 %v4034_v27  ;;  %v1030_v55 = vmul.f32 0.0, %v1014_v18 }
 0x166   : > { %913 = vmatprep.subr.bf16.mxu1 %v843_v28 }
 0x167   : > { %914 = vmatpush1.bf16.msra.mxu1 %v842_v29  ;;  %v781_v33 = vsel %vm301_vm0, %v4031_v17, %v4035_v31  ;;  %v783_v34 = vsel %vm301_vm0, %v4036_v30, %v779_v51  ;;  %v782_v35 = vsel %vm301_vm0, %v4035_v31, %v4036_v30  ;;  %v1458_v17 = vld [vmem:[#allocation4 + $0x230] sm:$0xff]  ;;  %vm1147_vm0 = vcmask 801792  }
 0x168   : > { %v845_v36 = vpack.c.bf16 %v781_v33, %v781_v33  ;;  %v847_v37 = vpack.c.bf16 %v783_v34, %v783_v34  ;;  %v846_v38 = vpack.c.bf16 %v782_v35, %v782_v35  ;;  %v4846_v0 = vpop.permute.xlu0 %1015  ;;  %v1018_v19 = vpop.permute.xlu1 %1017 }
 0x16a   : > { %3893 = vmatprep.subr.msk.bf16.mxu0 %vm853_vm8, %v845_v36  ;;  %3895 = vmatprep.subr.msk.bf16.mxu1 %vm853_vm8, %v847_v37  ;;  %v861_v40 = vsel %vm853_vm8, %v846_v38, 0 }
 0x16b   : > { %875 = vmatpush1.bf16.msra.mxu0 %v855_v39  ;;  %916 = vmatpush1.bf16.msra.mxu1 %v861_v40 }
 0x16c   : > { %v4848_v2 = vpop.permute.xlu0 %1076  ;;  %v4877_v20 = vpop.permute.xlu1 %1019 }
 0x16d   : > { %v1093_v4 = vmul.f32 0.0, %v4848_v2 }
 0x16e   : > { %3894 = vmatmul.mubr.msk.bf16.vlgmr.msra.gmra.mrb[0].mxu0 %vm849_vm9, %v848_v41  ;;  %3896 = vmatmul.mubr.msk.bf16.vlgmr.msra.gmra.mrb[0].mxu1 %vm849_vm9, %v848_v41 }
 0x16f   : > { %1616 = vmatprep.mubr.bf16.mxu0 %v4476_v23  ;;  %1657 = vmatprep.mubr.bf16.mxu1 %v4476_v23 }
 0x170   : > { %v4852_v50 = vpop.permute.xlu0 %1080  ;;  %v1079_v21 = vpop.permute.xlu1 %1078 }
 0x174   : > { %v4855_v6 = vpop.permute.xlu0 %1139  ;;  %v4879_v22 = vpop.permute.xlu1 %1082 }
 0x175   : > { %v1156_v9 = vmul.f32 0.0, %v4855_v6 }
 0x178   : > { %v4861_v11 = vpop.permute.xlu0 %1143  ;;  %v4881_v24 = vpop.permute.xlu1 %1141 }
 0x17c   : > { %v4866_v14 = vpop.permute.xlu0 %1202  ;;  %v4883_v25 = vpop.permute.xlu1 %1145 }
 0x17d   : > { %v1219_v15 = vmul.f32 0.0, %v4866_v14 }
 0x180   : > { %v4885_v61 = vpop.permute.xlu1 %1204  ;;  %v4887_v26 = vpop.permute.xlu0 %1206 }
 0x184   : > { %v4889_v27 = vpop.permute.xlu1 %1208  ;;  %v4891_v28 = vpop.permute.xlu0 %1281 }
 0x188   : > { %v4893_v29 = vpop.permute.xlu1 %1283  ;;  %v4895_v30 = vpop.permute.xlu0 %1285 }
 0x18c   : > { %v4897_v31 = vpop.permute.xlu1 %1287 }
 0x241   : > { %v4826_v42 = vpop.f32.mrb[0].mxu0  ;;  %v4828_v43 = vpop.f32.mrb[0].mxu1 }
 0x242   : > { %v4830_v44 = vpop.f32.mrb[1].mxu0  ;;  %v4832_v45 = vpop.f32.mrb[1].mxu1  ;;  %v952_v46 = vmul.f32 %v4826_v42, %v4826_v42  ;;  %v978_v56 = vmul.f32 %v4828_v43, %v4828_v43 }
 0x243   : > { %v904_v47 = vpop.f32.mrb[2].mxu0  ;;  %v974_v48 = vadd.f32 %v4832_v45, %v4828_v43  ;;  %v948_v60 = vadd.f32 %v4830_v44, %v4826_v42  ;;  %v945_v5 = vpop.f32.mrb[2].mxu1  ;;  %v953_v59 = vmul.f32 %v4830_v44, %v4830_v44  ;;  %v979_v58 = vmul.f32 %v4832_v45, %v4832_v45 }
 0x244   : > { %v905_v62 = vpop.f32.mrb[3].mxu0  ;;  %v946_v57 = vpop.f32.mrb[3].mxu1 }
 0x245   : > { %975 = vadd.xlane.f32.xlu1 %v974_v48  ;;  %949 = vadd.xlane.f32.xlu0 %v948_v60  ;;  %v954_v52 = vadd.f32 %v953_v59, %v952_v46  ;;  %v980_v63 = vadd.f32 %v979_v58, %v978_v56 }
 0x249   : > { %955 = vadd.xlane.f32.xlu0 %v954_v52 }
 0x24d   : > { %981 = vadd.xlane.f32.xlu0 %v980_v63 }
 0x256   : > { %1344 = vrot.lane.b32.xlu1 %v1335_v1, %s4482_s12 }
 0x25a   : > { %1348 = vrot.lane.b32.xlu1 %v1337_v53, %s4482_s12 }
 0x25e   : > { %1405 = vrot.lane.b32.xlu1 %v1396_v54, %s4483_s13 }
 0x262   : > { %1409 = vrot.lane.b32.xlu1 %v1398_v3, %s4483_s13 }
 0x263   : > { %1342 = vrot.lane.b32.xlu0 %v1334_v49, %s4482_s12  ;;  %v1023_v49 = vsel %vm1021_vm10, %v4846_v0, %v1018_v19 }
 0x266   : > { %1466 = vrot.lane.b32.xlu1 %v1457_v7, %s4484_s14 }
 0x267   : > { %1346 = vrot.lane.b32.xlu0 %v1336_v8, %s4482_s12 }
 0x26a   : > { %1470 = vrot.lane.b32.xlu1 %v1459_v10, %s4484_s14 }
 0x26b   : > { %1403 = vrot.lane.b32.xlu0 %v1395_v12, %s4483_s13  ;;  %v1024_v12 = vsel %vm1021_vm10, %v1018_v19, %v4877_v20 }
 0x26e   : > { %1103 = vrot.lane.b32.xlu1 %v1093_v4, %s4483_s13  ;;  %v1085_v4 = vsel %vm1084_vm13, %v4848_v2, %v1079_v21  ;;  %v1148_v2 = vsel %vm1147_vm0, %v4855_v6, %v4881_v24 }
 0x26f   : > { %1407 = vrot.lane.b32.xlu0 %v1397_v13, %s4483_s13 }
 0x272   : > { %1229 = vrot.lane.b32.xlu1 %v1219_v15, %s4481_s9  ;;  %v1086_v15 = vsel %vm1084_vm13, %v1079_v21, %v4852_v50 }
 0x273   : > { %1464 = vrot.lane.b32.xlu0 %v1456_v16, %s4484_s14 }
 0x277   : > { %1468 = vrot.lane.b32.xlu0 %v1458_v17, %s4484_s14 }
 0x27b   : > { %1040 = vrot.lane.b32.xlu0 %v1030_v55, %s4484_s14 }
 0x27f   : > { %1166 = vrot.lane.b32.xlu0 %v1156_v9, %s4482_s12 }
 0x2d2   : > { %v950_v51 = vpop.xlane.xlu0 %949  ;;  %v976_v33 = vpop.xlane.xlu1 %975 }
 0x2d3   : > { %v951_v32 = vmul.f32 0.00390625, %v950_v51  ;;  %v977_v35 = vmul.f32 0.00390625, %v976_v33  ;;  %v1087_v51 = vsel %vm1084_vm13, %v4852_v50, %v4879_v22  ;;  %v1211_v50 = vsel %vm1210_vm1, %v4866_v14, %v4885_v61 }
 0x2d5   : > { %v958_v36 = vmul.f32 %v951_v32, %v951_v32  ;;  %v984_v39 = vmul.f32 %v977_v35, %v977_v35  ;;  %v960_v48 = vsub.f32 %v4826_v42, %v951_v32  ;;  %v961_v60 = vsub.f32 %v4830_v44, %v951_v32 }
 0x2d6   : > { %v956_v34 = vpop.xlane.xlu0 %955  ;;  %v986_v62 = vsub.f32 %v4828_v43, %v977_v35  ;;  %v987_v57 = vsub.f32 %v4832_v45, %v977_v35  ;;  %v1022_v44 = vsel %vm1021_vm10, %v1014_v18, %v4846_v0  ;;  %v4919_v13 = vpop.permute.xlu1 %1344  ;;  %v1149_v32 = vsel %vm1147_vm0, %v4881_v24, %v4861_v11 }
 0x2d7   : > { %v957_v37 = vmul.f32 0.00390625, %v956_v34  ;;  %v1212_v24 = vsel %vm1210_vm1, %v4885_v61, %v4887_v26 }
 0x2d9   : > { %v959_v38 = vsub.f32 %v957_v37, %v958_v36 }
 0x2da   : > { %v982_v40 = vpop.xlane.xlu0 %981  ;;  %v1349_v35 = vpop.permute.xlu1 %1348 }
 0x2db   : > { %v962_v41 = vadd.f32 1e-05, %v959_v38  ;;  %v983_v46 = vmul.f32 0.00390625, %v982_v40  ;;  %v1150_v38 = vsel %vm1147_vm0, %v4861_v11, %v4883_v25  ;;  %v1213_v11 = vsel %vm1210_vm1, %v4887_v26, %v4889_v27 }
 0x2dd   : > { %4401 = vrsqrt.f32 %v962_v41  ;;  %v985_v56 = vsub.f32 %v983_v46, %v984_v39 }
 0x2de   : > { %v4911_v7 = vpop.permute.xlu0 %1342 }
 0x2df   : > { %v988_v47 = vadd.f32 1e-05, %v985_v56  ;;  %v1406_v56 = vpop.permute.xlu1 %1405 }
 0x2e1   : > { %4403 = vrsqrt.f32 %v988_v47  ;;  %v1290_v47 = vsel %vm1239_vm2, %v4893_v29, %v4895_v30 }
 0x2e2   : > { %v1347_v19 = vpop.permute.xlu0 %1346 }
 0x2e6   : > { %v4960_v40 = vpop.permute.xlu0 %1403 }
 0x2e7   : > { %v4402_v5 = vpop.eup %4401 }
 0x2e8   : > { %v964_v59 = vmul.f32 %v4402_v5, %v960_v48  ;;  %v965_v58 = vmul.f32 %v4402_v5, %v961_v60 }
 0x2ea   : > { %vm966_vm11 = vcmp.ge.f32.partialorder %v964_v59, 0.0  ;;  %vm967_vm12 = vcmp.ge.f32.partialorder %v965_v58, 0.0  ;;  %v968_v52 = vmul.f32 0.1, %v964_v59  ;;  %v969_v63 = vmul.f32 0.1, %v965_v58 }
 0x2eb   : > { %v4404_v1 = vpop.eup %4403 }
 0x2ec   : > { %v4903_v53 = vsel %vm966_vm11, %v964_v59, %v968_v52  ;;  %v4905_v54 = vsel %vm967_vm12, %v965_v58, %v969_v63  ;;  %v990_v42 = vmul.f32 %v4404_v1, %v986_v62  ;;  %v991_v3 = vmul.f32 %v4404_v1, %v987_v57  ;;  %v1408_v62 = vpop.permute.xlu0 %1407  ;;  %v1410_v52 = vpop.permute.xlu1 %1409 }
 0x2ed   : > { %v1031_v8 = vmul.f32 %v1022_v44, %v4903_v53  ;;  %v1032_v10 = vmul.f32 %v1023_v49, %v4905_v54  ;;  %v1094_v17 = vmul.f32 %v1085_v4, %v4903_v53  ;;  %v1095_v55 = vmul.f32 %v1086_v15, %v4905_v54 }
 0x2ee   : > { %vm992_vm14 = vcmp.ge.f32.partialorder %v990_v42, 0.0  ;;  %vm993_vm15 = vcmp.ge.f32.partialorder %v991_v3, 0.0  ;;  %v994_v43 = vmul.f32 0.1, %v990_v42  ;;  %v995_v45 = vmul.f32 0.1, %v991_v3 }
 0x2ef   : > { %v4037_v18 = vpack.i.bf16 %v1032_v10, %v1031_v8  ;;  %v4047_v33 = vpack.i.bf16 %v1095_v55, %v1094_v17  ;;  %v1157_v34 = vmul.f32 %v1148_v2, %v4903_v53  ;;  %v1158_v36 = vmul.f32 %v1149_v32, %v4905_v54 }
 0x2f0   : > { %v4921_v0 = vsel %vm992_vm14, %v990_v42, %v994_v43  ;;  %v4925_v16 = vsel %vm993_vm15, %v991_v3, %v995_v45  ;;  %v1220_v39 = vmul.f32 %v1211_v50, %v4903_v53  ;;  %v1289_v58 = vsel %vm1239_vm2, %v4891_v28, %v4893_v29  ;;  %v1465_v45 = vpop.permute.xlu0 %1464  ;;  %v1467_v15 = vpop.permute.xlu1 %1466 }
 0x2f1   : > { %v1033_v9 = vmul.f32 %v1024_v12, %v4921_v0  ;;  %4038 = vrot.lane.b32.xlu0 %v4037_v18, %s4484_s14  ;;  %v1034_v21 = vmul.f32 %v4877_v20, %v4925_v16  ;;  %v1096_v37 = vmul.f32 %v1087_v51, %v4921_v0  ;;  %v1097_v20 = vmul.f32 %v4879_v22, %v4925_v16 }
 0x2f2   : > { %v1221_v22 = vmul.f32 %v1212_v24, %v4905_v54  ;;  %v4057_v14 = vpack.i.bf16 %v1158_v36, %v1157_v34  ;;  %v1159_v46 = vmul.f32 %v1150_v38, %v4921_v0  ;;  %v1160_v61 = vmul.f32 %v4883_v25, %v4925_v16 }
 0x2f3   : > { %v4042_v6 = vpack.i.bf16 %v1034_v21, %v1033_v9  ;;  %v4052_v41 = vpack.i.bf16 %v1097_v20, %v1096_v37  ;;  %v1299_v5 = vmul.f32 %v1290_v47, %v4921_v0  ;;  %v1222_v59 = vmul.f32 %v1213_v11, %v4921_v0  ;;  %v1785_v11 = vld [vmem:[#allocation4 + $0x268] sm:$0xff]  ;;  %v1847_v47 = vld [vmem:[#allocation4 + $0x290] sm:$0xff] }
 0x2f4   : > { %v4067_v48 = vpack.i.bf16 %v1221_v22, %v1220_v39  ;;  %v4062_v60 = vpack.i.bf16 %v1160_v61, %v1159_v46  ;;  %v1223_v25 = vmul.f32 %v4889_v27, %v4925_v16  ;;  %v1298_v26 = vmul.f32 %v1289_v58, %v4905_v54  ;;  %v1471_v32 = vpop.permute.xlu1 %1470  ;;  %v1786_v46 = vld [vmem:[#allocation4 + $0x270] sm:$0xff]  ;;  %v1726_v61 = vld [vmem:[#allocation4 + $0x258] sm:$0xff]  ;;  %v1983_v58 = vld [vmem:[#allocation4 + $0x2e0] sm:$0xff] }
 0x2f5   : > { %4048 = vrot.lane.b32.xlu0 %v4047_v33, %s4483_s13  ;;  %4043 = vrot.lane.b32.xlu1 %v4042_v6, %s4484_s14  ;;  %v1291_v57 = vsel %vm1239_vm2, %v4895_v30, %v4897_v31  ;;  %v1352_v42 = vsel %vm1176_vm3, %v1347_v19, %v1349_v35  ;;  %v1351_v29 = vsel %vm1176_vm3, %v4919_v13, %v1347_v19  ;;  %v1301_v3 = vmul.f32 0.0, %v4897_v31  ;;  %v1469_v19 = vpop.permute.xlu0 %1468 }
 0x2f6   : > { %v4077_v63 = vpack.i.bf16 %v1299_v5, %v1298_v26  ;;  %v4072_v1 = vpack.i.bf16 %v1223_v25, %v1222_v59  ;;  %v1300_v27 = vmul.f32 %v1291_v57, %v4925_v16  ;;  %v1362_v44 = vmul.f32 0.0, %v1349_v35  ;;  %v1846_v5 = vld [vmem:[#allocation4 + $0x288] sm:$0xff]  ;;  %v1908_v59 = vld [vmem:[#allocation4 + $0x2b0] sm:$0xff]  ;;  %v1848_v25 = vld [vmem:[#allocation4 + $0x298] sm:$0xff] }
 0x2f7   : > { %v1350_v30 = vsel %vm1176_vm3, %v4911_v7, %v4919_v13  ;;  %v1361_v49 = vmul.f32 %v1352_v42, %v4925_v16  ;;  %v1360_v43 = vmul.f32 %v1351_v29, %v4921_v0  ;;  %v1297_v8 = vmul.f32 %v4891_v28, %v4903_v53  ;;  %v1909_v26 = vld [vmem:[#allocation4 + $0x2b8] sm:$0xff]  ;;  %v1984_v57 = vld [vmem:[#allocation4 + $0x2e8] sm:$0xff] }
 0x2f8   : > { %v4082_v10 = vpack.i.bf16 %v1301_v3, %v1300_v27  ;;  %v1413_v31 = vsel %vm1113_vm4, %v1408_v62, %v1410_v52  ;;  %v1412_v12 = vsel %vm1113_vm4, %v1406_v56, %v1408_v62  ;;  %v1359_v4 = vmul.f32 %v1350_v30, %v4905_v54  ;;  %v1907_v62 = vld [vmem:[#allocation4 + $0x2a8] sm:$0xff] }
 0x2f9   : > { %4058 = vrot.lane.b32.xlu0 %v4057_v14, %s4482_s12  ;;  %4053 = vrot.lane.b32.xlu1 %v4052_v41, %s4483_s13  ;;  %v1423_v13 = vmul.f32 0.0, %v1410_v52  ;;  %v1411_v17 = vsel %vm1113_vm4, %v4960_v40, %v1406_v56  ;;  %v4092_v18 = vpack.i.bf16 %v1362_v44, %v1361_v49  ;;  %v1422_v28 = vmul.f32 %v1413_v31, %v4925_v16  ;;  %v1784_v14 = vld [vmem:[#allocation4 + $0x260] sm:$0xff]  ;;  %v1725_v41 = vld [vmem:[#allocation4 + $0x250] sm:$0xff]  ;;  %v1041_v52 = vpop.permute.xlu0 %1040 }
 0x2fa   : > { %v4087_v55 = vpack.i.bf16 %v1360_v43, %v1359_v4  ;;  %v1421_v9 = vmul.f32 %v1412_v12, %v4921_v0  ;;  %v1420_v2 = vmul.f32 %v1411_v17, %v4905_v54  ;;  %v1472_v33 = vsel %vm1050_vm5, %v1465_v45, %v1467_v15  ;;  %v1845_v56 = vld [vmem:[#allocation4 + $0x280] sm:$0xff] }
 0x2fb   : > { %v4102_v21 = vpack.i.bf16 %v1423_v13, %v1422_v28  ;;  %v1473_v34 = vsel %vm1050_vm5, %v1467_v15, %v1469_v19  ;;  %v1474_v35 = vsel %vm1050_vm5, %v1469_v19, %v1471_v32  ;;  %v1358_v6 = vmul.f32 %v4911_v7, %v4903_v53  ;;  %v1724_v7 = vld [vmem:[#allocation4 + $0x248] sm:$0xff] }
 0x2fc   : > { %v4097_v51 = vpack.i.bf16 %v1421_v9, %v1420_v2  ;;  %v1419_v36 = vmul.f32 %v4960_v40, %v4903_v53  ;;  %v1480_v37 = vmul.f32 %v1465_v45, %v4903_v53  ;;  %v1481_v20 = vmul.f32 %v1472_v33, %v4905_v54  ;;  %v1723_v40 = vld [vmem:[#allocation4 + $0x240] sm:$0xff] }
 0x2fd   : > { %4068 = vrot.lane.b32.xlu0 %v4067_v48, %s4481_s9  ;;  %4063 = vrot.lane.b32.xlu1 %v4062_v60, %s4482_s12  ;;  %v1482_v50 = vmul.f32 %v1473_v34, %v4921_v0  ;;  %v1483_v24 = vmul.f32 %v1474_v35, %v4925_v16  ;;  %v1484_v22 = vmul.f32 0.0, %v1471_v32  ;;  %v1787_v48 = vld [vmem:[#allocation4 + $0x278] sm:$0xff]  ;;  %v1906_v60 = vld [vmem:[#allocation4 + $0x2a0] sm:$0xff]  ;;  %vm2656_vm14 = vcmask 523264  }
 0x2fe   : > { %v4107_v38 = vpack.i.bf16 %v1481_v20, %v1480_v37  ;;  %vm2589_vm15 = vcmask 556032  }
 0x2ff   : > { %v4112_v39 = vpack.i.bf16 %v1483_v24, %v1482_v50 }
 0x301   : > { %4078 = vrot.lane.b32.xlu0 %v4077_v63, %s4480_s8  ;;  %4073 = vrot.lane.b32.xlu1 %v4072_v1, %s4481_s9  ;;  %v1104_v63 = vpop.permute.xlu1 %1103  ;;  %v1167_v1 = vpop.permute.xlu0 %1166 }
 0x305   : > { %1307 = vrot.lane.b32.xlu0 %v1297_v8, %s4480_s8  ;;  %4083 = vrot.lane.b32.xlu1 %v4082_v10, %s4480_s8  ;;  %v1230_v27 = vpop.permute.xlu1 %1229 }
 0x309   : > { %4093 = vrot.lane.b32.xlu0 %v4092_v18, %s4479_s7  ;;  %4088 = vrot.lane.b32.xlu1 %v4087_v55, %s4479_s7 }
 0x30d   : > { %4103 = vrot.lane.b32.xlu0 %v4102_v21, %s4478_s30  ;;  %4098 = vrot.lane.b32.xlu1 %v4097_v51, %s4478_s30 }
 0x311   : > { %1429 = vrot.lane.b32.xlu0 %v1419_v36, %s4478_s30  ;;  %1368 = vrot.lane.b32.xlu1 %v1358_v6, %s4479_s7 }
 0x315   : > { %4108 = vrot.lane.b32.xlu1 %v4107_v38, %s4477_s29  ;;  %4113 = vrot.lane.b32.xlu0 %v4112_v39, %s4477_s29 }
 0x319   : > { %1498 = vrot.lane.b32.xlu1 %v1484_v22, %s4477_s29  ;;  %1733 = vrot.lane.b32.xlu0 %v1724_v7, %s4477_s29  ;;  %v1257_v22 = vld [vmem:[#allocation4 + $0x1a8] sm:$0xff] }
 0x31d   : > { %1731 = vrot.lane.b32.xlu1 %v1723_v40, %s4477_s29  ;;  %1792 = vrot.lane.b32.xlu0 %v1784_v14, %s4478_s30 }
 0x321   : > { %1735 = vrot.lane.b32.xlu1 %v1725_v41, %s4477_s29  ;;  %1796 = vrot.lane.b32.xlu0 %v1786_v46, %s4478_s30 }
 0x325   : > { %1737 = vrot.lane.b32.xlu1 %v1726_v61, %s4477_s29  ;;  %1853 = vrot.lane.b32.xlu0 %v1845_v56, %s4479_s7 }
 0x329   : > { %1794 = vrot.lane.b32.xlu1 %v1785_v11, %s4478_s30  ;;  %1857 = vrot.lane.b32.xlu0 %v1847_v47, %s4479_s7 }
 0x32d   : > { %1798 = vrot.lane.b32.xlu1 %v1787_v48, %s4478_s30  ;;  %1914 = vrot.lane.b32.xlu0 %v1906_v60, %s4480_s8  ;;  %v1256_v48 = vld [vmem:[#allocation4 + $0x1a0] sm:$0xff] }
 0x331   : > { %1855 = vrot.lane.b32.xlu1 %v1846_v5, %s4479_s7  ;;  %1918 = vrot.lane.b32.xlu0 %v1908_v59, %s4480_s8  ;;  %v1261_v5 = vmul.f32 %v1257_v22, %v4905_v54 }
 0x335   : > { %1859 = vrot.lane.b32.xlu1 %v1848_v25, %s4479_s7  ;;  %1991 = vrot.lane.b32.xlu0 %v1983_v58, %s4481_s9 }
 0x339   : > { %1916 = vrot.lane.b32.xlu1 %v1907_v62, %s4480_s8 }
 0x33d   : > { %1920 = vrot.lane.b32.xlu1 %v1909_v26, %s4480_s8  ;;  %v1259_v26 = vld [vmem:[#allocation4 + $0x1b8] sm:$0xff] }
 0x341   : > { %1993 = vrot.lane.b32.xlu1 %v1984_v57, %s4481_s9  ;;  %v1258_v57 = vld [vmem:[#allocation4 + $0x1b0] sm:$0xff] }
 0x363   : > { %v4039_v42 = vpop.permute.xlu0 %4038 }
 0x364   : > { %v4040_v29 = vunpack.i.l.bf16 %v4039_v42  ;;  %v4041_v3 = vunpack.i.h.bf16 %v4039_v42 }
 0x366   : > { %v1051_v45 = vsel %vm1050_vm5, %v1041_v52, %v4040_v29  ;;  %v1052_v12 = vsel %vm1050_vm5, %v4040_v29, %v4041_v3 }
 0x367   : > { %v4044_v44 = vpop.permute.xlu1 %4043  ;;  %v4049_v30 = vpop.permute.xlu0 %4048 }
 0x368   : > { %v4051_v49 = vunpack.i.h.bf16 %v4049_v30  ;;  %v4050_v43 = vunpack.i.l.bf16 %v4049_v30  ;;  %v4045_v8 = vunpack.i.l.bf16 %v4044_v44  ;;  %v4046_v10 = vunpack.i.h.bf16 %v4044_v44 }
 0x36a   : > { %v1114_v31 = vsel %vm1113_vm4, %v1104_v63, %v4050_v43  ;;  %v1115_v4 = vsel %vm1113_vm4, %v4050_v43, %v4051_v49  ;;  %v1053_v9 = vsel %vm1050_vm5, %v4041_v3, %v4045_v8  ;;  %v1054_v51 = vsel %vm1050_vm5, %v4045_v8, %v4046_v10 }
 0x36b   : > { %v4054_v15 = vpop.permute.xlu1 %4053  ;;  %v4059_v13 = vpop.permute.xlu0 %4058  ;;  %v1549_v17 = vpack.c.bf16 %v1115_v4, %v1052_v12  ;;  %v1548_v18 = vpack.c.bf16 %v1114_v31, %v1051_v45  ;;  %v1260_v63 = vmul.f32 %v1256_v48, %v4903_v53  ;;  %v1263_v43 = vmul.f32 %v1259_v26, %v4925_v16 }
 0x36c   : > { %v4056_v55 = vunpack.i.h.bf16 %v4054_v15  ;;  %v4055_v28 = vunpack.i.l.bf16 %v4054_v15  ;;  %v4060_v2 = vunpack.i.l.bf16 %v4059_v13  ;;  %v4061_v21 = vunpack.i.h.bf16 %v4059_v13 }
 0x36d   : > { %1584 = vmatprep.subr.bf16.mxu0 %v1549_v17  ;;  %v1262_v45 = vmul.f32 %v1258_v57, %v4921_v0  ;;  %v1568_v57 = vld [vmem:[%s6251_s3] sm:$0xf] }
 0x36e   : > { %v1116_v19 = vsel %vm1113_vm4, %v4051_v49, %v4055_v28  ;;  %1585 = vmatpush1.bf16.msra.mxu0 %v1548_v18  ;;  %v1117_v32 = vsel %vm1113_vm4, %v4055_v28, %v4056_v55  ;;  %v1177_v20 = vsel %vm1176_vm3, %v1167_v1, %v4060_v2  ;;  %v1178_v39 = vsel %vm1176_vm3, %v4060_v2, %v4061_v21 }
 0x36f   : > { %v4064_v33 = vpop.permute.xlu1 %4063  ;;  %v4069_v34 = vpop.permute.xlu0 %4068  ;;  %v1551_v35 = vpack.c.bf16 %v1117_v32, %v1054_v51  ;;  %v1550_v6 = vpack.c.bf16 %v1116_v19, %v1053_v9 }
 0x370   : > { %v4071_v36 = vunpack.i.h.bf16 %v4069_v34  ;;  %v4070_v37 = vunpack.i.l.bf16 %v4069_v34  ;;  %v4065_v50 = vunpack.i.l.bf16 %v4064_v33  ;;  %v4066_v24 = vunpack.i.h.bf16 %v4064_v33 }
 0x371   : > { %1625 = vmatprep.subr.bf16.mxu1 %v1551_v35 }
 0x372   : > { %v1240_v38 = vsel %vm1239_vm2, %v1230_v27, %v4070_v37  ;;  %1626 = vmatpush1.bf16.msra.mxu1 %v1550_v6  ;;  %v1241_v7 = vsel %vm1239_vm2, %v4070_v37, %v4071_v36  ;;  %v1179_v60 = vsel %vm1176_vm3, %v4061_v21, %v4065_v50  ;;  %v1180_v58 = vsel %vm1176_vm3, %v4065_v50, %v4066_v24 }
 0x373   : > { %v4074_v40 = vpop.permute.xlu1 %4073  ;;  %v4079_v14 = vpop.permute.xlu0 %4078  ;;  %v1553_v41 = vpack.c.bf16 %v1241_v7, %v1178_v39  ;;  %v1552_v46 = vpack.c.bf16 %v1240_v38, %v1177_v20 }
 0x374   : > { %v4076_v61 = vunpack.i.h.bf16 %v4074_v40  ;;  %v4075_v56 = vunpack.i.l.bf16 %v4074_v40  ;;  %v4081_v11 = vunpack.i.h.bf16 %v4079_v14  ;;  %v4080_v47 = vunpack.i.l.bf16 %v4079_v14 }
 0x375   : > { %1586 = vmatprep.subr.bf16.mxu0 %v1553_v41 }
 0x376   : > { %v1242_v59 = vsel %vm1239_vm2, %v4071_v36, %v4075_v56  ;;  %1587 = vmatpush1.bf16.msra.mxu0 %v1552_v46  ;;  %v1318_v25 = vsel %vm1210_vm1, %v4080_v47, %v4081_v11  ;;  %v1243_v62 = vsel %vm1239_vm2, %v4075_v56, %v4076_v61 }
 0x377   : > { %v4084_v52 = vpop.permute.xlu1 %4083  ;;  %v1308_v1 = vpop.permute.xlu0 %1307  ;;  %v1557_v27 = vpack.c.bf16 %v1318_v25, %v1261_v5  ;;  %v1555_v42 = vpack.c.bf16 %v1243_v62, %v1180_v58  ;;  %v1554_v29 = vpack.c.bf16 %v1242_v59, %v1179_v60 }
 0x378   : > { %v4086_v3 = vunpack.i.h.bf16 %v4084_v52  ;;  %v4085_v44 = vunpack.i.l.bf16 %v4084_v52  ;;  %v1317_v30 = vsel %vm1210_vm1, %v1308_v1, %v4080_v47 }
 0x379   : > { %v1556_v49 = vpack.c.bf16 %v1317_v30, %v1260_v63  ;;  %1588 = vmatprep.subr.bf16.mxu0 %v1557_v27  ;;  %1627 = vmatprep.subr.bf16.mxu1 %v1555_v42 }
 0x37a   : > { %v1319_v8 = vsel %vm1210_vm1, %v4081_v11, %v4085_v44  ;;  %1628 = vmatpush1.bf16.msra.mxu1 %v1554_v29  ;;  %v1320_v10 = vsel %vm1210_vm1, %v4085_v44, %v4086_v3 }
 0x37b   : > { %v4089_v31 = vpop.permute.xlu1 %4088  ;;  %v4094_v12 = vpop.permute.xlu0 %4093  ;;  %1589 = vmatpush1.bf16.msra.mxu0 %v1556_v49  ;;  %v1559_v4 = vpack.c.bf16 %v1320_v10, %v1263_v43  ;;  %v1558_v15 = vpack.c.bf16 %v1319_v8, %v1262_v45 }
 0x37c   : > { %v4091_v13 = vunpack.i.h.bf16 %v4089_v31  ;;  %v4090_v17 = vunpack.i.l.bf16 %v4089_v31  ;;  %v4095_v18 = vunpack.i.l.bf16 %v4094_v12  ;;  %v4096_v55 = vunpack.i.h.bf16 %v4094_v12 }
 0x37d   : > { %1629 = vmatprep.subr.bf16.mxu1 %v1559_v4  ;;  %v1986_v4 = vld [vmem:[#allocation4 + $0x2f8] sm:$0xff] }
 0x37e   : > { %1630 = vmatpush1.bf16.msra.mxu1 %v1558_v15  ;;  %v1380_v32 = vsel %vm1147_vm0, %v4091_v13, %v4095_v18  ;;  %v1379_v33 = vsel %vm1147_vm0, %v4090_v17, %v4091_v13  ;;  %v1381_v6 = vsel %vm1147_vm0, %v4095_v18, %v4096_v55  ;;  %v2045_v13 = vld [vmem:[#allocation4 + $0x308] sm:$0xff]  ;;  %v2047_v18 = vld [vmem:[#allocation4 + $0x318] sm:$0xff]  ;;  %v1985_v55 = vld [vmem:[#allocation4 + $0x2f0] sm:$0xff] }
 0x37f   : > { %v4099_v28 = vpop.permute.xlu1 %4098  ;;  %v4104_v9 = vpop.permute.xlu0 %4103 }
 0x380   : > { %v4101_v2 = vunpack.i.h.bf16 %v4099_v28  ;;  %v4100_v19 = vunpack.i.l.bf16 %v4099_v28  ;;  %v4106_v21 = vunpack.i.h.bf16 %v4104_v9  ;;  %v4105_v51 = vunpack.i.l.bf16 %v4104_v9  ;;  %v2106_v28 = vld [vmem:[#allocation4 + $0x328] sm:$0xff] }
 0x382   : > { %v1441_v34 = vsel %vm1084_vm13, %v4101_v2, %v4105_v51  ;;  %v1440_v35 = vsel %vm1084_vm13, %v4100_v19, %v4101_v2  ;;  %v1442_v36 = vsel %vm1084_vm13, %v4105_v51, %v4106_v21  ;;  %v2044_v2 = vld [vmem:[#allocation4 + $0x300] sm:$0xff]  ;;  %v2046_v51 = vld [vmem:[#allocation4 + $0x310] sm:$0xff] }
 0x383   : > { %v1369_v37 = vpop.permute.xlu1 %1368  ;;  %v1430_v20 = vpop.permute.xlu0 %1429  ;;  %v1561_v50 = vpack.c.bf16 %v1440_v35, %v1379_v33  ;;  %v1563_v24 = vpack.c.bf16 %v1442_v36, %v1381_v6  ;;  %v1562_v38 = vpack.c.bf16 %v1441_v34, %v1380_v32  ;;  %v2167_v32 = vld [vmem:[#allocation4 + $0x348] sm:$0xff]  ;;  %v2105_v33 = vld [vmem:[#allocation4 + $0x320] sm:$0xff]  ;;  %v2169_v34 = vld [vmem:[#allocation4 + $0x358] sm:$0xff] }
 0x384   : > { %v1378_v39 = vsel %vm1147_vm0, %v1369_v37, %v4090_v17  ;;  %v1439_v7 = vsel %vm1084_vm13, %v1430_v20, %v4100_v19  ;;  %v2108_v19 = vld [vmem:[#allocation4 + $0x338] sm:$0xff]  ;;  %v2107_v6 = vld [vmem:[#allocation4 + $0x330] sm:$0xff]  ;;  %v2166_v20 = vld [vmem:[#allocation4 + $0x340] sm:$0xff] }
 0x385   : > { %v1560_v22 = vpack.c.bf16 %v1439_v7, %v1378_v39  ;;  %1590 = vmatprep.subr.bf16.mxu0 %v1561_v50  ;;  %1631 = vmatprep.subr.bf16.mxu1 %v1563_v24  ;;  %v2168_v24 = vld [vmem:[#allocation4 + $0x350] sm:$0xff] }
 0x386   : > { %1632 = vmatpush1.bf16.msra.mxu1 %v1562_v38 }
 0x387   : > { %v4109_v40 = vpop.permute.xlu1 %4108  ;;  %v4114_v14 = vpop.permute.xlu0 %4113  ;;  %1591 = vmatpush1.bf16.msra.mxu0 %v1560_v22 }
 0x388   : > { %v4111_v41 = vunpack.i.h.bf16 %v4109_v40  ;;  %v4110_v46 = vunpack.i.l.bf16 %v4109_v40  ;;  %v4116_v61 = vunpack.i.h.bf16 %v4114_v14  ;;  %v4115_v56 = vunpack.i.l.bf16 %v4114_v14 }
 0x38a   : > { %v1501_v11 = vsel %vm1021_vm10, %v4111_v41, %v4115_v56  ;;  %v1500_v47 = vsel %vm1021_vm10, %v4110_v46, %v4111_v41  ;;  %v1502_v48 = vsel %vm1021_vm10, %v4115_v56, %v4116_v61 }
 0x38b   : > { %v1499_v60 = vpop.permute.xlu1 %1498  ;;  %v1565_v5 = vpack.c.bf16 %v1501_v11, %v1501_v11  ;;  %v1564_v59 = vpack.c.bf16 %v1500_v47, %v1500_v47  ;;  %v1566_v25 = vpack.c.bf16 %v1502_v48, %v1502_v48  ;;  %v5115_v15 = vpop.permute.xlu0 %1733 }
 0x38c   : > { %v1503_v58 = vsel %vm1021_vm10, %v4116_v61, %v1499_v60 }
 0x38d   : > { %v1567_v62 = vpack.c.bf16 %v1503_v58, %v1503_v58  ;;  %3897 = vmatprep.subr.msk.bf16.mxu0 %vm853_vm8, %v1565_v5  ;;  %v1573_v26 = vsel %vm853_vm8, %v1564_v59, 0  ;;  %v1579_v52 = vsel %vm853_vm8, %v1566_v25, 0 }
 0x38e   : > { %1593 = vmatpush1.bf16.msra.mxu0 %v1573_v26 }
 0x38f   : > { %3899 = vmatprep.subr.msk.bf16.mxu1 %vm853_vm8, %v1567_v62  ;;  %v5118_v17 = vpop.permute.xlu0 %1792  ;;  %v1732_v38 = vpop.permute.xlu1 %1731 }
 0x390   : > { %1634 = vmatpush1.bf16.msra.mxu1 %v1579_v52  ;;  %v1808_v36 = vmul.f32 0.0, %v5118_v17  ;;  %v1747_v39 = vmul.f32 0.0, %v1732_v38 }
 0x391   : > { %3898 = vmatmul.mubr.msk.bf16.vlgmr.msra.gmra.mrb[4].mxu0 %vm849_vm9, %v1568_v57 }
 0x392   : > { %2332 = vmatprep.mubr.bf16.mxu0 %v4476_v23 }
 0x393   : > { %3900 = vmatmul.mubr.msk.bf16.vlgmr.msra.gmra.mrb[4].mxu1 %vm849_vm9, %v1568_v57  ;;  %v5122_v9 = vpop.permute.xlu0 %1796  ;;  %v1736_v22 = vpop.permute.xlu1 %1735 }
 0x394   : > { %2375 = vmatprep.mubr.bf16.mxu1 %v4476_v23 }
 0x397   : > { %v5127_v21 = vpop.permute.xlu0 %1853  ;;  %v5148_v40 = vpop.permute.xlu1 %1737 }
 0x398   : > { %v1869_v7 = vmul.f32 0.0, %v5127_v21 }
 0x39b   : > { %v5132_v35 = vpop.permute.xlu0 %1857  ;;  %v1795_v14 = vpop.permute.xlu1 %1794 }
 0x39f   : > { %v5138_v37 = vpop.permute.xlu0 %1914  ;;  %v5150_v41 = vpop.permute.xlu1 %1798 }
 0x3a0   : > { %v1930_v50 = vmul.f32 0.0, %v5138_v37 }
 0x3a3   : > { %v1856_v46 = vpop.permute.xlu1 %1855  ;;  %v5156_v11 = vpop.permute.xlu0 %1918 }
 0x3a7   : > { %v5152_v61 = vpop.permute.xlu1 %1859  ;;  %v5160_v48 = vpop.permute.xlu0 %1991 }
 0x3ab   : > { %v5154_v56 = vpop.permute.xlu1 %1916 }
 0x3af   : > { %v5158_v47 = vpop.permute.xlu1 %1920 }
 0x3b3   : > { %v1994_v60 = vpop.permute.xlu1 %1993 }
 0x464   : > { %v5095_v63 = vpop.f32.mrb[4].mxu0 }
 0x465   : > { %v1670_v1 = vmul.f32 %v5095_v63, %v5095_v63  ;;  %v5099_v27 = vpop.f32.mrb[5].mxu0 }
 0x466   : > { %v1666_v42 = vadd.f32 %v5099_v27, %v5095_v63  ;;  %v1671_v29 = vmul.f32 %v5099_v27, %v5099_v27  ;;  %v1622_v3 = vpop.f32.mrb[6].mxu0  ;;  %v5105_v44 = vpop.f32.mrb[4].mxu1 }
 0x467   : > { %v1696_v30 = vmul.f32 %v5105_v44, %v5105_v44  ;;  %v1623_v23 = vpop.f32.mrb[7].mxu0  ;;  %v5109_v49 = vpop.f32.mrb[5].mxu1 }
 0x468   : > { %v1692_v43 = vadd.f32 %v5109_v49, %v5105_v44  ;;  %v1697_v45 = vmul.f32 %v5109_v49, %v5109_v49  ;;  %1667 = vadd.xlane.f32.xlu0 %v1666_v42  ;;  %v1663_v8 = vpop.f32.mrb[6].mxu1  ;;  %v1672_v10 = vadd.f32 %v1671_v29, %v1670_v1 }
 0x469   : > { %v1664_v31 = vpop.f32.mrb[7].mxu1 }
 0x46a   : > { %1693 = vadd.xlane.f32.xlu1 %v1692_v43  ;;  %v1698_v12 = vadd.f32 %v1697_v45, %v1696_v30 }
 0x46c   : > { %1673 = vadd.xlane.f32.xlu0 %v1672_v10 }
 0x470   : > { %1699 = vadd.xlane.f32.xlu0 %v1698_v12 }
 0x47b   : > { %1997 = vrot.lane.b32.xlu1 %v1986_v4, %s4481_s9 }
 0x47f   : > { %2054 = vrot.lane.b32.xlu1 %v2045_v13, %s4482_s12 }
 0x483   : > { %2058 = vrot.lane.b32.xlu1 %v2047_v18, %s4482_s12 }
 0x486   : > { %1995 = vrot.lane.b32.xlu0 %v1985_v55, %s4481_s9 }
 0x487   : > { %2115 = vrot.lane.b32.xlu1 %v2106_v28, %s4483_s13 }
 0x48a   : > { %2052 = vrot.lane.b32.xlu0 %v2044_v2, %s4482_s12 }
 0x48b   : > { %2119 = vrot.lane.b32.xlu1 %v2108_v19, %s4483_s13 }
 0x48e   : > { %2056 = vrot.lane.b32.xlu0 %v2046_v51, %s4482_s12 }
 0x48f   : > { %2176 = vrot.lane.b32.xlu1 %v2167_v32, %s4484_s14 }
 0x492   : > { %2113 = vrot.lane.b32.xlu0 %v2105_v33, %s4483_s13 }
 0x493   : > { %2180 = vrot.lane.b32.xlu1 %v2169_v34, %s4484_s14 }
 0x496   : > { %2117 = vrot.lane.b32.xlu0 %v2107_v6, %s4483_s13 }
 0x497   : > { %1818 = vrot.lane.b32.xlu1 %v1808_v36, %s4483_s13 }
 0x49a   : > { %2174 = vrot.lane.b32.xlu0 %v2166_v20, %s4484_s14  ;;  %v1741_v20 = vsel %vm1021_vm10, %v1736_v22, %v5148_v40 }
 0x49b   : > { %1940 = vrot.lane.b32.xlu1 %v1930_v50, %s4481_s9 }
 0x49e   : > { %2178 = vrot.lane.b32.xlu0 %v2168_v24, %s4484_s14 }
 0x4a2   : > { %1757 = vrot.lane.b32.xlu0 %v1747_v39, %s4484_s14  ;;  %v1801_v39 = vsel %vm1084_vm13, %v1795_v14, %v5122_v9 }
 0x4a6   : > { %1879 = vrot.lane.b32.xlu0 %v1869_v7, %s4482_s12 }
 0x4f5   : > { %v1668_v5 = vpop.xlane.xlu0 %1667 }
 0x4f6   : > { %v1669_v59 = vmul.f32 0.00390625, %v1668_v5 }
 0x4f7   : > { %v1694_v25 = vpop.xlane.xlu1 %1693 }
 0x4f8   : > { %v1695_v62 = vmul.f32 0.00390625, %v1694_v25  ;;  %v1676_v26 = vmul.f32 %v1669_v59, %v1669_v59  ;;  %v1678_v4 = vsub.f32 %v5095_v63, %v1669_v59  ;;  %v1679_v13 = vsub.f32 %v5099_v27, %v1669_v59 }
 0x4f9   : > { %v1674_v58 = vpop.xlane.xlu0 %1673  ;;  %v1739_v63 = vsel %vm1021_vm10, %v1732_v38, %v5115_v15  ;;  %v1740_v27 = vsel %vm1021_vm10, %v5115_v15, %v1736_v22  ;;  %v1802_v38 = vsel %vm1084_vm13, %v5122_v9, %v5150_v41  ;;  %v1861_v15 = vsel %vm1147_vm0, %v5127_v21, %v1856_v46 }
 0x4fa   : > { %v1675_v57 = vmul.f32 0.00390625, %v1674_v58  ;;  %v1702_v42 = vmul.f32 %v1695_v62, %v1695_v62  ;;  %v1704_v19 = vsub.f32 %v5105_v44, %v1695_v62  ;;  %v1705_v51 = vsub.f32 %v5109_v49, %v1695_v62 }
 0x4fb   : > { %v5162_v52 = vpop.permute.xlu1 %1997  ;;  %v1800_v44 = vsel %vm1084_vm13, %v5118_v17, %v1795_v14  ;;  %v1862_v17 = vsel %vm1147_vm0, %v1856_v46, %v5132_v35  ;;  %v1863_v9 = vsel %vm1147_vm0, %v5132_v35, %v5152_v61  ;;  %v1999_v21 = vsel %vm1239_vm2, %v5160_v48, %v1994_v60 }
 0x4fc   : > { %v1677_v1 = vsub.f32 %v1675_v57, %v1676_v26 }
 0x4fd   : > { %v1700_v29 = vpop.xlane.xlu0 %1699 }
 0x4fe   : > { %v1680_v3 = vadd.f32 1e-05, %v1677_v1  ;;  %v1701_v30 = vmul.f32 0.00390625, %v1700_v29 }
 0x4ff   : > { %v2055_v23 = vpop.permute.xlu1 %2054 }
 0x500   : > { %4405 = vrsqrt.f32 %v1680_v3  ;;  %v1703_v43 = vsub.f32 %v1701_v30, %v1702_v42 }
 0x501   : > { %v5164_v45 = vpop.permute.xlu0 %1995 }
 0x502   : > { %v1706_v8 = vadd.f32 1e-05, %v1703_v43 }
 0x503   : > { %v5166_v10 = vpop.permute.xlu1 %2058 }
 0x504   : > { %4407 = vrsqrt.f32 %v1706_v8 }
 0x505   : > { %v5168_v31 = vpop.permute.xlu0 %2052 }
 0x506   : > { %v2060_v5 = vsel %vm1176_vm3, %v5168_v31, %v2055_v23 }
 0x507   : > { %v2116_v12 = vpop.permute.xlu1 %2115 }
 0x509   : > { %v5172_v18 = vpop.permute.xlu0 %2056 }
 0x50a   : > { %v4406_v55 = vpop.eup %4405  ;;  %v2061_v14 = vsel %vm1176_vm3, %v2055_v23, %v5172_v18 }
 0x50b   : > { %v1682_v28 = vmul.f32 %v4406_v55, %v1678_v4  ;;  %v1683_v2 = vmul.f32 %v4406_v55, %v1679_v13  ;;  %v5176_v34 = vpop.permute.xlu1 %2119  ;;  %v1923_v4 = vsel %vm1210_vm1, %v5154_v56, %v5156_v11 }
 0x50d   : > { %v1684_v32 = vmax.f32 %v1682_v28, 0.0  ;;  %v1685_v33 = vmax.f32 %v1683_v2, 0.0  ;;  %v5178_v6 = vpop.permute.xlu0 %2113  ;;  %v1924_v28 = vsel %vm1210_vm1, %v5156_v11, %v5158_v47 }
 0x50e   : > { %v4408_v36 = vpop.eup %4407  ;;  %v2121_v25 = vsel %vm1113_vm4, %v5178_v6, %v2116_v12 }
 0x50f   : > { %v5189_v49 = vadd.f32 %v1684_v32, %v4903_v53  ;;  %v1708_v50 = vmul.f32 %v4408_v36, %v1704_v19  ;;  %v1709_v24 = vmul.f32 %v4408_v36, %v1705_v51  ;;  %v5199_v7 = vadd.f32 %v1685_v33, %v4905_v54  ;;  %v2177_v58 = vpop.permute.xlu1 %2176 }
 0x510   : > { %v2000_v54 = vsel %vm1239_vm2, %v1994_v60, %v5164_v45 }
 0x511   : > { %v1710_v53 = vmax.f32 %v1708_v50, 0.0  ;;  %v1711_v22 = vmax.f32 %v1709_v24, 0.0  ;;  %v5205_v59 = vpop.permute.xlu0 %2117  ;;  %v1748_v35 = vmul.f32 %v1739_v63, %v5189_v49  ;;  %v2008_v60 = vmul.f32 %v1999_v21, %v5199_v7 }
 0x512   : > { %v2122_v62 = vsel %vm1113_vm4, %v2116_v12, %v5205_v59  ;;  %v5229_v57 = vmul.f32 %v2060_v5, %v5199_v7  ;;  %v1809_v3 = vmul.f32 %v1800_v44, %v5189_v49  ;;  %v1810_v30 = vmul.f32 %v1801_v39, %v5199_v7 }
 0x513   : > { %v5217_v46 = vadd.f32 %v1710_v53, %v4921_v0  ;;  %v5225_v26 = vadd.f32 %v1711_v22, %v4925_v16  ;;  %v1749_v0 = vmul.f32 %v1740_v27, %v5199_v7  ;;  %v5239_v16 = vmul.f32 %v2121_v25, %v5199_v7  ;;  %v2181_v51 = vpop.permute.xlu1 %2180 }
 0x514   : > { %v1922_v12 = vsel %vm1210_vm1, %v5138_v37, %v5154_v56  ;;  %v4127_v32 = vpack.i.bf16 %v1810_v30, %v1809_v3  ;;  %v1870_v63 = vmul.f32 %v1861_v15, %v5189_v49  ;;  %v1871_v50 = vmul.f32 %v1862_v17, %v5199_v7  ;;  %v2504_v3 = vld [vmem:[#allocation4 + $0x380] sm:$0xff]  ;;  %v2502_v30 = vld [vmem:[#allocation4 + $0x370] sm:$0xff] }
 0x515   : > { %v2009_v1 = vmul.f32 %v2000_v54, %v5217_v46  ;;  %v5234_v42 = vmul.f32 %v2061_v14, %v5217_v46  ;;  %v2175_v29 = vpop.permute.xlu0 %2174  ;;  %v5242_v23 = vmul.f32 %v2122_v62, %v5217_v46  ;;  %v4117_v43 = vpack.i.bf16 %v1749_v0, %v1748_v35 }
 0x516   : > { %v2182_v8 = vsel %vm1050_vm5, %v2175_v29, %v2177_v58  ;;  %v2190_v19 = vmul.f32 %v2175_v29, %v5189_v49  ;;  %v1750_v56 = vmul.f32 %v1741_v20, %v5217_v46  ;;  %v1751_v33 = vmul.f32 %v5148_v40, %v5225_v26 }
 0x517   : > { %v4157_v13 = vpack.i.bf16 %v2009_v1, %v2008_v60  ;;  %v4167_v55 = vpack.i.bf16 %v5234_v42, %v5229_v57  ;;  %v4177_v2 = vpack.i.bf16 %v5242_v23, %v5239_v16  ;;  %4118 = vrot.lane.b32.xlu0 %v4117_v43, %s4484_s14  ;;  %v2191_v37 = vmul.f32 %v2182_v8, %v5199_v7  ;;  %v2624_v16 = vld [vmem:[#allocation4 + $0x3a0] sm:$0xff]  ;;  %v2503_v23 = vld [vmem:[#allocation4 + $0x378] sm:$0xff]  ;;  %v2626_v43 = vld [vmem:[#allocation4 + $0x3b0] sm:$0xff] }
 0x518   : > { %v4122_v24 = vpack.i.bf16 %v1751_v33, %v1750_v56  ;;  %v1811_v20 = vmul.f32 %v1802_v38, %v5217_v46  ;;  %v4137_v40 = vpack.i.bf16 %v1871_v50, %v1870_v63  ;;  %v1812_v15 = vmul.f32 %v5150_v41, %v5225_v26  ;;  %v2505_v8 = vld [vmem:[#allocation4 + $0x388] sm:$0xff]  ;;  %v2753_v56 = vld [vmem:[#allocation4 + $0x410] sm:$0xff]  ;;  %v2750_v63 = vld [vmem:[#allocation4 + $0x3f8] sm:$0xff] }
 0x519   : > { %v2179_v36 = vpop.permute.xlu0 %2178  ;;  %v4187_v11 = vpack.i.bf16 %v2191_v37, %v2190_v19  ;;  %v1931_v22 = vmul.f32 %v1922_v12, %v5189_v49  ;;  %v1932_v5 = vmul.f32 %v1923_v4, %v5199_v7  ;;  %v1872_v21 = vmul.f32 %v1863_v9, %v5217_v46  ;;  %v2628_v12 = vld [vmem:[#allocation4 + $0x3c0] sm:$0xff]  ;;  %v2507_v4 = vld [vmem:[#allocation4 + $0x398] sm:$0xff]  ;;  %v2749_v19 = vld [vmem:[#allocation4 + $0x3f0] sm:$0xff] }
 0x51a   : > { %v2183_v27 = vsel %vm1050_vm5, %v2177_v58, %v2179_v36  ;;  %v2184_v44 = vsel %vm1050_vm5, %v2179_v36, %v2181_v51  ;;  %4123 = vrot.lane.b32.xlu1 %v4122_v24, %s4484_s14  ;;  %v1873_v54 = vmul.f32 %v5152_v61, %v5225_v26  ;;  %v1933_v38 = vmul.f32 %v1924_v28, %v5217_v46  ;;  %v2747_v28 = vld [vmem:[#allocation4 + $0x3e0] sm:$0xff]  ;;  %v2629_v37 = vld [vmem:[#allocation4 + $0x3c8] sm:$0xff]  ;;  %v2754_v50 = vld [vmem:[#allocation4 + $0x418] sm:$0xff] }
 0x51b   : > { %v2192_v39 = vmul.f32 %v2183_v27, %v5217_v46  ;;  %v2193_v53 = vmul.f32 %v2184_v44, %v5225_v26  ;;  %4128 = vrot.lane.b32.xlu0 %v4127_v32, %s4483_s13  ;;  %v4132_v14 = vpack.i.bf16 %v1812_v15, %v1811_v20  ;;  %v4147_v25 = vpack.i.bf16 %v1932_v5, %v1931_v22  ;;  %v2631_v32 = vld [vmem:[#allocation4 + $0x3d8] sm:$0xff]  ;;  %v2748_v33 = vld [vmem:[#allocation4 + $0x3e8] sm:$0xff]  ;;  %v2869_v36 = vld [vmem:[#allocation4 + $0x420] sm:$0xff] }
 0x51c   : > { %v1934_v58 = vmul.f32 %v5158_v47, %v5225_v26  ;;  %v4142_v41 = vpack.i.bf16 %v1873_v54, %v1872_v21  ;;  %v2001_v9 = vsel %vm1239_vm2, %v5164_v45, %v5162_v52  ;;  %v2011_v61 = vmul.f32 0.0, %v5162_v52  ;;  %v2752_v27 = vld [vmem:[#allocation4 + $0x408] sm:$0xff]  ;;  %v2873_v44 = vld [vmem:[#allocation4 + $0x440] sm:$0xff]  ;;  %v2875_v24 = vld [vmem:[#allocation4 + $0x450] sm:$0xff] }
 0x51d   : > { %v4192_v17 = vpack.i.bf16 %v2193_v53, %v2192_v39  ;;  %v2010_v35 = vmul.f32 %v2001_v9, %v5225_v26  ;;  %v2062_v47 = vsel %vm1176_vm3, %v5172_v18, %v5166_v10  ;;  %v2072_v60 = vmul.f32 0.0, %v5166_v10  ;;  %v2870_v39 = vld [vmem:[#allocation4 + $0x428] sm:$0xff]  ;;  %v3025_v53 = vld [vmem:[#allocation4 + $0x4a0] sm:$0xff]  ;;  %v2872_v20 = vld [vmem:[#allocation4 + $0x438] sm:$0xff]  ;;  %v1758_v22 = vpop.permute.xlu0 %1757 }
 0x51e   : > { %v4152_v62 = vpack.i.bf16 %v1934_v58, %v1933_v38  ;;  %4133 = vrot.lane.b32.xlu1 %v4132_v14, %s4483_s13  ;;  %v2071_v45 = vmul.f32 %v2062_v47, %v5225_v26  ;;  %v2007_v57 = vmul.f32 %v5160_v48, %v5189_v49  ;;  %v2123_v52 = vsel %vm1113_vm4, %v5205_v59, %v5176_v34  ;;  %v2874_v15 = vld [vmem:[#allocation4 + $0x448] sm:$0xff]  ;;  %v3029_v5 = vld [vmem:[#allocation4 + $0x4c0] sm:$0xff]  ;;  %v3031_v21 = vld [vmem:[#allocation4 + $0x4d0] sm:$0xff]  ;;  %v1819_v14 = vpop.permute.xlu1 %1818 }
 0x51f   : > { %4138 = vrot.lane.b32.xlu0 %v4137_v40, %s4482_s12  ;;  %v4162_v0 = vpack.i.bf16 %v2011_v61, %v2010_v35  ;;  %v2133_v1 = vmul.f32 0.0, %v5176_v34  ;;  %v2132_v42 = vmul.f32 %v2123_v52, %v5225_v26  ;;  %v2129_v48 = vmul.f32 %v5178_v6, %v5189_v49  ;;  %v2501_v34 = vld [vmem:[#allocation4 + $0x368] sm:$0xff]  ;;  %v2500_v6 = vld [vmem:[#allocation4 + $0x360] sm:$0xff]  ;;  %v3027_v40 = vld [vmem:[#allocation4 + $0x4b0] sm:$0xff] }
 0x520   : > { %v4172_v18 = vpack.i.bf16 %v2072_v60, %v2071_v45  ;;  %v2068_v59 = vmul.f32 %v5168_v31, %v5189_v49  ;;  %v2194_v29 = vmul.f32 0.0, %v2181_v51  ;;  %v2506_v31 = vld [vmem:[#allocation4 + $0x390] sm:$0xff]  ;;  %v2751_v51 = vld [vmem:[#allocation4 + $0x400] sm:$0xff]  ;;  %v3026_v38 = vld [vmem:[#allocation4 + $0x4a8] sm:$0xff] }
 0x521   : > { %v4182_v10 = vpack.i.bf16 %v2133_v1, %v2132_v42  ;;  %v1880_v54 = vpop.permute.xlu0 %1879  ;;  %v3149_v35 = vld [vmem:[#allocation4 + $0x4f0] sm:$0xff]  ;;  %v3030_v60 = vld [vmem:[#allocation4 + $0x4c8] sm:$0xff] }
 0x522   : > { %4143 = vrot.lane.b32.xlu1 %v4142_v41, %s4482_s12  ;;  %v3028_v41 = vld [vmem:[#allocation4 + $0x4b8] sm:$0xff] }
 0x523   : > { %4148 = vrot.lane.b32.xlu0 %v4147_v25, %s4481_s9  ;;  %v3147_v25 = vld [vmem:[#allocation4 + $0x4e0] sm:$0xff] }
 0x526   : > { %4153 = vrot.lane.b32.xlu1 %v4152_v62, %s4481_s9  ;;  %v1941_v62 = vpop.permute.xlu1 %1940 }
 0x527   : > { %4158 = vrot.lane.b32.xlu0 %v4157_v13, %s4480_s8  ;;  %v2630_v13 = vld [vmem:[#allocation4 + $0x3d0] sm:$0xff] }
 0x52a   : > { %4163 = vrot.lane.b32.xlu1 %v4162_v0, %s4480_s8 }
 0x52b   : > { %2017 = vrot.lane.b32.xlu0 %v2007_v57, %s4480_s8 }
 0x52e   : > { %4168 = vrot.lane.b32.xlu1 %v4167_v55, %s4479_s7  ;;  %v2625_v55 = vld [vmem:[#allocation4 + $0x3a8] sm:$0xff] }
 0x52f   : > { %4173 = vrot.lane.b32.xlu0 %v4172_v18, %s4479_s7 }
 0x532   : > { %4178 = vrot.lane.b32.xlu1 %v4177_v2, %s4478_s30  ;;  %v2627_v2 = vld [vmem:[#allocation4 + $0x3b8] sm:$0xff] }
 0x533   : > { %4183 = vrot.lane.b32.xlu0 %v4182_v10, %s4478_s30  ;;  %v3151_v10 = vld [vmem:[#allocation4 + $0x500] sm:$0xff] }
 0x536   : > { %2078 = vrot.lane.b32.xlu1 %v2068_v59, %s4479_s7 }
 0x537   : > { %2139 = vrot.lane.b32.xlu0 %v2129_v48, %s4478_s30  ;;  %s3913_s30 = sshll.u32 %s6334_s22, 6 }
 0x538   : > { %s6223_s9 = scalar_lea.vmem %s6254_s6, %s3913_s30 }
 0x53a   : > { %4188 = vrot.lane.b32.xlu1 %v4187_v11, %s4477_s29  ;;  %v2871_v11 = vld [vmem:[#allocation4 + $0x430] sm:$0xff] }
 0x53b   : > { %4193 = vrot.lane.b32.xlu0 %v4192_v17, %s4477_s29  ;;  %v2876_v17 = vld [vmem:[#allocation4 + $0x458] sm:$0xff] }
 0x53e   : > { %2208 = vrot.lane.b32.xlu1 %v2194_v29, %s4477_s29 }
 0x53f   : > { %2518 = vrot.lane.b32.xlu0 %v2501_v34, %s4485_s17 }
 0x542   : > { %2516 = vrot.lane.b32.xlu1 %v2500_v6, %s4485_s17  ;;  %v3032_v6 = vld [vmem:[#allocation4 + $0x4d8] sm:$0xff] }
 0x543   : > { %2524 = vrot.lane.b32.xlu0 %v2504_v3, %s4485_s17 }
 0x546   : > { %2520 = vrot.lane.b32.xlu1 %v2502_v30, %s4485_s17 }
 0x547   : > { %2528 = vrot.lane.b32.xlu0 %v2506_v31, %s4485_s17 }
 0x54a   : > { %2522 = vrot.lane.b32.xlu1 %v2503_v23, %s4485_s17 }
 0x54b   : > { %2640 = vrot.lane.b32.xlu0 %v2624_v16, %s4486_s18 }
 0x54e   : > { %2526 = vrot.lane.b32.xlu1 %v2505_v8, %s4485_s17  ;;  %v3153_v8 = vld [vmem:[#allocation4 + $0x510] sm:$0xff] }
 0x54f   : > { %2644 = vrot.lane.b32.xlu0 %v2626_v43, %s4486_s18 }
 0x552   : > { %2530 = vrot.lane.b32.xlu1 %v2507_v4, %s4485_s17 }
 0x553   : > { %2648 = vrot.lane.b32.xlu0 %v2628_v12, %s4486_s18 }
 0x556   : > { %2642 = vrot.lane.b32.xlu1 %v2625_v55, %s4486_s18 }
 0x557   : > { %2652 = vrot.lane.b32.xlu0 %v2630_v13, %s4486_s18 }
 0x55a   : > { %2646 = vrot.lane.b32.xlu1 %v2627_v2, %s4486_s18  ;;  %v3148_v2 = vld [vmem:[#allocation4 + $0x4e8] sm:$0xff] }
 0x55b   : > { %2763 = vrot.lane.b32.xlu0 %v2747_v28, %s4487_s19 }
 0x55e   : > { %2650 = vrot.lane.b32.xlu1 %v2629_v37, %s4486_s18 }
 0x55f   : > { %2767 = vrot.lane.b32.xlu0 %v2749_v19, %s4487_s19 }
 0x562   : > { %2654 = vrot.lane.b32.xlu1 %v2631_v32, %s4486_s18 }
 0x563   : > { %2771 = vrot.lane.b32.xlu0 %v2751_v51, %s4487_s19 }
 0x566   : > { %2765 = vrot.lane.b32.xlu1 %v2748_v33, %s4487_s19 }
 0x567   : > { %2775 = vrot.lane.b32.xlu0 %v2753_v56, %s4487_s19 }
 0x56a   : > { %2769 = vrot.lane.b32.xlu1 %v2750_v63, %s4487_s19 }
 0x56b   : > { %2885 = vrot.lane.b32.xlu0 %v2869_v36, %s4488_s20 }
 0x56e   : > { %2773 = vrot.lane.b32.xlu1 %v2752_v27, %s4487_s19 }
 0x56f   : > { %2889 = vrot.lane.b32.xlu0 %v2871_v11, %s4488_s20 }
 0x572   : > { %2777 = vrot.lane.b32.xlu1 %v2754_v50, %s4487_s19  ;;  %v3269_v50 = vld [vmem:[#allocation4 + $0x520] sm:$0xff] }
 0x573   : > { %2893 = vrot.lane.b32.xlu0 %v2873_v44, %s4488_s20  ;;  %v1967_v44 = vld [vmem:[#allocation4 + $0x2c8] sm:$0xff] }
 0x576   : > { %2887 = vrot.lane.b32.xlu1 %v2870_v39, %s4488_s20 }
 0x577   : > { %2897 = vrot.lane.b32.xlu0 %v2875_v24, %s4488_s20 }
 0x57a   : > { %2891 = vrot.lane.b32.xlu1 %v2872_v20, %s4488_s20 }
 0x57b   : > { %3041 = vrot.lane.b32.xlu0 %v3025_v53, %s4489_s23 }
 0x57e   : > { %2895 = vrot.lane.b32.xlu1 %v2874_v15, %s4488_s20  ;;  %v3150_v15 = vld [vmem:[#allocation4 + $0x4f8] sm:$0xff] }
 0x57f   : > { %3045 = vrot.lane.b32.xlu0 %v3027_v40, %s4489_s23  ;;  %v1966_v40 = vld [vmem:[#allocation4 + $0x2c0] sm:$0xff] }
 0x582   : > { %2899 = vrot.lane.b32.xlu1 %v2876_v17, %s4488_s20 }
 0x583   : > { %3049 = vrot.lane.b32.xlu0 %v3029_v5, %s4489_s23 }
 0x586   : > { %3043 = vrot.lane.b32.xlu1 %v3026_v38, %s4489_s23  ;;  %v1971_v38 = vmul.f32 %v1967_v44, %v5199_v7 }
 0x587   : > { %3053 = vrot.lane.b32.xlu0 %v3031_v21, %s4489_s23 }
 0x589   : > { %v4119_v58 = vpop.permute.xlu0 %4118 }
 0x58a   : > { %v4121_v9 = vunpack.i.h.bf16 %v4119_v58  ;;  %v4120_v61 = vunpack.i.l.bf16 %v4119_v58  ;;  %3047 = vrot.lane.b32.xlu1 %v3028_v41, %s4489_s23  ;;  %v3271_v41 = vld [vmem:[#allocation4 + $0x530] sm:$0xff] }
 0x58b   : > { %3163 = vrot.lane.b32.xlu0 %v3147_v25, %s4485_s17  ;;  %v1970_v25 = vmul.f32 %v1966_v40, %v5189_v49 }
 0x58c   : > { %v4124_v45 = vpop.permute.xlu1 %4123  ;;  %v1767_v52 = vsel %vm1050_vm5, %v1758_v22, %v4120_v61  ;;  %v1768_v1 = vsel %vm1050_vm5, %v4120_v61, %v4121_v9 }
 0x58d   : > { %v4129_v47 = vpop.permute.xlu0 %4128  ;;  %v4126_v48 = vunpack.i.h.bf16 %v4124_v45  ;;  %v4125_v59 = vunpack.i.l.bf16 %v4124_v45  ;;  %v3152_v45 = vld [vmem:[#allocation4 + $0x508] sm:$0xff] }
 0x58e   : > { %v4131_v57 = vunpack.i.h.bf16 %v4129_v47  ;;  %v4130_v0 = vunpack.i.l.bf16 %v4129_v47  ;;  %3051 = vrot.lane.b32.xlu1 %v3030_v60, %s4489_s23  ;;  %v1969_v47 = vld [vmem:[#allocation4 + $0x2d8] sm:$0xff]  ;;  %v1968_v60 = vld [vmem:[#allocation4 + $0x2d0] sm:$0xff] }
 0x58f   : > { %3167 = vrot.lane.b32.xlu0 %v3149_v35, %s4485_s17  ;;  %v1769_v12 = vsel %vm1050_vm5, %v4121_v9, %v4125_v59  ;;  %v1770_v55 = vsel %vm1050_vm5, %v4125_v59, %v4126_v48  ;;  %v1972_v48 = vmul.f32 %v1968_v60, %v5217_v46 }
 0x590   : > { %v1828_v18 = vsel %vm1113_vm4, %v1819_v14, %v4130_v0  ;;  %v1829_v42 = vsel %vm1113_vm4, %v4130_v0, %v4131_v57  ;;  %v4134_v31 = vpop.permute.xlu1 %4133 }
 0x591   : > { %v4139_v34 = vpop.permute.xlu0 %4138  ;;  %v2259_v29 = vpack.c.bf16 %v1829_v42, %v1768_v1  ;;  %v2258_v3 = vpack.c.bf16 %v1828_v18, %v1767_v52  ;;  %v4136_v30 = vunpack.i.h.bf16 %v4134_v31  ;;  %v4135_v16 = vunpack.i.l.bf16 %v4134_v31 }
 0x592   : > { %v4140_v23 = vunpack.i.l.bf16 %v4139_v34  ;;  %v4141_v43 = vunpack.i.h.bf16 %v4139_v34  ;;  %3055 = vrot.lane.b32.xlu1 %v3032_v6, %s4489_s23 }
 0x593   : > { %2300 = vmatprep.subr.bf16.mxu0 %v2259_v29  ;;  %3171 = vrot.lane.b32.xlu0 %v3151_v10, %s4485_s17  ;;  %v1830_v4 = vsel %vm1113_vm4, %v4131_v57, %v4135_v16  ;;  %v1831_v28 = vsel %vm1113_vm4, %v4135_v16, %v4136_v30  ;;  %v1973_v10 = vmul.f32 %v1969_v47, %v5225_v26 }
 0x594   : > { %2301 = vmatpush1.bf16.msra.mxu0 %v2258_v3  ;;  %v4144_v19 = vpop.permute.xlu1 %4143  ;;  %v2261_v32 = vpack.c.bf16 %v1831_v28, %v1770_v55  ;;  %v2260_v56 = vpack.c.bf16 %v1830_v4, %v1769_v12  ;;  %v1889_v33 = vsel %vm1176_vm3, %v1880_v54, %v4140_v23  ;;  %v1890_v11 = vsel %vm1176_vm3, %v4140_v23, %v4141_v43  ;;  %v3154_v3 = vld [vmem:[#allocation4 + $0x518] sm:$0xff] }
 0x595   : > { %v4149_v13 = vpop.permute.xlu0 %4148  ;;  %v4145_v36 = vunpack.i.l.bf16 %v4144_v19  ;;  %v4146_v24 = vunpack.i.h.bf16 %v4144_v19 }
 0x596   : > { %v4151_v37 = vunpack.i.h.bf16 %v4149_v13  ;;  %v4150_v51 = vunpack.i.l.bf16 %v4149_v13  ;;  %2343 = vmatprep.subr.bf16.mxu1 %v2261_v32  ;;  %3165 = vrot.lane.b32.xlu1 %v3148_v2, %s4485_s17 }
 0x597   : > { %3175 = vrot.lane.b32.xlu0 %v3153_v8, %s4485_s17  ;;  %2344 = vmatpush1.bf16.msra.mxu1 %v2260_v56  ;;  %v1891_v14 = vsel %vm1176_vm3, %v4141_v43, %v4145_v36  ;;  %v1892_v35 = vsel %vm1176_vm3, %v4145_v36, %v4146_v24  ;;  %v3270_v8 = vld [vmem:[#allocation4 + $0x528] sm:$0xff] }
 0x598   : > { %v1950_v63 = vsel %vm1239_vm2, %v1941_v62, %v4150_v51  ;;  %v1951_v27 = vsel %vm1239_vm2, %v4150_v51, %v4151_v37  ;;  %v4154_v22 = vpop.permute.xlu1 %4153 }
 0x599   : > { %v4159_v39 = vpop.permute.xlu0 %4158  ;;  %v2263_v53 = vpack.c.bf16 %v1951_v27, %v1890_v11  ;;  %v2262_v20 = vpack.c.bf16 %v1950_v63, %v1889_v33  ;;  %v4156_v21 = vunpack.i.h.bf16 %v4154_v22  ;;  %v4155_v54 = vunpack.i.l.bf16 %v4154_v22 }
 0x59a   : > { %v4161_v5 = vunpack.i.h.bf16 %v4159_v39  ;;  %v4160_v17 = vunpack.i.l.bf16 %v4159_v39  ;;  %3169 = vrot.lane.b32.xlu1 %v3150_v15, %s4485_s17 }
 0x59b   : > { %2302 = vmatprep.subr.bf16.mxu0 %v2263_v53  ;;  %3285 = vrot.lane.b32.xlu0 %v3269_v50, %s4486_s18  ;;  %v1952_v62 = vsel %vm1239_vm2, %v4151_v37, %v4155_v54  ;;  %v1953_v7 = vsel %vm1239_vm2, %v4155_v54, %v4156_v21  ;;  %v3272_v50 = vld [vmem:[#allocation4 + $0x538] sm:$0xff] }
 0x59c   : > { %2303 = vmatpush1.bf16.msra.mxu0 %v2262_v20  ;;  %v2028_v58 = vsel %vm1210_vm1, %v4160_v17, %v4161_v5  ;;  %v4164_v57 = vpop.permute.xlu1 %4163  ;;  %v2265_v49 = vpack.c.bf16 %v1953_v7, %v1892_v35  ;;  %v2264_v52 = vpack.c.bf16 %v1952_v62, %v1891_v14 }
 0x59d   : > { %v2018_v9 = vpop.permute.xlu0 %2017  ;;  %v2267_v61 = vpack.c.bf16 %v2028_v58, %v1971_v38  ;;  %v4166_v18 = vunpack.i.h.bf16 %v4164_v57  ;;  %v4165_v1 = vunpack.i.l.bf16 %v4164_v57 }
 0x59e   : > { %v2027_v0 = vsel %vm1210_vm1, %v2018_v9, %v4160_v17  ;;  %2345 = vmatprep.subr.bf16.mxu1 %v2265_v49  ;;  %3173 = vrot.lane.b32.xlu1 %v3152_v45, %s4485_s17 }
 0x59f   : > { %v2266_v42 = vpack.c.bf16 %v2027_v0, %v1970_v25  ;;  %2304 = vmatprep.subr.bf16.mxu0 %v2267_v61  ;;  %3289 = vrot.lane.b32.xlu0 %v3271_v41, %s4486_s18  ;;  %v2029_v59 = vsel %vm1210_vm1, %v4161_v5, %v4165_v1  ;;  %v2030_v29 = vsel %vm1210_vm1, %v4165_v1, %v4166_v18  ;;  %v4397_v61 = vld [vmem:[%s6252_s4] sm:$0xff]  }
 0x5a0   : > { %2346 = vmatpush1.bf16.msra.mxu1 %v2264_v52  ;;  %v4169_v6 = vpop.permute.xlu1 %4168  ;;  %v2269_v31 = vpack.c.bf16 %v2030_v29, %v1973_v10  ;;  %v2268_v30 = vpack.c.bf16 %v2029_v59, %v1972_v48 }
 0x5a1   : > { %v4174_v34 = vpop.permute.xlu0 %4173  ;;  %2305 = vmatpush1.bf16.msra.mxu0 %v2266_v42  ;;  %v4171_v16 = vunpack.i.h.bf16 %v4169_v6  ;;  %v4170_v46 = vunpack.i.l.bf16 %v4169_v6 }
 0x5a2   : > { %v4176_v23 = vunpack.i.h.bf16 %v4174_v34  ;;  %v4175_v43 = vunpack.i.l.bf16 %v4174_v34  ;;  %2347 = vmatprep.subr.bf16.mxu1 %v2269_v31  ;;  %3177 = vrot.lane.b32.xlu1 %v3154_v3, %s4485_s17 }
 0x5a3   : > { %v2089_v56 = vsel %vm1147_vm0, %v4170_v46, %v4171_v16 }
 0x5a4   : > { %2348 = vmatpush1.bf16.msra.mxu1 %v2268_v30  ;;  %v4179_v12 = vpop.permute.xlu1 %4178  ;;  %v2090_v2 = vsel %vm1147_vm0, %v4171_v16, %v4175_v43  ;;  %v2091_v19 = vsel %vm1147_vm0, %v4175_v43, %v4176_v23 }
 0x5a5   : > { %v4184_v26 = vpop.permute.xlu0 %4183  ;;  %v4181_v55 = vunpack.i.h.bf16 %v4179_v12  ;;  %v4180_v28 = vunpack.i.l.bf16 %v4179_v12 }
 0x5a6   : > { %v4186_v4 = vunpack.i.h.bf16 %v4184_v26  ;;  %v4185_v13 = vunpack.i.l.bf16 %v4184_v26  ;;  %3287 = vrot.lane.b32.xlu1 %v3270_v8, %s4486_s18 }
 0x5a7   : > { %v2150_v33 = vsel %vm1084_vm13, %v4180_v28, %v4181_v55 }
 0x5a8   : > { %v2152_v37 = vsel %vm1084_vm13, %v4185_v13, %v4186_v4  ;;  %v2151_v51 = vsel %vm1084_vm13, %v4181_v55, %v4185_v13  ;;  %v2079_v63 = vpop.permute.xlu1 %2078  ;;  %v2271_v27 = vpack.c.bf16 %v2150_v33, %v2089_v56 }
 0x5a9   : > { %v2140_v32 = vpop.permute.xlu0 %2139  ;;  %v2273_v36 = vpack.c.bf16 %v2152_v37, %v2091_v19  ;;  %v2272_v44 = vpack.c.bf16 %v2151_v51, %v2090_v2  ;;  %v2088_v24 = vsel %vm1147_vm0, %v2079_v63, %v4170_v46 }
 0x5aa   : > { %v2149_v11 = vsel %vm1084_vm13, %v2140_v32, %v4180_v28  ;;  %2306 = vmatprep.subr.bf16.mxu0 %v2271_v27  ;;  %3291 = vrot.lane.b32.xlu1 %v3272_v50, %s4486_s18 }
 0x5ab   : > { %2349 = vmatprep.subr.bf16.mxu1 %v2273_v36  ;;  %v2270_v39 = vpack.c.bf16 %v2149_v11, %v2088_v24 }
 0x5ac   : > { %2350 = vmatpush1.bf16.msra.mxu1 %v2272_v44  ;;  %v4189_v20 = vpop.permute.xlu1 %4188 }
 0x5ad   : > { %v4194_v53 = vpop.permute.xlu0 %4193  ;;  %2307 = vmatpush1.bf16.msra.mxu0 %v2270_v39  ;;  %v4191_v22 = vunpack.i.h.bf16 %v4189_v20  ;;  %v4190_v5 = vunpack.i.l.bf16 %v4189_v20 }
 0x5ae   : > { %v4196_v40 = vunpack.i.h.bf16 %v4194_v53  ;;  %v4195_v15 = vunpack.i.l.bf16 %v4194_v53 }
 0x5af   : > { %v2210_v54 = vsel %vm1021_vm10, %v4190_v5, %v4191_v22 }
 0x5b0   : > { %v2212_v17 = vsel %vm1021_vm10, %v4195_v15, %v4196_v40  ;;  %v2211_v21 = vsel %vm1021_vm10, %v4191_v22, %v4195_v15  ;;  %v2209_v38 = vpop.permute.xlu1 %2208  ;;  %v2274_v25 = vpack.c.bf16 %v2210_v54, %v2210_v54 }
 0x5b1   : > { %v2275_v14 = vpack.c.bf16 %v2211_v21, %v2211_v21  ;;  %v2276_v58 = vpack.c.bf16 %v2212_v17, %v2212_v17  ;;  %v2213_v41 = vsel %vm1021_vm10, %v4196_v40, %v2209_v38  ;;  %v5420_v47 = vpop.permute.xlu0 %2518 }
 0x5b2   : > { %v2277_v62 = vpack.c.bf16 %v2213_v41, %v2213_v41  ;;  %v2289_v9 = vsel %vm853_vm8, %v2274_v25, 0 }
 0x5b3   : > { %3902 = vmatprep.subr.msk.bf16.mxu0 %vm853_vm8, %v2275_v14  ;;  %v2295_v35 = vsel %vm853_vm8, %v2276_v58, 0 }
 0x5b4   : > { %2309 = vmatpush1.bf16.msra.mxu0 %v2289_v9  ;;  %3904 = vmatprep.subr.msk.bf16.mxu1 %vm853_vm8, %v2277_v62  ;;  %v5418_v7 = vpop.permute.xlu1 %2516  ;;  %vm2958_vm8 = vcmask 31744  }
 0x5b5   : > { %2352 = vmatpush1.bf16.msra.mxu1 %v2295_v35  ;;  %v5424_v45 = vpop.permute.xlu0 %2524 }
 0x5b6   : > { %6280 = vst [vmem:[#allocation7_spill] sm:$0xff] %v5424_v45 }
 0x5b7   : > { %3903 = vmatmul.mubr.msk.bf16.vlgmr.msra.gmra.mrb[8].mxu0 %vm849_vm9, %v4397_v61 }
 0x5b8   : > { %3905 = vmatmul.mubr.msk.bf16.vlgmr.msra.gmra.mrb[8].mxu1 %vm849_vm9, %v4397_v61  ;;  %v5422_v60 = vpop.permute.xlu1 %2520  ;;  %vm2532_vm9 = vcmask 490496  }
 0x5b9   : > { %v5430_v49 = vpop.permute.xlu0 %2528 }
 0x5ba   : > { %6282 = vst [vmem:[#allocation9_spill] sm:$0xff] %v5430_v49 }
 0x5bc   : > { %v5426_v57 = vpop.permute.xlu1 %2522 }
 0x5bd   : > { %v5434_v18 = vpop.permute.xlu0 %2640 }
 0x5c0   : > { %v5428_v0 = vpop.permute.xlu1 %2526 }
 0x5c1   : > { %6281 = vst [vmem:[#allocation8_spill] sm:$0xff] %v5428_v0  ;;  %v5438_v42 = vpop.permute.xlu0 %2644 }
 0x5c4   : > { %v5432_v52 = vpop.permute.xlu1 %2530 }
 0x5c5   : > { %6283 = vst [vmem:[#allocation10_spill] sm:$0xff] %v5432_v52  ;;  %v5442_v48 = vpop.permute.xlu0 %2648 }
 0x5c6   : > { %6284 = vst [vmem:[#allocation11_spill] sm:$0xff] %v5442_v48 }
 0x5c8   : > { %v5436_v1 = vpop.permute.xlu1 %2642 }
 0x5c9   : > { %v5446_v34 = vpop.permute.xlu0 %2652 }
 0x5ca   : > { %6286 = vst [vmem:[#allocation13_spill] sm:$0xff] %v5446_v34 }
 0x5cc   : > { %v5440_v10 = vpop.permute.xlu1 %2646 }
 0x5cd   : > { %v5450_v3 = vpop.permute.xlu0 %2763 }
 0x5d0   : > { %v5444_v59 = vpop.permute.xlu1 %2650 }
 0x5d1   : > { %6285 = vst [vmem:[#allocation12_spill] sm:$0xff] %v5444_v59  ;;  %v5454_v31 = vpop.permute.xlu0 %2767 }
 0x5d4   : > { %v5448_v29 = vpop.permute.xlu1 %2654 }
 0x5d5   : > { %6287 = vst [vmem:[#allocation14_spill] sm:$0xff] %v5448_v29  ;;  %v5458_v16 = vpop.permute.xlu0 %2771 }
 0x5d6   : > { %6288 = vst [vmem:[#allocation15_spill] sm:$0xff] %v5458_v16 }
 0x5d8   : > { %v5452_v6 = vpop.permute.xlu1 %2765 }
 0x5d9   : > { %v5462_v43 = vpop.permute.xlu0 %2775 }
 0x5da   : > { %6290 = vst [vmem:[#allocation17_spill] sm:$0xff] %v5462_v43 }
 0x5dc   : > { %v5456_v30 = vpop.permute.xlu1 %2769 }
 0x5dd   : > { %v5466_v26 = vpop.permute.xlu0 %2885 }
 0x5e0   : > { %v5460_v23 = vpop.permute.xlu1 %2773 }
 0x5e1   : > { %6289 = vst [vmem:[#allocation16_spill] sm:$0xff] %v5460_v23  ;;  %v5470_v12 = vpop.permute.xlu0 %2889 }
 0x5e4   : > { %v5464_v46 = vpop.permute.xlu1 %2777 }
 0x5e5   : > { %6291 = vst [vmem:[#allocation18_spill] sm:$0xff] %v5464_v46  ;;  %v5479_v55 = vpop.permute.xlu0 %2893 }
 0x5e8   : > { %v5468_v8 = vpop.permute.xlu1 %2887 }
 0x5e9   : > { %v5475_v4 = vsel %vm2901_vm7, %v5468_v8, %v5470_v12  ;;  %v5481_v2 = vpop.permute.xlu0 %2897 }
 0x5ea   : > { %6292 = vst [vmem:[#allocation19_spill] sm:$0xff] %v5481_v2 }
 0x5ec   : > { %v5477_v13 = vpop.permute.xlu1 %2891 }
 0x5ed   : > { %v5493_v32 = vpop.permute.xlu0 %3041 }
 0x5f0   : > { %v2896_v28 = vpop.permute.xlu1 %2895 }
 0x5f1   : > { %v5485_v19 = vsel %vm2901_vm7, %v5479_v55, %v2896_v28  ;;  %v5489_v37 = vsel %vm2901_vm7, %v2896_v28, %v5481_v2  ;;  %v3046_v33 = vpop.permute.xlu0 %3045 }
 0x5f2   : > { %6293 = vst [vmem:[#allocation20_spill] sm:$0xff] %v5485_v19  ;;  %6294 = vst [vmem:[#allocation21_spill] sm:$0xff] %v5489_v37 }
 0x5f4   : > { %v5491_v51 = vpop.permute.xlu1 %2899 }
 0x5f5   : > { %6295 = vst [vmem:[#allocation22_spill] sm:$0xff] %v5491_v51  ;;  %v5503_v11 = vpop.permute.xlu0 %3049 }
 0x5f8   : > { %v5495_v56 = vpop.permute.xlu1 %3043 }
 0x5f9   : > { %v5499_v36 = vsel %vm2958_vm8, %v5495_v56, %v3046_v33  ;;  %v3054_v50 = vpop.permute.xlu0 %3053 }
 0x5fc   : > { %v5501_v63 = vpop.permute.xlu1 %3047 }
 0x5fd   : > { %v5507_v27 = vsel %vm2958_vm8, %v3046_v33, %v5501_v63  ;;  %v5517_v53 = vpop.permute.xlu0 %3163 }
 0x600   : > { %v5509_v44 = vpop.permute.xlu1 %3051 }
 0x601   : > { %v5513_v24 = vsel %vm2958_vm8, %v5509_v44, %v3054_v50  ;;  %v5525_v15 = vpop.permute.xlu0 %3167 }
 0x602   : > { %6296 = vst [vmem:[#allocation23_spill] sm:$0xff] %v5513_v24 }
 0x604   : > { %v5515_v39 = vpop.permute.xlu1 %3055 }
 0x605   : > { %v5521_v20 = vsel %vm2958_vm8, %v3054_v50, %v5515_v39  ;;  %v5534_v17 = vpop.permute.xlu0 %3171 }
 0x606   : > { %6297 = vst [vmem:[#allocation24_spill] sm:$0xff] %v5521_v20  ;;  %v3394_v20 = vld [vmem:[#allocation4 + $0x578] sm:$0xff] }
 0x608   : > { %v5523_v40 = vpop.permute.xlu1 %3165 }
 0x609   : > { %v5530_v22 = vsel %vm2532_vm9, %v5523_v40, %v5525_v15  ;;  %v3176_v54 = vpop.permute.xlu0 %3175 }
 0x60c   : > { %v5532_v5 = vpop.permute.xlu1 %3169 }
 0x610   : > { %v5536_v21 = vpop.permute.xlu1 %3173 }
 0x611   : > { %v5540_v38 = vsel %vm2532_vm9, %v5536_v21, %v3176_v54 }
 0x612   : > { %6298 = vst [vmem:[#allocation25_spill] sm:$0xff] %v5540_v38  ;;  %v3274_v38 = vld [vmem:[#allocation4 + $0x548] sm:$0xff] }
 0x614   : > { %v5542_v14 = vpop.permute.xlu1 %3177 }
 0x615   : > { %6299 = vst [vmem:[#allocation26_spill] sm:$0xff] %v5542_v14  ;;  %v5546_v25 = vsel %vm2532_vm9, %v3176_v54, %v5542_v14 }
 0x616   : > { %6300 = vst [vmem:[#allocation27_spill] sm:$0xff] %v5546_v25 }
 0x68a   : > { %v5548_v58 = vpop.f32.mrb[8].mxu0 }
 0x68b   : > { %v2394_v41 = vmul.f32 %v5548_v58, %v5548_v58  ;;  %v5552_v62 = vpop.f32.mrb[9].mxu0  ;;  %v5560_v28 = vpop.f32.mrb[8].mxu1 }
 0x68c   : > { %v2386_v9 = vadd.f32 %v5552_v62, %v5548_v58  ;;  %v2395_v61 = vmul.f32 %v5552_v62, %v5552_v62  ;;  %v5558_v35 = vpop.f32.mrb[10].mxu0  ;;  %v2446_v54 = vmul.f32 %v5560_v28, %v5560_v28  ;;  %v5568_v46 = vpop.f32.mrb[9].mxu1 }
 0x68d   : > { %v2396_v33 = vmul.f32 %v5558_v35, %v5558_v35  ;;  %v5564_v50 = vpop.f32.mrb[11].mxu0  ;;  %v2438_v59 = vadd.f32 %v5568_v46, %v5560_v28  ;;  %v2447_v43 = vmul.f32 %v5568_v46, %v5568_v46  ;;  %v5578_v23 = vpop.f32.mrb[10].mxu1 }
 0x68e   : > { %v2389_v2 = vadd.f32 %v5564_v50, %v5558_v35  ;;  %v2397_v51 = vmul.f32 %v5564_v50, %v5564_v50  ;;  %2387 = vadd.xlane.f32.xlu0 %v2386_v9  ;;  %v2448_v52 = vmul.f32 %v5578_v23, %v5578_v23  ;;  %v5582_v34 = vpop.f32.mrb[11].mxu1  ;;  %v2398_v29 = vadd.f32 %v2395_v61, %v2394_v41  ;;  %v3276_v41 = vld [vmem:[#allocation4 + $0x558] sm:$0xff]  ;;  %v3273_v61 = vld [vmem:[#allocation4 + $0x540] sm:$0xff] }
 0x68f   : > { %v2441_v49 = vadd.f32 %v5582_v34, %v5578_v23  ;;  %v2449_v9 = vmul.f32 %v5582_v34, %v5582_v34  ;;  %v2450_v0 = vadd.f32 %v2447_v43, %v2446_v54  ;;  %v2678_v43 = vmul.f32 0.0, %v5442_v48  ;;  %v3397_v54 = vld [vmem:[#allocation4 + $0x590] sm:$0xff] }
 0x690   : > { %2390 = vadd.xlane.f32.xlu1 %v2389_v2  ;;  %v2401_v25 = vadd.f32 %v2397_v51, %v2396_v33  ;;  %v3392_v2 = vld [vmem:[#allocation4 + $0x568] sm:$0xff]  ;;  %v3393_v51 = vld [vmem:[#allocation4 + $0x570] sm:$0xff] }
 0x691   : > { %v2453_v14 = vadd.f32 %v2449_v9, %v2448_v52  ;;  %v3275_v52 = vld [vmem:[#allocation4 + $0x550] sm:$0xff]  ;;  %v2549_v9 = vmul.f32 0.0, %v5418_v7 }
 0x692   : > { %2439 = vadd.xlane.f32.xlu0 %v2438_v59  ;;  %v3398_v59 = vld [vmem:[#allocation4 + $0x598] sm:$0xff] }
 0x694   : > { %2399 = vadd.xlane.f32.xlu1 %v2398_v29  ;;  %v2673_v29 = vmul.f32 0.0, %v5434_v18 }
 0x696   : > { %2442 = vadd.xlane.f32.xlu0 %v2441_v49  ;;  %v3396_v49 = vld [vmem:[#allocation4 + $0x588] sm:$0xff] }
 0x698   : > { %2451 = vadd.xlane.f32.xlu1 %v2450_v0  ;;  %v3391_v0 = vld [vmem:[#allocation4 + $0x560] sm:$0xff] }
 0x69a   : > { %2402 = vadd.xlane.f32.xlu0 %v2401_v25  ;;  %v3395_v25 = vld [vmem:[#allocation4 + $0x580] sm:$0xff] }
 0x69e   : > { %2454 = vadd.xlane.f32.xlu0 %v2453_v14  ;;  %v2923_v14 = vmul.f32 0.0, %v5479_v55  ;;  %v2795_v55 = vmul.f32 0.0, %v5450_v3 }
 0x6a9   : > { %3295 = vrot.lane.b32.xlu1 %v3274_v38, %s4486_s18  ;;  %v4202_v38 = vpack.i.bf16 %v2678_v43, %v2673_v29 }
 0x6ad   : > { %3299 = vrot.lane.b32.xlu1 %v3276_v41, %s4486_s18  ;;  %v2554_v41 = vmul.f32 0.0, %v5424_v45 }
 0x6b1   : > { %3409 = vrot.lane.b32.xlu1 %v3392_v2, %s4487_s19  ;;  %v4197_v2 = vpack.i.bf16 %v2554_v41, %v2549_v9 }
 0x6b4   : > { %3293 = vrot.lane.b32.xlu0 %v3273_v61, %s4486_s18  ;;  %v2800_v61 = vmul.f32 0.0, %v5458_v16 }
 0x6b5   : > { %3413 = vrot.lane.b32.xlu1 %v3394_v20, %s4487_s19  ;;  %v2918_v20 = vmul.f32 0.0, %v5466_v26 }
 0x6b7   : > { %v4212_v33 = vpack.i.bf16 %v2923_v14, %v2918_v20 }
 0x6b8   : > { %3297 = vrot.lane.b32.xlu0 %v3275_v52, %s4486_s18  ;;  %v4207_v52 = vpack.i.bf16 %v2800_v61, %v2795_v55 }
 0x6b9   : > { %3417 = vrot.lane.b32.xlu1 %v3396_v49, %s4487_s19  ;;  %v5612_v49 = vpop.permute.xlu0 %3285 }
 0x6ba   : > { %6301 = vst [vmem:[#allocation28_spill] sm:$0xff] %v5612_v49 }
 0x6bc   : > { %3407 = vrot.lane.b32.xlu0 %v3391_v0, %s4487_s19  ;;  %v5614_v0 = vpop.permute.xlu1 %3287 }
 0x6bd   : > { %3421 = vrot.lane.b32.xlu1 %v3398_v59, %s4487_s19  ;;  %6302 = vst [vmem:[#allocation29_spill] sm:$0xff] %v5614_v0  ;;  %v5616_v59 = vpop.permute.xlu0 %3289 }
 0x6c0   : > { %3411 = vrot.lane.b32.xlu0 %v3393_v51, %s4487_s19  ;;  %v5618_v29 = vpop.permute.xlu1 %3291 }
 0x6c1   : > { %4203 = vrot.lane.b32.xlu1 %v4202_v38, %s4486_s18  ;;  %6303 = vst [vmem:[#allocation30_spill] sm:$0xff] %v5618_v29 }
 0x6c4   : > { %3415 = vrot.lane.b32.xlu0 %v3395_v25, %s4487_s19 }
 0x6c5   : > { %4213 = vrot.lane.b32.xlu1 %v4212_v33, %s4489_s23 }
 0x6c8   : > { %3419 = vrot.lane.b32.xlu0 %v3397_v54, %s4487_s19 }
 0x6cc   : > { %4198 = vrot.lane.b32.xlu0 %v4197_v2, %s4487_s19 }
 0x6d0   : > { %4208 = vrot.lane.b32.xlu0 %v4207_v52, %s4485_s17 }
 0x71b   : > { %v2388_v43 = vpop.xlane.xlu0 %2387 }
 0x71c   : > { %v2392_v38 = vmul.f32 0.00390625, %v2388_v43 }
 0x71d   : > { %v2391_v51 = vpop.xlane.xlu1 %2390 }
 0x71e   : > { %v2406_v33 = vmul.f32 %v2392_v38, %v2392_v38  ;;  %v5620_v29 = vmul.f32 0.00390625, %v2391_v51 }
 0x71f   : > { %v2440_v20 = vpop.xlane.xlu0 %2439 }
 0x720   : > { %v2444_v25 = vmul.f32 0.00390625, %v2440_v20 }
 0x721   : > { %v2400_v14 = vpop.xlane.xlu1 %2399 }
 0x722   : > { %v2404_v54 = vmul.f32 0.00390625, %v2400_v14  ;;  %v2458_v2 = vmul.f32 %v2444_v25, %v2444_v25  ;;  %v2410_v14 = vsub.f32 %v5548_v58, %v2392_v38 }
 0x723   : > { %v2443_v9 = vpop.xlane.xlu0 %2442 }
 0x724   : > { %v2408_v41 = vsub.f32 %v2404_v54, %v2406_v33  ;;  %v5622_v43 = vmul.f32 0.00390625, %v2443_v9  ;;  %v2411_v33 = vsub.f32 %v5552_v62, %v2392_v38  ;;  %v2407_v54 = vmul.f32 %v5620_v29, %v5620_v29 }
 0x725   : > { %v2452_v55 = vpop.xlane.xlu1 %2451  ;;  %v2462_v9 = vsub.f32 %v5560_v28, %v2444_v25 }
 0x726   : > { %v2414_v61 = vadd.f32 1e-05, %v2408_v41  ;;  %v2456_v52 = vmul.f32 0.00390625, %v2452_v55 }
 0x727   : > { %v2403_v48 = vpop.xlane.xlu0 %2402 }
 0x728   : > { %4409 = vrsqrt.f32 %v2414_v61  ;;  %v2460_v16 = vsub.f32 %v2456_v52, %v2458_v2  ;;  %v2405_v37 = vmul.f32 0.00390625, %v2403_v48  ;;  %v2459_v2 = vmul.f32 %v5622_v43, %v5622_v43 }
 0x729   : > { %v2463_v48 = vsub.f32 %v5568_v46, %v2444_v25  ;;  %v2534_v46 = vsel %vm2532_vm9, %v5420_v47, %v5422_v60 }
 0x72a   : > { %v2466_v45 = vadd.f32 1e-05, %v2460_v16  ;;  %v2409_v51 = vsub.f32 %v2405_v37, %v2407_v54  ;;  %v2533_v37 = vsel %vm2532_vm9, %v5418_v7, %v5420_v47  ;;  %v2535_v47 = vsel %vm2532_vm9, %v5422_v60, %v5426_v57 }
 0x72b   : > { %v2455_v24 = vpop.xlane.xlu0 %2454  ;;  %v2658_v60 = vsel %vm2656_vm14, %v5436_v1, %v5438_v42 }
 0x72c   : > { %4411 = vrsqrt.f32 %v2466_v45  ;;  %v2457_v20 = vmul.f32 0.00390625, %v2455_v24  ;;  %v2415_v62 = vadd.f32 1e-05, %v2409_v51 }
 0x72e   : > { %v2461_v55 = vsub.f32 %v2457_v20, %v2459_v2  ;;  %4413 = vrsqrt.f32 %v2415_v62  ;;  %v2657_v2 = vsel %vm2656_vm14, %v5434_v18, %v5436_v1  ;;  %v2780_v18 = vsel %vm2589_vm15, %v5452_v6, %v5454_v31 }
 0x72f   : > { %v5648_v7 = vpop.permute.xlu0 %3293 }
 0x730   : > { %v2467_v49 = vadd.f32 1e-05, %v2461_v55 }
 0x732   : > { %v4410_v41 = vpop.eup %4409  ;;  %4415 = vrsqrt.f32 %v2467_v49  ;;  %v2659_v49 = vsel %vm2656_vm14, %v5438_v42, %v5440_v10 }
 0x733   : > { %v2418_v16 = vmul.f32 %v4410_v41, %v2410_v14  ;;  %v2419_v45 = vmul.f32 %v4410_v41, %v2411_v33 }
 0x735   : > { %v2426_v24 = vmul.f32 0.1, %v2418_v16  ;;  %v2427_v58 = vmul.f32 0.1, %v2419_v45  ;;  %vm2422_vm10 = vcmp.ge.f32.partialorder %v2418_v16, 0.0  ;;  %vm2423_vm11 = vcmp.ge.f32.partialorder %v2419_v45, 0.0 }
 0x736   : > { %v4412_v61 = vpop.eup %4411 }
 0x737   : > { %v2470_v38 = vmul.f32 %v4412_v61, %v2462_v9  ;;  %v2471_v52 = vmul.f32 %v4412_v61, %v2463_v48  ;;  %v5632_v19 = vsel %vm2422_vm10, %v2418_v16, %v2426_v24  ;;  %v5634_v0 = vsel %vm2423_vm11, %v2419_v45, %v2427_v58  ;;  %v5659_v16 = vpop.permute.xlu1 %3295 }
 0x738   : > { %v2550_v20 = vmul.f32 %v2533_v37, %v5632_v19  ;;  %v2551_v14 = vmul.f32 %v2534_v46, %v5634_v0  ;;  %v2779_v61 = vsel %vm2589_vm15, %v5450_v3, %v5452_v6  ;;  %v2781_v9 = vsel %vm2589_vm15, %v5454_v31, %v5456_v30  ;;  %v4414_v48 = vpop.eup %4413 }
 0x739   : > { %v2478_v28 = vmul.f32 0.1, %v2470_v38  ;;  %v2479_v25 = vmul.f32 0.1, %v2471_v52  ;;  %vm2474_vm12 = vcmp.ge.f32.partialorder %v2470_v38, 0.0  ;;  %vm2475_vm13 = vcmp.ge.f32.partialorder %v2471_v52, 0.0 }
 0x73a   : > { %v4217_v41 = vpack.i.bf16 %v2551_v14, %v2550_v20  ;;  %v2796_v58 = vmul.f32 %v2779_v61, %v5632_v19  ;;  %v2797_v1 = vmul.f32 %v2780_v18, %v5634_v0  ;;  %v2902_v3 = vsel %vm2901_vm7, %v5466_v26, %v5468_v8 }
 0x73b   : > { %v5644_v33 = vsel %vm2474_vm12, %v2470_v38, %v2478_v28  ;;  %v5646_v54 = vsel %vm2475_vm13, %v2471_v52, %v2479_v25  ;;  %v2412_v6 = vsub.f32 %v5558_v35, %v5620_v29  ;;  %v2413_v31 = vsub.f32 %v5564_v50, %v5620_v29  ;;  %v5694_v52 = vpop.permute.xlu0 %3297 }
 0x73c   : > { %4218 = vrot.lane.b32.xlu0 %v4217_v41, %s4487_s19  ;;  %v2676_v45 = vmul.f32 %v2659_v49, %v5644_v33  ;;  %v2677_v51 = vmul.f32 %v5440_v10, %v5646_v54  ;;  %v2552_v55 = vmul.f32 %v2535_v47, %v5644_v33  ;;  %v2553_v24 = vmul.f32 %v5426_v57, %v5646_v54  ;;  %v4416_v42 = vpop.eup %4415 }
 0x73d   : > { %v2674_v62 = vmul.f32 %v2657_v2, %v5632_v19  ;;  %v2464_v57 = vsub.f32 %v5578_v23, %v5622_v43  ;;  %v2465_v38 = vsub.f32 %v5582_v34, %v5622_v43  ;;  %v2675_v26 = vmul.f32 %v2658_v60, %v5634_v0  ;;  %v5704_v34 = vpop.permute.xlu1 %3299 }
 0x73e   : > { %v4232_v10 = vpack.i.bf16 %v2677_v51, %v2676_v45  ;;  %v4222_v37 = vpack.i.bf16 %v2553_v24, %v2552_v55  ;;  %v2904_v8 = vsel %vm2901_vm7, %v5470_v12, %v5477_v13  ;;  %v3057_v35 = vsel %vm2958_vm8, %v5493_v32, %v5495_v56 }
 0x73f   : > { %v2420_v50 = vmul.f32 %v4414_v48, %v2412_v6  ;;  %v2421_v23 = vmul.f32 %v4414_v48, %v2413_v31  ;;  %v2472_v29 = vmul.f32 %v4416_v42, %v2464_v57  ;;  %v2473_v46 = vmul.f32 %v4416_v42, %v2465_v38  ;;  %v5724_v45 = vpop.permute.xlu0 %3407  ;;  %v6304_v38 = vld [vmem:[#allocation29_spill] sm:$0xff] }
 0x740   : > { %4233 = vrot.lane.b32.xlu0 %v4232_v10, %s4486_s18  ;;  %4223 = vrot.lane.b32.xlu1 %v4222_v37, %s4487_s19  ;;  %v4237_v43 = vpack.i.bf16 %v2797_v1, %v2796_v58  ;;  %v2921_v28 = vmul.f32 %v2904_v8, %v5644_v33  ;;  %v4227_v25 = vpack.i.bf16 %v2675_v26, %v2674_v62  ;;  %v3077_v2 = vmul.f32 0.0, %v5501_v63  ;;  %v6306_v26 = vld [vmem:[#allocation28_spill] sm:$0xff] }
 0x741   : > { %v2922_v20 = vmul.f32 %v5477_v13, %v5646_v54  ;;  %v2798_v12 = vmul.f32 %v2781_v9, %v5644_v33  ;;  %v2799_v56 = vmul.f32 %v5456_v30, %v5646_v54  ;;  %v3074_v14 = vmul.f32 %v3057_v35, %v5634_v0  ;;  %v3410_v9 = vpop.permute.xlu1 %3409 }
 0x742   : > { %v3075_v41 = vmul.f32 %v5499_v36, %v5644_v33  ;;  %v2919_v47 = vmul.f32 %v2902_v3, %v5632_v19  ;;  %v2920_v49 = vmul.f32 %v5475_v4, %v5634_v0  ;;  %v3179_v13 = vsel %vm2532_vm9, %v5517_v53, %v5523_v40 }
 0x743   : > { %vm2424_vm0 = vcmp.ge.f32.partialorder %v2420_v50, 0.0  ;;  %v2428_v30 = vmul.f32 0.1, %v2420_v50  ;;  %v4252_v51 = vpack.i.bf16 %v2922_v20, %v2921_v28  ;;  %v3076_v60 = vmul.f32 %v5507_v27, %v5646_v54  ;;  %v3412_v31 = vpop.permute.xlu0 %3411 }
 0x744   : > { %4238 = vrot.lane.b32.xlu0 %v4237_v43, %s4485_s17  ;;  %4228 = vrot.lane.b32.xlu1 %v4227_v25, %s4486_s18  ;;  %v4257_v55 = vpack.i.bf16 %v3075_v41, %v3074_v14  ;;  %v4247_v36 = vpack.i.bf16 %v2920_v49, %v2919_v47  ;;  %vm2425_vm1 = vcmp.ge.f32.partialorder %v2421_v23, 0.0  ;;  %v2429_v4 = vmul.f32 0.1, %v2421_v23  ;;  %v6308_v43 = vld [vmem:[#allocation23_spill] sm:$0xff]  ;;  %v6309_v25 = vld [vmem:[#allocation24_spill] sm:$0xff]  ;;  %v6310_v41 = vld [vmem:[#allocation25_spill] sm:$0xff] }
 0x745   : > { %v3196_v63 = vmul.f32 %v3179_v13, %v5634_v0  ;;  %v3197_v61 = vmul.f32 %v5530_v22, %v5644_v33  ;;  %v2480_v40 = vmul.f32 0.1, %v2472_v29  ;;  %v2481_v18 = vmul.f32 0.1, %v2473_v46  ;;  %v3414_v35 = vpop.permute.xlu1 %3413  ;;  %v6311_v49 = vld [vmem:[#allocation26_spill] sm:$0xff] }
 0x746   : > { %v4242_v48 = vpack.i.bf16 %v2799_v56, %v2798_v12  ;;  %v4262_v10 = vpack.i.bf16 %v3077_v2, %v3076_v60  ;;  %v3181_v24 = vsel %vm2532_vm9, %v5525_v15, %v5532_v5  ;;  %vm2476_vm2 = vcmp.ge.f32.partialorder %v2472_v29, 0.0 }
 0x747   : > { %vm2477_vm3 = vcmp.ge.f32.partialorder %v2473_v46, 0.0  ;;  %v4267_v27 = vpack.i.bf16 %v3197_v61, %v3196_v63  ;;  %v5737_v58 = vsel %vm2424_vm0, %v2420_v50, %v2428_v30  ;;  %v3198_v22 = vmul.f32 %v3181_v24, %v5646_v54  ;;  %v6313_v61 = vld [vmem:[#allocation30_spill] sm:$0xff]  ;;  %v6314_v24 = vld [vmem:[#allocation8_spill] sm:$0xff] }
 0x748   : > { %4253 = vrot.lane.b32.xlu0 %v4252_v51, %s4489_s23  ;;  %4243 = vrot.lane.b32.xlu1 %v4242_v48, %s4485_s17  ;;  %v5742_v1 = vsel %vm2425_vm1, %v2421_v23, %v2429_v4  ;;  %v3060_v42 = vsel %vm2958_vm8, %v5503_v11, %v5509_v44  ;;  %v3199_v3 = vmul.f32 0.0, %v5532_v5  ;;  %v5748_v15 = vsel %vm2476_vm2, %v2472_v29, %v2480_v40  ;;  %v6305_v5 = vld [vmem:[#allocation20_spill] sm:$0xff]  ;;  %v6312_v51 = vld [vmem:[#allocation27_spill] sm:$0xff] }
 0x749   : > { %v5750_v6 = vsel %vm2477_vm3, %v2473_v46, %v2481_v18  ;;  %v5754_v62 = vmul.f32 0.0, %v5515_v39  ;;  %v3182_v57 = vsel %vm2532_vm9, %v5534_v17, %v5536_v21  ;;  %v3302_v44 = vsel %vm2656_vm14, %v6304_v38, %v5616_v59  ;;  %v6307_v21 = vld [vmem:[#allocation21_spill] sm:$0xff] }
 0x74a   : > { %v5764_v37 = vmul.f32 %v6305_v5, %v5737_v58  ;;  %v3301_v8 = vsel %vm2656_vm14, %v6306_v26, %v6304_v38  ;;  %v4272_v39 = vpack.i.bf16 %v3199_v3, %v3198_v22  ;;  %v3319_v50 = vmul.f32 %v3302_v44, %v5644_v33  ;;  %v6315_v22 = vld [vmem:[#allocation7_spill] sm:$0xff] }
 0x74b   : > { %v5773_v23 = vmul.f32 %v6307_v21, %v5742_v1  ;;  %v3425_v29 = vsel %vm2589_vm15, %v3412_v31, %v3414_v35  ;;  %v5777_v46 = vmul.f32 %v3060_v42, %v5742_v1  ;;  %v5781_v28 = vmul.f32 %v6308_v43, %v5748_v15  ;;  %v6318_v21 = vld [vmem:[#allocation13_spill] sm:$0xff] }
 0x74c   : > { %4258 = vrot.lane.b32.xlu0 %v4257_v55, %s4488_s20  ;;  %4248 = vrot.lane.b32.xlu1 %v4247_v36, %s4489_s23  ;;  %v5785_v20 = vmul.f32 %v6309_v25, %v5750_v6  ;;  %v3318_v12 = vmul.f32 %v3301_v8, %v5634_v0  ;;  %v5792_v14 = vmul.f32 %v3182_v57, %v5742_v1  ;;  %v5799_v2 = vmul.f32 0.0, %v6311_v49 }
 0x74d   : > { %v4327_v56 = vpack.i.bf16 %v5773_v23, %v5764_v37  ;;  %v5796_v47 = vmul.f32 %v6310_v41, %v5748_v15  ;;  %v4337_v13 = vpack.i.bf16 %v5781_v28, %v5777_v46  ;;  %v5807_v55 = vmul.f32 %v6312_v51, %v5750_v6 }
 0x74e   : > { %v4342_v30 = vpack.i.bf16 %v5754_v62, %v5785_v20  ;;  %v3443_v36 = vmul.f32 0.0, %v3414_v35  ;;  %v3442_v60 = vmul.f32 %v3425_v29, %v5646_v54  ;;  %v4277_v4 = vpack.i.bf16 %v3319_v50, %v3318_v12  ;;  %v6317_v50 = vld [vmem:[#allocation14_spill] sm:$0xff] }
 0x74f   : > { %v4352_v63 = vpack.i.bf16 %v5796_v47, %v5792_v14  ;;  %v3303_v40 = vsel %vm2656_vm14, %v5616_v59, %v6313_v61  ;;  %v4357_v18 = vpack.i.bf16 %v5799_v2, %v5807_v55  ;;  %v2536_v42 = vsel %vm2532_vm9, %v6315_v22, %v6314_v24 }
 0x750   : > { %4273 = vrot.lane.b32.xlu0 %v4272_v39, %s4487_s19  ;;  %4263 = vrot.lane.b32.xlu1 %v4262_v10, %s4488_s20  ;;  %v3320_v48 = vmul.f32 %v3303_v40, %v5646_v54  ;;  %v6316_v10 = vld [vmem:[#allocation9_spill] sm:$0xff]  ;;  %v3424_v57 = vsel %vm2589_vm15, %v3410_v9, %v3412_v31  ;;  %v3321_v38 = vmul.f32 0.0, %v6313_v61  ;;  %v4292_v59 = vpack.i.bf16 %v3443_v36, %v3442_v60  ;;  %v6320_v36 = vld [vmem:[#allocation16_spill] sm:$0xff]  ;;  %v6321_v60 = vld [vmem:[#allocation15_spill] sm:$0xff] }
 0x751   : > { %v2537_v3 = vsel %vm2532_vm9, %v6314_v24, %v6316_v10  ;;  %v2555_v44 = vmul.f32 %v2536_v42, %v5737_v58  ;;  %v3423_v8 = vsel %vm2589_vm15, %v5724_v45, %v3410_v9  ;;  %v3441_v35 = vmul.f32 %v3424_v57, %v5644_v33  ;;  %v6319_v9 = vld [vmem:[#allocation10_spill] sm:$0xff]  ;;  %v6322_v61 = vld [vmem:[#allocation17_spill] sm:$0xff]  ;;  %v6323_v42 = vld [vmem:[#allocation12_spill] sm:$0xff] }
 0x752   : > { %v2556_v5 = vmul.f32 %v2537_v3, %v5742_v1  ;;  %v4282_v39 = vpack.i.bf16 %v3321_v38, %v3320_v48  ;;  %v2662_v31 = vsel %vm2656_vm14, %v6318_v21, %v6317_v50  ;;  %v3440_v29 = vmul.f32 %v3423_v8, %v5634_v0  ;;  %v6326_v8 = vld [vmem:[#allocation19_spill] sm:$0xff] }
 0x753   : > { %v2681_v43 = vmul.f32 %v2662_v31, %v5748_v15  ;;  %v2682_v25 = vmul.f32 %v6317_v50, %v5750_v6  ;;  %v2538_v12 = vsel %vm2532_vm9, %v6316_v10, %v6319_v9  ;;  %v2558_v51 = vmul.f32 %v6319_v9, %v5750_v6  ;;  %v6324_v10 = vld [vmem:[#allocation11_spill] sm:$0xff] }
 0x754   : > { %4278 = vrot.lane.b32.xlu0 %v4277_v4, %s4486_s18  ;;  %4268 = vrot.lane.b32.xlu1 %v4267_v27, %s4487_s19  ;;  %v4297_v27 = vpack.i.bf16 %v2556_v5, %v2555_v44  ;;  %v4287_v41 = vpack.i.bf16 %v3441_v35, %v3440_v29  ;;  %v2557_v49 = vmul.f32 %v2538_v12, %v5748_v15  ;;  %v6325_v5 = vld [vmem:[#allocation22_spill] sm:$0xff] }
 0x755   : > { %v2782_v4 = vsel %vm2589_vm15, %v6321_v60, %v6320_v36  ;;  %v2783_v40 = vsel %vm2589_vm15, %v6320_v36, %v6322_v61  ;;  %v4312_v48 = vpack.i.bf16 %v2682_v25, %v2681_v43  ;;  %v2660_v3 = vsel %vm2656_vm14, %v6324_v10, %v6323_v42 }
 0x756   : > { %v2801_v24 = vmul.f32 %v2782_v4, %v5737_v58  ;;  %v2802_v22 = vmul.f32 %v2783_v40, %v5742_v1  ;;  %v2661_v57 = vsel %vm2656_vm14, %v6323_v42, %v6318_v21  ;;  %v4302_v38 = vpack.i.bf16 %v2558_v51, %v2557_v49  ;;  %v6327_v21 = vld [vmem:[#allocation18_spill] sm:$0xff]  ;;  %v3416_v51 = vpop.permute.xlu0 %3415 }
 0x757   : > { %v2680_v44 = vmul.f32 %v2661_v57, %v5742_v1  ;;  %v2907_v35 = vsel %vm2901_vm7, %v6326_v8, %v6325_v5  ;;  %v2927_v31 = vmul.f32 %v6325_v5, %v5750_v6  ;;  %v2784_v29 = vsel %vm2589_vm15, %v6322_v61, %v6327_v21  ;;  %v4398_v61 = vld [vmem:[%s6253_s5 + $0x4] ss:$8 sps:$4 sm:$0xff]  }
 0x758   : > { %4293 = vrot.lane.b32.xlu0 %v4292_v59, %s4485_s17  ;;  %4283 = vrot.lane.b32.xlu1 %v4282_v39, %s4486_s18  ;;  %v2679_v59 = vmul.f32 %v2660_v3, %v5737_v58  ;;  %v4317_v39 = vpack.i.bf16 %v2802_v22, %v2801_v24  ;;  %v2926_v50 = vmul.f32 %v2907_v35, %v5748_v15 }
 0x759   : > { %v2803_v43 = vmul.f32 %v2784_v29, %v5748_v15  ;;  %v2804_v25 = vmul.f32 %v6327_v21, %v5750_v6  ;;  %v3073_v49 = vmul.f32 %v5493_v32, %v5632_v19  ;;  %v3305_v60 = vsel %vm2656_vm14, %v5659_v16, %v5694_v52  ;;  %3908 = vmatprep.mubr.msk.bf16.mxu0 %vm393_vm6, %v4398_v61 }
 0x75a   : > { %v4332_v9 = vpack.i.bf16 %v2927_v31, %v2926_v50  ;;  %v3304_v46 = vsel %vm2656_vm14, %v5648_v7, %v5659_v16  ;;  %v3324_v32 = vmul.f32 %v3305_v60, %v5748_v15  ;;  %v3420_v23 = vpop.permute.xlu0 %3419  ;;  %v3200_v28 = vmul.f32 %v5534_v17, %v5737_v58  ;;  %3909 = vmatprep.mubr.msk.bf16.mxu1 %vm393_vm6, %v4398_v61 }
 0x75b   : > { %v4322_v12 = vpack.i.bf16 %v2804_v25, %v2803_v43  ;;  %v3323_v37 = vmul.f32 %v3304_v46, %v5742_v1  ;;  %v3306_v16 = vsel %vm2656_vm14, %v5694_v52, %v5704_v34  ;;  %v3195_v2 = vmul.f32 %v5517_v53, %v5632_v19  ;;  %v2998_v43 = vld [vmem:[#allocation4 + $0x498] sm:$0xff]  ;;  %v2995_v25 = vld [vmem:[#allocation4 + $0x480] sm:$0xff] }
 0x75c   : > { %4298 = vrot.lane.b32.xlu0 %v4297_v27, %s4487_s19  ;;  %4288 = vrot.lane.b32.xlu1 %v4287_v41, %s4485_s17  ;;  %v4307_v27 = vpack.i.bf16 %v2680_v44, %v2679_v59  ;;  %v3078_v41 = vmul.f32 %v5503_v11, %v5737_v58  ;;  %v3418_v11 = vpop.permute.xlu1 %3417  ;;  %v3326_v17 = vmul.f32 0.0, %v5704_v34  ;;  %v3317_v52 = vmul.f32 %v6306_v26, %v5632_v19 }
 0x75d   : > { %v4367_v62 = vpack.i.bf16 %v3324_v32, %v3323_v37  ;;  %v3427_v55 = vsel %vm2589_vm15, %v3418_v11, %v3420_v23  ;;  %v3426_v53 = vsel %vm2589_vm15, %v3416_v51, %v3418_v11  ;;  %v3444_v40 = vmul.f32 %v3416_v51, %v5737_v58  ;;  %v2993_v32 = vld [vmem:[#allocation4 + $0x470] sm:$0xff] }
 0x75e   : > { %v4347_v36 = vpack.i.bf16 %v3078_v41, %v3073_v49  ;;  %v3446_v34 = vmul.f32 %v3427_v55, %v5748_v15  ;;  %v3445_v26 = vmul.f32 %v3426_v53, %v5742_v1  ;;  %v3439_v24 = vmul.f32 %v5724_v45, %v5632_v19  ;;  %v4199_v42 = vpop.permute.xlu0 %4198  ;;  %v2994_v41 = vld [vmem:[#allocation4 + $0x478] sm:$0xff]  ;;  %v2991_v49 = vld [vmem:[#allocation4 + $0x460] sm:$0xff] }
 0x75f   : > { %v5991_v11 = vmul.f32 %v2998_v43, %v5750_v6  ;;  %v5994_v46 = vmul.f32 %v2995_v25, %v5737_v58  ;;  %v6014_v55 = vmul.f32 %v2993_v32, %v5644_v33 }
 0x760   : > { %4313 = vrot.lane.b32.xlu0 %v4312_v48, %s4486_s18  ;;  %4303 = vrot.lane.b32.xlu1 %v4302_v38, %s4487_s19  ;;  %v3422_v20 = vpop.permute.xlu1 %3421  ;;  %v4382_v48 = vpack.i.bf16 %v3446_v34, %v3445_v26  ;;  %v4392_v22 = vpack.i.bf16 %v3444_v40, %v3439_v24 }
 0x761   : > { %v3448_v14 = vmul.f32 0.0, %v3422_v20 }
 0x762   : > { %v5954_v3 = vpop.permute.xlu0 %4208 }
 0x764   : > { %4318 = vrot.lane.b32.xlu0 %v4317_v39, %s4485_s17  ;;  %4308 = vrot.lane.b32.xlu1 %v4307_v27, %s4486_s18  ;;  %v5952_v10 = vpop.permute.xlu1 %4203  ;;  %v2996_v27 = vld [vmem:[#allocation4 + $0x488] sm:$0xff] }
 0x765   : > { %v4206_v51 = vunpack.i.h.bf16 %v5952_v10  ;;  %v5988_v60 = vmul.f32 %v2996_v27, %v5742_v1  ;;  %v4205_v37 = vunpack.i.l.bf16 %v5952_v10 }
 0x768   : > { %4333 = vrot.lane.b32.xlu0 %v4332_v9, %s4489_s23  ;;  %4323 = vrot.lane.b32.xlu1 %v4322_v12, %s4485_s17  ;;  %v5958_v38 = vpop.permute.xlu1 %4213  ;;  %v2992_v12 = vld [vmem:[#allocation4 + $0x468] sm:$0xff] }
 0x76c   : > { %4338 = vrot.lane.b32.xlu0 %v4337_v13, %s4488_s20  ;;  %4328 = vrot.lane.b32.xlu1 %v4327_v56, %s4489_s23  ;;  %v3322_v56 = vmul.f32 %v5648_v7, %v5737_v58  ;;  %v3428_v13 = vsel %vm2589_vm15, %v3420_v23, %v3422_v20  ;;  %v4362_v7 = vpack.i.bf16 %v3200_v28, %v3195_v2  ;;  %v4201_v28 = vunpack.i.h.bf16 %v4199_v42 }
 0x76d   : > { %v3447_v47 = vmul.f32 %v3428_v13, %v5750_v6  ;;  %v6002_v2 = vmul.f32 %v2992_v12, %v5634_v0  ;;  %v6005_v13 = vmul.f32 %v2994_v41, %v5646_v54 }
 0x76f   : > { %v4387_v4 = vpack.i.bf16 %v3448_v14, %v3447_v47 }
 0x770   : > { %4348 = vrot.lane.b32.xlu0 %v4347_v36, %s4488_s20  ;;  %4343 = vrot.lane.b32.xlu1 %v4342_v30, %s4488_s20  ;;  %v3325_v30 = vmul.f32 %v3306_v16, %v5750_v6  ;;  %v4200_v16 = vunpack.i.l.bf16 %v4199_v42 }
 0x774   : > { %4358 = vrot.lane.b32.xlu0 %v4357_v18, %s4487_s19  ;;  %4353 = vrot.lane.b32.xlu1 %v4352_v63, %s4487_s19  ;;  %v4377_v18 = vpack.i.bf16 %v3322_v56, %v3317_v52  ;;  %v4372_v63 = vpack.i.bf16 %v3326_v17, %v3325_v30  ;;  %v2997_v56 = vld [vmem:[#allocation4 + $0x490] sm:$0xff]  ;;  %v6008_v17 = vmul.f32 %v2991_v49, %v5632_v19  ;;  %v4210_v52 = vunpack.i.l.bf16 %v5954_v3 }
 0x778   : > { %4368 = vrot.lane.b32.xlu0 %v4367_v62, %s4486_s18  ;;  %4363 = vrot.lane.b32.xlu1 %v4362_v7, %s4487_s19  ;;  %v4211_v62 = vunpack.i.h.bf16 %v5954_v3 }
 0x77c   : > { %4378 = vrot.lane.b32.xlu0 %v4377_v18, %s4486_s18  ;;  %4373 = vrot.lane.b32.xlu1 %v4372_v63, %s4486_s18  ;;  %v6023_v63 = vmul.f32 %v2997_v56, %v5748_v15 }
 0x780   : > { %4388 = vrot.lane.b32.xlu0 %v4387_v4, %s4485_s17  ;;  %4383 = vrot.lane.b32.xlu1 %v4382_v48, %s4485_s17 }
 0x784   : > { %4393 = vrot.lane.b32.xlu1 %v4392_v22, %s4485_s17 }
 0x7ae   : > { %v5956_v57 = vpop.permute.xlu0 %4218 }
 0x7af   : > { %v4221_v30 = vunpack.i.h.bf16 %v5956_v57  ;;  %v4220_v7 = vunpack.i.l.bf16 %v5956_v57 }
 0x7b1   : > { %v2590_v57 = vsel %vm2589_vm15, %v4200_v16, %v4220_v7  ;;  %v2591_v43 = vsel %vm2589_vm15, %v4220_v7, %v4221_v30 }
 0x7b2   : > { %v5960_v59 = vpop.permute.xlu0 %4233  ;;  %v5962_v44 = vpop.permute.xlu1 %4223 }
 0x7b3   : > { %v4236_v34 = vunpack.i.h.bf16 %v5960_v59  ;;  %v4235_v26 = vunpack.i.l.bf16 %v5960_v59  ;;  %v4226_v40 = vunpack.i.h.bf16 %v5962_v44  ;;  %v4225_v48 = vunpack.i.l.bf16 %v5962_v44 }
 0x7b5   : > { %v2593_v53 = vsel %vm2589_vm15, %v4225_v48, %v4226_v40 }
 0x7b6   : > { %v5964_v5 = vpop.permute.xlu0 %4238  ;;  %v5966_v45 = vpop.permute.xlu1 %4228 }
 0x7b7   : > { %v4241_v24 = vunpack.i.h.bf16 %v5964_v5  ;;  %v4240_v22 = vunpack.i.l.bf16 %v5964_v5  ;;  %v4231_v25 = vunpack.i.h.bf16 %v5966_v45  ;;  %v4230_v12 = vunpack.i.l.bf16 %v5966_v45 }
 0x7b9   : > { %v6044_v7 = vsel %vm2532_vm9, %v4210_v52, %v4240_v22  ;;  %v6050_v45 = vsel %vm2532_vm9, %v4240_v22, %v4241_v24  ;;  %v2713_v52 = vsel %vm2656_vm14, %v4205_v37, %v4230_v12  ;;  %v2714_v40 = vsel %vm2656_vm14, %v4230_v12, %v4231_v25 }
 0x7ba   : > { %v5968_v8 = vpop.permute.xlu0 %4253  ;;  %v5970_v35 = vpop.permute.xlu1 %4243 }
 0x7be   : > { %v5972_v39 = vpop.permute.xlu0 %4258  ;;  %v5974_v50 = vpop.permute.xlu1 %4248 }
 0x7bf   : > { %v4261_v37 = vunpack.i.h.bf16 %v5972_v39 }
 0x7c2   : > { %v5976_v31 = vpop.permute.xlu0 %4273  ;;  %v5978_v21 = vpop.permute.xlu1 %4263 }
 0x7c6   : > { %v5980_v29 = vpop.permute.xlu0 %4278  ;;  %v5982_v9 = vpop.permute.xlu1 %4268 }
 0x7ca   : > { %v5985_v36 = vpop.permute.xlu0 %4293  ;;  %v5999_v20 = vpop.permute.xlu1 %4283 }
 0x7ce   : > { %v4299_v18 = vpop.permute.xlu0 %4298  ;;  %v6031_v42 = vpop.permute.xlu1 %4288 }
 0x7cf   : > { %v4301_v4 = vunpack.i.h.bf16 %v4299_v18  ;;  %v4300_v61 = vunpack.i.l.bf16 %v4299_v18  ;;  %v2716_v18 = vsel %vm2656_vm14, %v4235_v26, %v4236_v34  ;;  %v4255_v34 = vunpack.i.l.bf16 %v5968_v8 }
 0x7d1   : > { %v2594_v27 = vsel %vm2589_vm15, %v4201_v28, %v4300_v61  ;;  %v2595_v59 = vsel %vm2589_vm15, %v4300_v61, %v4301_v4  ;;  %v2592_v28 = vsel %vm2589_vm15, %v4221_v30, %v4225_v48  ;;  %v2715_v30 = vsel %vm2656_vm14, %v4231_v25, %v4235_v26 }
 0x7d2   : > { %v3575_v41 = vpack.c.bf16 %v2594_v27, %v2590_v57  ;;  %v4314_v44 = vpop.permute.xlu0 %4313  ;;  %v3576_v49 = vpack.c.bf16 %v2595_v59, %v2591_v43  ;;  %v4304_v61 = vpop.permute.xlu1 %4303  ;;  %v4256_v57 = vunpack.i.h.bf16 %v5968_v8  ;;  %v4246_v8 = vunpack.i.h.bf16 %v5970_v35 }
 0x7d3   : > { %v4316_v32 = vunpack.i.h.bf16 %v4314_v44  ;;  %v4315_v56 = vunpack.i.l.bf16 %v4314_v44  ;;  %v4306_v27 = vunpack.i.h.bf16 %v4304_v61  ;;  %v4305_v43 = vunpack.i.l.bf16 %v4304_v61 }
 0x7d4   : > { %3625 = vmatprep.subr.bf16.mxu0 %v3576_v49  ;;  %v4245_v61 = vunpack.i.l.bf16 %v5970_v35  ;;  %v4260_v25 = vunpack.i.l.bf16 %v5972_v39  ;;  %v6332_v39 = vpack.c.bf16 %v5994_v46, %v6008_v17 }
 0x7d5   : > { %3626 = vmatpush1.bf16.msra.mxu0 %v3575_v41  ;;  %v2720_v44 = vsel %vm2656_vm14, %v4315_v56, %v4316_v32  ;;  %v2596_v48 = vsel %vm2589_vm15, %v4301_v4, %v4305_v43  ;;  %v2597_v16 = vsel %vm2589_vm15, %v4305_v43, %v4306_v27  ;;  %v2962_v32 = vsel %vm2958_vm8, %v4255_v34, %v4256_v57 }
 0x7d6   : > { %v4319_v59 = vpop.permute.xlu0 %4318  ;;  %v3577_v41 = vpack.c.bf16 %v2596_v48, %v2592_v28  ;;  %v4309_v14 = vpop.permute.xlu1 %4308  ;;  %v3578_v26 = vpack.c.bf16 %v2597_v16, %v2593_v53  ;;  %v4251_v4 = vunpack.i.h.bf16 %v5974_v50  ;;  %v3582_v27 = vpack.c.bf16 %v2720_v44, %v2716_v18 }
 0x7d7   : > { %v4321_v22 = vunpack.i.h.bf16 %v4319_v59  ;;  %v4320_v49 = vunpack.i.l.bf16 %v4319_v59  ;;  %v4311_v47 = vunpack.i.h.bf16 %v4309_v14  ;;  %v4310_v23 = vunpack.i.l.bf16 %v4309_v14 }
 0x7d8   : > { %3668 = vmatprep.subr.bf16.mxu1 %v3578_v26  ;;  %v4250_v28 = vunpack.i.l.bf16 %v5974_v50  ;;  %v2837_v18 = vsel %vm2532_vm9, %v4241_v24, %v4245_v61  ;;  %v6088_v5 = vsel %vm2901_vm7, %v4260_v25, %v4261_v37  ;;  %v2961_v24 = vsel %vm2958_vm8, %v4251_v4, %v4255_v34 }
 0x7d9   : > { %v2840_v43 = vsel %vm2532_vm9, %v4320_v49, %v4321_v22  ;;  %v2719_v35 = vsel %vm2656_vm14, %v4311_v47, %v4315_v56  ;;  %v2717_v53 = vsel %vm2656_vm14, %v4206_v51, %v4310_v23  ;;  %3669 = vmatpush1.bf16.msra.mxu1 %v3577_v41  ;;  %v2718_v26 = vsel %vm2656_vm14, %v4310_v23, %v4311_v47 }
 0x7da   : > { %v4334_v12 = vpop.permute.xlu0 %4333  ;;  %v3579_v57 = vpack.c.bf16 %v2717_v53, %v2713_v52  ;;  %v3581_v59 = vpack.c.bf16 %v2719_v35, %v2715_v30  ;;  %v4324_v48 = vpop.permute.xlu1 %4323  ;;  %3670 = vmatprep.subr.bf16.mxu1 %v3582_v27  ;;  %v3580_v10 = vpack.c.bf16 %v2718_v26, %v2714_v40  ;;  %v2839_v51 = vsel %vm2532_vm9, %v4211_v62, %v4320_v49 }
 0x7db   : > { %v4336_v16 = vunpack.i.h.bf16 %v4334_v12  ;;  %v4335_v14 = vunpack.i.l.bf16 %v4334_v12  ;;  %v4326_v56 = vunpack.i.h.bf16 %v4324_v48  ;;  %v4325_v44 = vunpack.i.l.bf16 %v4324_v48 }
 0x7dc   : > { %v3584_v50 = vpack.c.bf16 %v2840_v43, %v6050_v45  ;;  %v2838_v30 = vsel %vm2532_vm9, %v4245_v61, %v4246_v8  ;;  %v4216_v23 = vunpack.i.h.bf16 %v5958_v38  ;;  %3627 = vmatprep.subr.bf16.mxu0 %v3580_v10  ;;  %v6328_v45 = vunpack.i.l.bf16 %v5958_v38 }
 0x7dd   : > { %v2841_v47 = vsel %vm2532_vm9, %v4321_v22, %v4325_v44  ;;  %3671 = vmatpush1.bf16.msra.mxu1 %v3581_v59  ;;  %v2842_v3 = vsel %vm2532_vm9, %v4325_v44, %v4326_v56  ;;  %v2966_v62 = vsel %vm2958_vm8, %v4335_v14, %v4336_v16  ;;  %3628 = vmatpush1.bf16.msra.mxu0 %v3579_v57  ;;  %v4276_v61 = vunpack.i.h.bf16 %v5976_v31 }
 0x7de   : > { %v6079_v41 = vpop.permute.xlu0 %4338  ;;  %v2959_v52 = vsel %vm2958_vm8, %v6328_v45, %v4250_v28  ;;  %v3585_v40 = vpack.c.bf16 %v2841_v47, %v2837_v18  ;;  %v4329_v49 = vpop.permute.xlu1 %4328  ;;  %v3586_v8 = vpack.c.bf16 %v2842_v3, %v2838_v30  ;;  %v4275_v22 = vunpack.i.l.bf16 %v5976_v31  ;;  %3629 = vmatprep.subr.bf16.mxu0 %v3584_v50 }
 0x7df   : > { %v4331_v12 = vunpack.i.h.bf16 %v4329_v49  ;;  %v4330_v27 = vunpack.i.l.bf16 %v4329_v49  ;;  %v4266_v43 = vunpack.i.h.bf16 %v5978_v21  ;;  %v3583_v35 = vpack.c.bf16 %v2839_v51, %v6044_v7 }
 0x7e0   : > { %3672 = vmatprep.subr.bf16.mxu1 %v3586_v8  ;;  %v3590_v38 = vpack.c.bf16 %v2966_v62, %v2962_v32  ;;  %v2960_v53 = vsel %vm2958_vm8, %v4250_v28, %v4251_v4  ;;  %v4265_v16 = vunpack.i.l.bf16 %v5978_v21  ;;  %v4281_v57 = vunpack.i.h.bf16 %v5980_v29 }
 0x7e1   : > { %v2965_v59 = vsel %vm2958_vm8, %v4331_v12, %v4335_v14  ;;  %v2963_v31 = vsel %vm2958_vm8, %v4216_v23, %v4330_v27  ;;  %3673 = vmatpush1.bf16.msra.mxu1 %v3585_v40  ;;  %v4280_v48 = vunpack.i.l.bf16 %v5980_v29  ;;  %v4341_v26 = vunpack.i.h.bf16 %v6079_v41  ;;  %3630 = vmatpush1.bf16.msra.mxu0 %v3583_v35 }
 0x7e2   : > { %v4349_v34 = vpop.permute.xlu0 %4348  ;;  %v3589_v18 = vpack.c.bf16 %v2965_v59, %v2961_v24  ;;  %v4344_v7 = vpop.permute.xlu1 %4343  ;;  %3674 = vmatprep.subr.bf16.mxu1 %v3590_v38  ;;  %v2964_v32 = vsel %vm2958_vm8, %v4330_v27, %v4331_v12  ;;  %v4340_v4 = vunpack.i.l.bf16 %v6079_v41  ;;  %v3587_v21 = vpack.c.bf16 %v2963_v31, %v2959_v52 }
 0x7e3   : > { %v4346_v28 = vunpack.i.h.bf16 %v4344_v7  ;;  %v4345_v56 = vunpack.i.l.bf16 %v4344_v7  ;;  %v4271_v14 = vunpack.i.h.bf16 %v5982_v9  ;;  %v4351_v44 = vunpack.i.h.bf16 %v4349_v34 }
 0x7e4   : > { %v3588_v10 = vpack.c.bf16 %v2964_v32, %v2960_v53  ;;  %v3238_v50 = vsel %vm2589_vm15, %v4275_v22, %v4276_v61  ;;  %v4350_v30 = vunpack.i.l.bf16 %v4349_v34  ;;  %v3115_v41 = vsel %vm2901_vm7, %v4261_v37, %v4265_v16 }
 0x7e5   : > { %3675 = vmatpush1.bf16.msra.mxu1 %v3589_v18  ;;  %v3120_v3 = vsel %vm2901_vm7, %v4345_v56, %v4346_v28  ;;  %v4270_v62 = vunpack.i.l.bf16 %v5982_v9  ;;  %v6329_v45 = vpack.c.bf16 %v5991_v11, %v6005_v13  ;;  %v3116_v52 = vsel %vm2901_vm7, %v4265_v16, %v4266_v43 }
 0x7e6   : > { %v4359_v51 = vpop.permute.xlu0 %4358  ;;  %3631 = vmatprep.subr.bf16.mxu0 %v3588_v10  ;;  %v4354_v24 = vpop.permute.xlu1 %4353  ;;  %v6127_v40 = vsel %vm2656_vm14, %v4280_v48, %v4281_v57  ;;  %v3119_v49 = vsel %vm2901_vm7, %v4341_v26, %v4345_v56  ;;  %v3118_v8 = vsel %vm2901_vm7, %v4340_v4, %v4341_v26  ;;  %v3237_v61 = vsel %vm2589_vm15, %v4271_v14, %v4275_v22 }
 0x7e7   : > { %v4361_v23 = vunpack.i.h.bf16 %v4359_v51  ;;  %v4360_v47 = vunpack.i.l.bf16 %v4359_v51  ;;  %3676 = vmatprep.subr.bf16.mxu1 %v6329_v45  ;;  %3632 = vmatpush1.bf16.msra.mxu0 %v3587_v21  ;;  %v4356_v37 = vunpack.i.h.bf16 %v4354_v24  ;;  %v4355_v9 = vunpack.i.l.bf16 %v4354_v24 }
 0x7e8   : > { %v4296_v11 = vunpack.i.h.bf16 %v5985_v36  ;;  %v4286_v13 = vunpack.i.h.bf16 %v5999_v20  ;;  %v6330_v12 = vpack.c.bf16 %v5988_v60, %v6002_v2  ;;  %v3598_v43 = vpack.c.bf16 %v3120_v3, %v3116_v52 }
 0x7e9   : > { %v4285_v35 = vunpack.i.l.bf16 %v5999_v20  ;;  %v3113_v34 = vsel %vm2901_vm7, %v4350_v30, %v4260_v25  ;;  %v3117_v38 = vsel %vm2901_vm7, %v4351_v44, %v4340_v4  ;;  %v6331_v22 = vpack.c.bf16 %v6023_v63, %v6014_v55 }
 0x7ea   : > { %3633 = vmatprep.subr.bf16.mxu0 %v6330_v12  ;;  %v4369_v27 = vpop.permute.xlu0 %4368  ;;  %v3242_v53 = vsel %vm2589_vm15, %v4360_v47, %v4361_v23  ;;  %v3597_v16 = vpack.c.bf16 %v3119_v49, %v3115_v41  ;;  %v3241_v60 = vsel %vm2589_vm15, %v4356_v37, %v4360_v47  ;;  %v4364_v59 = vpop.permute.xlu1 %4363  ;;  %v3596_v31 = vpack.c.bf16 %v3118_v8, %v6088_v5 }
 0x7eb   : > { %3677 = vmatpush1.bf16.msra.mxu1 %v6331_v22  ;;  %v4371_v2 = vunpack.i.h.bf16 %v4369_v27  ;;  %3634 = vmatpush1.bf16.msra.mxu0 %v6332_v39  ;;  %v4370_v20 = vunpack.i.l.bf16 %v4369_v27  ;;  %v4366_v25 = vunpack.i.h.bf16 %v4364_v59  ;;  %v4365_v26 = vunpack.i.l.bf16 %v4364_v59 }
 0x7ec   : > { %3678 = vmatprep.subr.bf16.mxu1 %v3598_v43  ;;  %v3240_v55 = vsel %vm2589_vm15, %v4355_v9, %v4356_v37  ;;  %v4295_v63 = vunpack.i.l.bf16 %v5985_v36  ;;  %v3595_v18 = vpack.c.bf16 %v3117_v38, %v3113_v34  ;;  %3635 = vmatprep.subr.bf16.mxu0 %v3596_v31  ;;  %v3236_v32 = vsel %vm2589_vm15, %v4270_v62, %v4271_v14 }
 0x7ed   : > { %v3602_v4 = vpack.c.bf16 %v3242_v53, %v3238_v50  ;;  %v3235_v5 = vsel %vm2589_vm15, %v4365_v26, %v4270_v62  ;;  %v3239_v21 = vsel %vm2589_vm15, %v4366_v25, %v4355_v9  ;;  %v3359_v28 = vsel %vm2656_vm14, %v4281_v57, %v4285_v35 }
 0x7ee   : > { %v4379_v7 = vpop.permute.xlu0 %4378  ;;  %v3601_v56 = vpack.c.bf16 %v3241_v60, %v3237_v61  ;;  %v4374_v44 = vpop.permute.xlu1 %4373  ;;  %v3600_v36 = vpack.c.bf16 %v3240_v55, %v3236_v32  ;;  %v3360_v10 = vsel %vm2656_vm14, %v4285_v35, %v4286_v13  ;;  %v3599_v51 = vpack.c.bf16 %v3239_v21, %v3235_v5 }
 0x7ef   : > { %3679 = vmatpush1.bf16.msra.mxu1 %v3597_v16  ;;  %v4381_v46 = vunpack.i.h.bf16 %v4379_v7  ;;  %v4380_v17 = vunpack.i.l.bf16 %v4379_v7  ;;  %3636 = vmatpush1.bf16.msra.mxu0 %v3595_v18  ;;  %v4376_v14 = vunpack.i.h.bf16 %v4374_v44  ;;  %v4375_v50 = vunpack.i.l.bf16 %v4374_v44  ;;  %v4400_v16 = vld [vmem:[%s6253_s5] ss:$8 sps:$4 sm:$0xff]  }
 0x7f0   : > { %3680 = vmatprep.subr.bf16.mxu1 %v3602_v4  ;;  %v3362_v30 = vsel %vm2656_vm14, %v4370_v20, %v4371_v2  ;;  %v4291_v23 = vunpack.i.h.bf16 %v6031_v42  ;;  %v4290_v47 = vunpack.i.l.bf16 %v6031_v42  ;;  %3637 = vmatprep.subr.bf16.mxu0 %v3600_v36  ;;  %v3482_v29 = vsel %vm2532_vm9, %v4295_v63, %v4296_v11 }
 0x7f1   : > { %v3357_v57 = vsel %vm2656_vm14, %v4380_v17, %v4280_v48  ;;  %v3361_v3 = vsel %vm2656_vm14, %v4381_v46, %v4370_v20  ;;  %v3363_v62 = vsel %vm2656_vm14, %v4371_v2, %v4375_v50  ;;  %v3364_v52 = vsel %vm2656_vm14, %v4375_v50, %v4376_v14 }
 0x7f2   : > { %v4389_v41 = vpop.permute.xlu0 %4388  ;;  %v3605_v49 = vpack.c.bf16 %v3363_v62, %v3359_v28  ;;  %v4384_v37 = vpop.permute.xlu1 %4383  ;;  %v3604_v9 = vpack.c.bf16 %v3362_v30, %v6127_v40  ;;  %v3606_v42 = vpack.c.bf16 %v3364_v52, %v3360_v10  ;;  %v3603_v8 = vpack.c.bf16 %v3361_v3, %v3357_v57 }
 0x7f3   : > { %3681 = vmatpush1.bf16.msra.mxu1 %v3601_v56  ;;  %v4391_v24 = vunpack.i.h.bf16 %v4389_v41  ;;  %v4390_v45 = vunpack.i.l.bf16 %v4389_v41  ;;  %3638 = vmatpush1.bf16.msra.mxu0 %v3599_v51  ;;  %v4386_v48 = vunpack.i.h.bf16 %v4384_v37  ;;  %v4385_v61 = vunpack.i.l.bf16 %v4384_v37 }
 0x7f4   : > { %3639 = vmatprep.subr.bf16.mxu0 %v3604_v9  ;;  %3682 = vmatprep.subr.bf16.mxu1 %v3606_v42  ;;  %v3481_v27 = vsel %vm2532_vm9, %v4291_v23, %v4295_v63  ;;  %v3480_v35 = vsel %vm2532_vm9, %v4290_v47, %v4291_v23 }
 0x7f5   : > { %v3486_v13 = vsel %vm2532_vm9, %v4390_v45, %v4391_v24  ;;  %v3485_v43 = vsel %vm2532_vm9, %v4386_v48, %v4390_v45  ;;  %v3484_v40 = vsel %vm2532_vm9, %v4385_v61, %v4386_v48 }
 0x7f6   : > { %v3610_v12 = vpack.c.bf16 %v3486_v13, %v3482_v29  ;;  %v3609_v34 = vpack.c.bf16 %v3485_v43, %v3481_v27  ;;  %v4394_v11 = vpop.permute.xlu1 %4393  ;;  %v3608_v38 = vpack.c.bf16 %v3484_v40, %v3480_v35 }
 0x7f7   : > { %3683 = vmatpush1.bf16.msra.mxu1 %v3605_v49  ;;  %3640 = vmatpush1.bf16.msra.mxu0 %v3603_v8  ;;  %v4396_v22 = vunpack.i.h.bf16 %v4394_v11  ;;  %v4395_v53 = vunpack.i.l.bf16 %v4394_v11 }
 0x7f8   : > { %3684 = vmatprep.subr.bf16.mxu1 %v3610_v12  ;;  %3641 = vmatprep.subr.bf16.mxu0 %v3608_v38 }
 0x7f9   : > { %v3479_v60 = vsel %vm2532_vm9, %v4395_v53, %v4290_v47  ;;  %v3483_v2 = vsel %vm2532_vm9, %v4396_v22, %v4385_v61 }
 0x7fa   : > { %v3607_v59 = vpack.c.bf16 %v3483_v2, %v3479_v60 }
 0x7fb   : > { %3685 = vmatpush1.bf16.msra.mxu1 %v3609_v34 }
 0x7fc   : > { %3642 = vmatpush1.bf16.msra.mxu0 %v3607_v59 }
 0x7fe   : > { %3701 = vmatmul.mubr.bf16.vlgmr.msra.gmra.mrb[12].mxu1 %v4400_v16 }
 0x7ff   : > { %3658 = vmatmul.mubr.bf16.vlgmr.msra.gmra.mrb[12].mxu0 %v4400_v16 }
 0x8d1   : > { %v6181_v31 = vpop.f32.mrb[12].mxu1 }
 0x8d2   : > { %v3771_v39 = vmul.f32 %v6181_v31, %v6181_v31  ;;  %v6185_v20 = vpop.f32.mrb[13].mxu1  ;;  %v6193_v63 = vpop.f32.mrb[12].mxu0 }
 0x8d3   : > { %v3763_v25 = vadd.f32 %v6185_v20, %v6181_v31  ;;  %v3772_v26 = vmul.f32 %v6185_v20, %v6185_v20  ;;  %v6191_v55 = vpop.f32.mrb[14].mxu1  ;;  %v3719_v32 = vmul.f32 %v6193_v63, %v6193_v63  ;;  %v3661_v4 = vpop.f32.mrb[13].mxu0 }
 0x8d4   : > { %v3773_v18 = vmul.f32 %v6191_v55, %v6191_v55  ;;  %v6197_v7 = vpop.f32.mrb[15].mxu1  ;;  %v3711_v17 = vadd.f32 %v3661_v4, %v6193_v63  ;;  %v3720_v28 = vmul.f32 %v3661_v4, %v3661_v4  ;;  %v6206_v56 = vpop.f32.mrb[14].mxu0 }
 0x8d5   : > { %v3766_v5 = vadd.f32 %v6197_v7, %v6191_v55  ;;  %v3774_v21 = vmul.f32 %v6197_v7, %v6197_v7  ;;  %v3775_v46 = vadd.f32 %v3772_v26, %v3771_v39  ;;  %v3721_v44 = vmul.f32 %v6206_v56, %v6206_v56  ;;  %v6210_v36 = vpop.f32.mrb[15].mxu0 }
 0x8d6   : > { %v3714_v51 = vadd.f32 %v6210_v36, %v6206_v56  ;;  %v3722_v14 = vmul.f32 %v6210_v36, %v6210_v36  ;;  %3712 = vadd.xlane.f32.xlu0 %v3711_v17  ;;  %v3723_v50 = vadd.f32 %v3720_v28, %v3719_v32 }
 0x8d7   : > { %v3778_v10 = vadd.f32 %v3774_v21, %v3773_v18 }
 0x8d8   : > { %v3726_v30 = vadd.f32 %v3722_v14, %v3721_v44  ;;  %3715 = vadd.xlane.f32.xlu1 %v3714_v51 }
 0x8da   : > { %3764 = vadd.xlane.f32.xlu0 %v3763_v25 }
 0x8dc   : > { %3724 = vadd.xlane.f32.xlu1 %v3723_v50 }
 0x8de   : > { %3767 = vadd.xlane.f32.xlu0 %v3766_v5 }
 0x8e0   : > { %3776 = vadd.xlane.f32.xlu1 %v3775_v46 }
 0x8e2   : > { %3727 = vadd.xlane.f32.xlu0 %v3726_v30 }
 0x8e6   : > { %3779 = vadd.xlane.f32.xlu0 %v3778_v10 }
 0x963   : > { %v3713_v23 = vpop.xlane.xlu0 %3712 }
 0x964   : > { %v3717_v57 = vmul.f32 0.00390625, %v3713_v23 }
 0x965   : > { %v3716_v47 = vpop.xlane.xlu1 %3715 }
 0x966   : > { %v3731_v24 = vmul.f32 %v3717_v57, %v3717_v57  ;;  %v3718_v52 = vmul.f32 0.00390625, %v3716_v47  ;;  %v3735_v16 = vsub.f32 %v6193_v63, %v3717_v57  ;;  %v3736_v60 = vsub.f32 %v3661_v4, %v3717_v57 }
 0x967   : > { %v3765_v3 = vpop.xlane.xlu0 %3764 }
 0x968   : > { %v3769_v62 = vmul.f32 0.00390625, %v3765_v3  ;;  %v3732_v61 = vmul.f32 %v3718_v52, %v3718_v52  ;;  %v3737_v63 = vsub.f32 %v6206_v56, %v3718_v52  ;;  %v3738_v4 = vsub.f32 %v6210_v36, %v3718_v52 }
 0x969   : > { %v3725_v41 = vpop.xlane.xlu1 %3724 }
 0x96a   : > { %v3729_v45 = vmul.f32 0.00390625, %v3725_v41  ;;  %v3783_v29 = vmul.f32 %v3769_v62, %v3769_v62  ;;  %v3787_v25 = vsub.f32 %v6181_v31, %v3769_v62  ;;  %v3788_v26 = vsub.f32 %v6185_v20, %v3769_v62 }
 0x96b   : > { %v3768_v49 = vpop.xlane.xlu0 %3767 }
 0x96c   : > { %v3733_v37 = vsub.f32 %v3729_v45, %v3731_v24  ;;  %v3770_v13 = vmul.f32 0.00390625, %v3768_v49 }
 0x96d   : > { %v3777_v9 = vpop.xlane.xlu1 %3776 }
 0x96e   : > { %v3739_v42 = vadd.f32 1e-05, %v3733_v37  ;;  %v3781_v8 = vmul.f32 0.00390625, %v3777_v9  ;;  %v3784_v11 = vmul.f32 %v3770_v13, %v3770_v13  ;;  %v3789_v56 = vsub.f32 %v6191_v55, %v3770_v13 }
 0x96f   : > { %v3728_v48 = vpop.xlane.xlu0 %3727  ;;  %v3790_v36 = vsub.f32 %v6197_v7, %v3770_v13 }
 0x970   : > { %4417 = vrsqrt.f32 %v3739_v42  ;;  %v3785_v12 = vsub.f32 %v3781_v8, %v3783_v29  ;;  %v3730_v27 = vmul.f32 0.00390625, %v3728_v48 }
 0x972   : > { %v3791_v43 = vadd.f32 1e-05, %v3785_v12  ;;  %v3734_v35 = vsub.f32 %v3730_v27, %v3732_v61 }
 0x973   : > { %v3780_v40 = vpop.xlane.xlu0 %3779 }
 0x974   : > { %4419 = vrsqrt.f32 %v3791_v43  ;;  %v3740_v34 = vadd.f32 1e-05, %v3734_v35  ;;  %v3782_v38 = vmul.f32 0.00390625, %v3780_v40 }
 0x976   : > { %4421 = vrsqrt.f32 %v3740_v34  ;;  %v3786_v22 = vsub.f32 %v3782_v38, %v3784_v11 }
 0x978   : > { %v3792_v53 = vadd.f32 1e-05, %v3786_v22 }
 0x97a   : > { %v4418_v2 = vpop.eup %4417  ;;  %4423 = vrsqrt.f32 %v3792_v53 }
 0x97b   : > { %v3743_v59 = vmul.f32 %v4418_v2, %v3735_v16  ;;  %v3744_v39 = vmul.f32 %v4418_v2, %v3736_v60 }
 0x97d   : > { %v3747_v18 = vmax.f32 %v3743_v59, 0.0  ;;  %v3748_v32 = vmax.f32 %v3744_v39, 0.0 }
 0x97e   : > { %v4420_v5 = vpop.eup %4419 }
 0x97f   : > { %v3755_v21 = vadd.f32 %v3747_v18, %v5632_v19  ;;  %v3756_v31 = vadd.f32 %v3748_v32, %v5634_v0  ;;  %v3795_v46 = vmul.f32 %v4420_v5, %v3787_v25  ;;  %v3796_v20 = vmul.f32 %v4420_v5, %v3788_v26 }
 0x980   : > { %v4422_v17 = vpop.eup %4421 }
 0x981   : > { %3759 = vst [vmem:[%s6223_s9] sm:$0xff] %v3755_v21  ;;  %3760 = vst [vmem:[%s6223_s9 + $0x8] sm:$0xff] %v3756_v31  ;;  %v3799_v28 = vmax.f32 %v3795_v46, 0.0  ;;  %v3800_v44 = vmax.f32 %v3796_v20, 0.0  ;;  %v3745_v10 = vmul.f32 %v4422_v17, %v3737_v63  ;;  %v3746_v51 = vmul.f32 %v4422_v17, %v3738_v4 }
 0x983   : > { %v3807_v19 = vadd.f32 %v3799_v28, %v5644_v33  ;;  %v3808_v0 = vadd.f32 %v3800_v44, %v5646_v54  ;;  %v3749_v14 = vmax.f32 %v3745_v10, 0.0  ;;  %v3750_v50 = vmax.f32 %v3746_v51, 0.0 }
 0x984   : > { %v4424_v30 = vpop.eup %4423 }
 0x985   : > { %3811 = vst [vmem:[%s6223_s9 + $0x10] sm:$0xff] %v3807_v19  ;;  %3812 = vst [vmem:[%s6223_s9 + $0x18] sm:$0xff] %v3808_v0  ;;  %v3757_v23 = vadd.f32 %v3749_v14, %v5737_v58  ;;  %v3758_v47 = vadd.f32 %v3750_v50, %v5742_v1  ;;  %v3797_v57 = vmul.f32 %v4424_v30, %v3789_v56 }
 0x986   : > { %v3798_v3 = vmul.f32 %v4424_v30, %v3790_v36 }
 0x987   : > { %3761 = vst [vmem:[%s6223_s9 + $0x20] sm:$0xff] %v3757_v23  ;;  %3762 = vst [vmem:[%s6223_s9 + $0x28] sm:$0xff] %v3758_v47  ;;  %v3801_v55 = vmax.f32 %v3797_v57, 0.0 }
 0x988   : > { %v3802_v7 = vmax.f32 %v3798_v3, 0.0 }
 0x989   : > { %v3809_v33 = vadd.f32 %v3801_v55, %v5748_v15 }
 0x98a   : > { %v3810_v54 = vadd.f32 %v3802_v7, %v5750_v6 }
 0x98b   : > { %3813 = vst [vmem:[%s6223_s9 + $0x30] sm:$0xff] %v3809_v33 }
 0x98c   : > { %3814 = vst [vmem:[%s6223_s9 + $0x38] sm:$0xff] %v3810_v54 }
 0x98d PF: > { %s17_s21 = sadd.s32 1, %s4463_s21  }
 0x98e   : > { %p14_p3 = scmp.ge.s32.totalorder %s17_s21, 4  }
 0x990   :  { %16 = sbr.rel (!%p14_p3) target bundleno = 1 (0x1), region = 79 }
 0x997   :  { %3836 = vsyncpa [#allocation5], 1 }
 0x998   :  { %3838 = vsyncpa [#allocation5 + $0x1], 1 }

</bundles_post_ra>
